<compile_context>
chip_gen: v7x
topology: tpu7x:2x2x1
jax: 0.10.0
libtpu: 0.0.40
codegen_flags: <defaults>
</compile_context>

<pallas_src>
import numpy as np

import jax
import jax.numpy as jnp
from jax.experimental import pallas as pl
from jax.experimental.pallas import tpu as pltpu


# ------------------------------ fused Pallas kernel ------------------------------

def _cnn_fused_kernel(x_ref, w1_ref, b1_ref, w2_ref, b2_ref, w3_ref, b3_ref, o_ref):
    # x_ref : (32, 32)  bf16  padded 28x28 image, rows pre-grouped by (row mod 4)
    # w1_ref: (2, 5, 32, 224) bf16 banded conv1 weights   [col-parity, dy, x_col, q*16+c]
    # b1_ref: (1, 224) f32    conv1 bias tiled over the 14 pooled columns
    # w2_ref: (2, 5, 224, 224) bf16 banded conv2 weights  [col-parity, dy, q1*16+c1, q2*32+c2]
    # b2_ref: (1, 224) f32    conv2 bias tiled over the 7 pooled columns
    # w3_ref: (7, 224, 128) bf16 Linear weights, rows pre-permuted to (h, w, c) order
    # b3_ref: (1, 128) f32    Linear bias (lane-padded 10 -> 128)
    # o_ref : (8, 128)  f32   logits (row 0 meaningful), lane-dense store
    f32 = jnp.float32
    x = x_ref[...]                                     # (32, 32) bf16

    def xslab(d):
        # padded-image rows {d, d+4, ..., d+24} -> contiguous because rows are mod-4 grouped
        base = 8 * (d % 4) + d // 4
        return x[base:base + 7, :]                     # (7, 32)

    def conv1_half(d0):
        # d0 = 0 -> pooled rows 0,2,...,12 ; d0 = 2 -> pooled rows 1,3,...,13
        acc = None
        for rp in range(2):                            # row inside the 2x2 pool window
            for par in range(2):                       # column parity of the pool window
                a = jnp.zeros((7, 224), f32)
                for dy in range(5):
                    a = a + jnp.dot(xslab(d0 + rp + dy), w1_ref[par, dy],
                                    preferred_element_type=f32)
                acc = a if acc is None else jnp.maximum(acc, a)
        # bias + ReLU commute with the max-pool (per-channel bias, ReLU monotone)
        return jnp.maximum(acc + b1_ref[...], 0.0).astype(jnp.bfloat16)   # (7, 224)

    h_even = conv1_half(0)                             # pooled conv1 rows 0,2,...,12
    h_odd = conv1_half(2)                              # pooled conv1 rows 1,3,...,13

    # parity-split planes of the (2-halo) padded conv2 input: rows 0 and 8 are the halo zeros
    zrow = jnp.zeros((1, 224), jnp.bfloat16)
    plane_e = jnp.concatenate([zrow, h_even, zrow], axis=0)   # (9, 224): h1_pad rows 0,2,...,16
    plane_o = jnp.concatenate([zrow, h_odd, zrow], axis=0)    # (9, 224): h1_pad rows 1,3,...,17

    def hslab(d):
        # h1_pad rows {d, d+2, ..., d+12} -> contiguous slice of the parity-d plane
        src = plane_e if d % 2 == 0 else plane_o
        return src[d // 2: d // 2 + 7, :]              # (7, 224)

    acc2 = None
    for rp in range(2):
        for par in range(2):
            a = jnp.zeros((7, 224), f32)
            for dy in range(5):
                a = a + jnp.dot(hslab(rp + dy), w2_ref[par, dy],
                                preferred_element_type=f32)
            acc2 = a if acc2 is None else jnp.maximum(acc2, a)
    pooled2 = jnp.maximum(acc2 + b2_ref[...], 0.0).astype(jnp.bfloat16)   # (7, 224)

    # fused Linear: logits = sum_p pooled2[p, :] @ w3[p]  (flatten never materialized)
    logits = b3_ref[...]                                # (1, 128) f32
    for p in range(7):
        logits = logits + jnp.dot(pooled2[p:p + 1, :], w3_ref[p],
                                  preferred_element_type=f32)
    o_ref[...] = jnp.broadcast_to(logits, (8, 128)).astype(o_ref.dtype)


# --------------------------------- forward wrapper --------------------------------

@jax.jit
def cnn_forward(x_nchw, kparams):
    N = x_nchw.shape[0]
    x = x_nchw.reshape(N, 28, 28).astype(jnp.float32)
    xp = jnp.pad(x, ((0, 0), (2, 2), (2, 2)))                     # 2-pixel halo -> (N, 32, 32)
    # group rows by (row mod 4) so every in-kernel row slab is a contiguous static slice
    xp = xp.reshape(N, 8, 4, 32).transpose(0, 2, 1, 3).reshape(N * 32, 32)
    xp = xp.astype(jnp.bfloat16)

    flops = N * 2 * (28 * 28 * 25 * 16 + 14 * 14 * 25 * 16 * 32 + 1568 * 10)
    bytes_accessed = (N * (32 * 32 * 2 + 8 * 128 * 4)
                      + 2 * 5 * 32 * 224 * 2 + 2 * 5 * 224 * 224 * 2 + 7 * 224 * 128 * 2)

    out = pl.pallas_call(
        _cnn_fused_kernel,
        out_shape=jax.ShapeDtypeStruct((N * 8, 128), jnp.float32),
        grid=(N,),
        in_specs=[
            pl.BlockSpec((32, 32), lambda i: (i, 0)),                 # per-image padded input
            pl.BlockSpec((2, 5, 32, 224), lambda i: (0, 0, 0, 0)),    # conv1 banded weights
            pl.BlockSpec((1, 224), lambda i: (0, 0)),                 # conv1 bias (tiled)
            pl.BlockSpec((2, 5, 224, 224), lambda i: (0, 0, 0, 0)),   # conv2 banded weights
            pl.BlockSpec((1, 224), lambda i: (0, 0)),                 # conv2 bias (tiled)
            pl.BlockSpec((7, 224, 128), lambda i: (0, 0, 0)),         # linear weights (permuted)
            pl.BlockSpec((1, 128), lambda i: (0, 0)),                 # linear bias (padded)
        ],
        out_specs=pl.BlockSpec((8, 128), lambda i: (i, 0)),
        compiler_params=pltpu.CompilerParams(
            dimension_semantics=("parallel",),
            vmem_limit_bytes=32 * 1024 * 1024,
        ),
        cost_estimate=pl.CostEstimate(
            flops=int(flops), transcendentals=0, bytes_accessed=int(bytes_accessed)),
    )(xp, kparams["w1b"], kparams["b1t"], kparams["w2b"], kparams["b2t"],
      kparams["w3k"], kparams["b3p"])
    return out.reshape(N, 8, 128)[:, 0, :10]


# --------------------------------- parameter prep ---------------------------------

def init_params(key):
    """Parameters in PyTorch layout: conv OIHW, linear (out_features, in_features)."""
    k1, k2, k3, k4, k5, k6 = jax.random.split(key, 6)
    return {
        "w1": jax.random.normal(k1, (16, 1, 5, 5), jnp.float32) * 0.1,
        "b1": jax.random.normal(k2, (16,), jnp.float32) * 0.1,
        "w2": jax.random.normal(k3, (32, 16, 5, 5), jnp.float32) * 0.05,
        "b2": jax.random.normal(k4, (32,), jnp.float32) * 0.1,
        "w3": jax.random.normal(k5, (10, 1568), jnp.float32) * 0.02,
        "b3": jax.random.normal(k6, (10,), jnp.float32) * 0.1,
    }


def _conv_band_weights(w_oihw, col_lo, col_hi, Q):
    """Banded conv weights: out[par, dy, (x-col_lo)*Cin+ci, q*Cout+co] = w[co,ci,dy,dx],
    with x = 2q + par + dx (the padded input column feeding pooled output column q)."""
    w = np.asarray(w_oihw, np.float32)                  # (Cout, Cin, 5, 5)
    cout, cin, kh, kw = w.shape
    k = (col_hi - col_lo) * cin
    out = np.zeros((2, kh, k, Q * cout), np.float32)
    for par in range(2):
        for dy in range(kh):
            for q in range(Q):
                for dx in range(kw):
                    x = 2 * q + par + dx
                    if col_lo <= x < col_hi:
                        out[par, dy,
                            (x - col_lo) * cin:(x - col_lo + 1) * cin,
                            q * cout:(q + 1) * cout] = w[:, :, dy, dx].T
    return out


def prepare_params(params):
    """One-time host-side conversion of PyTorch-layout params to the kernel layout."""
    # conv1: padded input columns x in [0,32); conv2: only the 14 data columns (x in [2,16))
    w1b = _conv_band_weights(params["w1"], 0, 32, 14)   # (2, 5, 32, 224)
    w2b = _conv_band_weights(params["w2"], 2, 16, 7)    # (2, 5, 224, 224)

    # Linear rows re-ordered from PyTorch NCHW flatten (c*49 + h*7 + w) to (h, w*32 + c)
    w3 = np.asarray(params["w3"], np.float32)           # (10, 1568)
    w3k = np.zeros((7, 224, 128), np.float32)
    for p in range(7):
        for q in range(7):
            for c in range(32):
                w3k[p, q * 32 + c, :10] = w3[:, c * 49 + p * 7 + q]

    b1t = np.tile(np.asarray(params["b1"], np.float32), 14).reshape(1, 224)
    b2t = np.tile(np.asarray(params["b2"], np.float32), 7).reshape(1, 224)
    b3p = np.zeros((1, 128), np.float32)
    b3p[0, :10] = np.asarray(params["b3"], np.float32)

    return {
        "w1b": jnp.asarray(w1b, jnp.bfloat16),
        "b1t": jnp.asarray(b1t),
        "w2b": jnp.asarray(w2b, jnp.bfloat16),
        "b2t": jnp.asarray(b2t),
        "w3k": jnp.asarray(w3k, jnp.bfloat16),
        "b3p": jnp.asarray(b3p),
    }


# -------------------------------- pure-JAX reference -------------------------------

def _reference_forward(x, params):
    def conv(h, w, b):
        y = jax.lax.conv_general_dilated(h, w, window_strides=(1, 1),
                                         padding=((2, 2), (2, 2)),
                                         dimension_numbers=("NCHW", "OIHW", "NCHW"))
        return jax.nn.relu(y + b[None, :, None, None])

    def pool(h):
        return jax.lax.reduce_window(h, -jnp.inf, jax.lax.max,
                                     (1, 1, 2, 2), (1, 1, 2, 2), "VALID")

    h = pool(conv(x, params["w1"], params["b1"]))
    h = pool(conv(h, params["w2"], params["b2"]))
    h = h.reshape(h.shape[0], -1)
    return h @ params["w3"].T + params["b3"]


if __name__ == "__main__":
    key = jax.random.PRNGKey(0)
    kx, kp = jax.random.split(key)
    # MNIST geometry: 1x28x28 input so the flatten yields 1568 = 32*7*7
    x = jax.random.normal(kx, (2, 1, 28, 28), jnp.float32)
    params = init_params(kp)
    kparams = prepare_params(params)

    out = cnn_forward(x, kparams)
    jax.block_until_ready(out)
    assert out.shape == (2, 10) and out.dtype == jnp.float32

    ref = _reference_forward(x, params)
    err = float(jnp.max(jnp.abs(out - ref)))
    # bf16 matmul operands with f32 accumulation: expect ~1e-3 level absolute error
    assert err < 5e-2, f"max abs error vs f32 reference too large: {err}"
    print("KERNEL_OK")
</pallas_src>

<mosaic_0001>
module attributes {stable_mosaic.version = 11 : i64} {
  func.func @_cnn_fused_kernel(%arg0: i32, %arg1: memref<32x32xbf16, #tpu.memory_space<vmem>>, %arg2: memref<2x5x32x224xbf16, #tpu.memory_space<vmem>>, %arg3: memref<1x224xf32, #tpu.memory_space<vmem>>, %arg4: memref<2x5x224x224xbf16, #tpu.memory_space<vmem>>, %arg5: memref<1x224xf32, #tpu.memory_space<vmem>>, %arg6: memref<7x224x128xbf16, #tpu.memory_space<vmem>>, %arg7: memref<1x128xf32, #tpu.memory_space<vmem>>, %arg8: memref<8x128xf32, #tpu.memory_space<vmem>>) attributes {dimension_semantics = [#tpu.dimension_semantics<parallel>], iteration_bounds = array<i64: 2>, scalar_prefetch = 0 : i64, scratch_operands = 0 : i64, tpu.core_type = #tpu.core_type<tc>, window_params = [{transform_indices = @transform_0, window_bounds = array<i64: 32, 32>}, {pipeline_mode = #tpu.pipeline_mode<synchronous>, transform_indices = @transform_1, window_bounds = array<i64: 2, 5, 32, 224>}, {pipeline_mode = #tpu.pipeline_mode<synchronous>, transform_indices = @transform_2, window_bounds = array<i64: 1, 224>}, {pipeline_mode = #tpu.pipeline_mode<synchronous>, transform_indices = @transform_3, window_bounds = array<i64: 2, 5, 224, 224>}, {pipeline_mode = #tpu.pipeline_mode<synchronous>, transform_indices = @transform_4, window_bounds = array<i64: 1, 224>}, {pipeline_mode = #tpu.pipeline_mode<synchronous>, transform_indices = @transform_5, window_bounds = array<i64: 7, 224, 128>}, {pipeline_mode = #tpu.pipeline_mode<synchronous>, transform_indices = @transform_6, window_bounds = array<i64: 1, 128>}, {transform_indices = @transform_7, window_bounds = array<i64: 8, 128>}]} {
    %c0 = arith.constant 0 : index
    %c0_0 = arith.constant 0 : index
    %0 = vector.load %arg1[%c0, %c0_0] : memref<32x32xbf16, #tpu.memory_space<vmem>>, vector<32x32xbf16>
    %cst = arith.constant 0.000000e+00 : f32
    %1 = vector.broadcast %cst : f32 to vector<7x224xf32>
    %2 = vector.extract_strided_slice %0 {offsets = [0, 0], sizes = [7, 32], strides = [1, 1]} : vector<32x32xbf16> to vector<7x32xbf16>
    %c0_1 = arith.constant 0 : index
    %c0_2 = arith.constant 0 : index
    %c0_3 = arith.constant 0 : index
    %c0_4 = arith.constant 0 : index
    %3 = vector.load %arg2[%c0_1, %c0_2, %c0_3, %c0_4] : memref<2x5x32x224xbf16, #tpu.memory_space<vmem>>, vector<1x1x32x224xbf16>
    %4 = vector.shape_cast %3 : vector<1x1x32x224xbf16> to vector<32x224xbf16>
    %cst_5 = arith.constant dense<0.000000e+00> : vector<7x224xf32>
    %5 = tpu.matmul %2, %4, %cst_5 {dimension_numbers = #tpu.dot_dimension_numbers<[1], [0], [0], [1], [0, 0, 1, 1], [], []>} : vector<7x32xbf16>, vector<32x224xbf16>, vector<7x224xf32> -> vector<7x224xf32>
    %6 = arith.addf %1, %5 : vector<7x224xf32>
    %7 = vector.extract_strided_slice %0 {offsets = [8, 0], sizes = [7, 32], strides = [1, 1]} : vector<32x32xbf16> to vector<7x32xbf16>
    %c0_6 = arith.constant 0 : index
    %c1 = arith.constant 1 : index
    %c0_7 = arith.constant 0 : index
    %c0_8 = arith.constant 0 : index
    %8 = vector.load %arg2[%c0_6, %c1, %c0_7, %c0_8] : memref<2x5x32x224xbf16, #tpu.memory_space<vmem>>, vector<1x1x32x224xbf16>
    %9 = vector.shape_cast %8 : vector<1x1x32x224xbf16> to vector<32x224xbf16>
    %cst_9 = arith.constant dense<0.000000e+00> : vector<7x224xf32>
    %10 = tpu.matmul %7, %9, %cst_9 {dimension_numbers = #tpu.dot_dimension_numbers<[1], [0], [0], [1], [0, 0, 1, 1], [], []>} : vector<7x32xbf16>, vector<32x224xbf16>, vector<7x224xf32> -> vector<7x224xf32>
    %11 = arith.addf %6, %10 : vector<7x224xf32>
    %12 = vector.extract_strided_slice %0 {offsets = [16, 0], sizes = [7, 32], strides = [1, 1]} : vector<32x32xbf16> to vector<7x32xbf16>
    %c0_10 = arith.constant 0 : index
    %c2 = arith.constant 2 : index
    %c0_11 = arith.constant 0 : index
    %c0_12 = arith.constant 0 : index
    %13 = vector.load %arg2[%c0_10, %c2, %c0_11, %c0_12] : memref<2x5x32x224xbf16, #tpu.memory_space<vmem>>, vector<1x1x32x224xbf16>
    %14 = vector.shape_cast %13 : vector<1x1x32x224xbf16> to vector<32x224xbf16>
    %cst_13 = arith.constant dense<0.000000e+00> : vector<7x224xf32>
    %15 = tpu.matmul %12, %14, %cst_13 {dimension_numbers = #tpu.dot_dimension_numbers<[1], [0], [0], [1], [0, 0, 1, 1], [], []>} : vector<7x32xbf16>, vector<32x224xbf16>, vector<7x224xf32> -> vector<7x224xf32>
    %16 = arith.addf %11, %15 : vector<7x224xf32>
    %17 = vector.extract_strided_slice %0 {offsets = [24, 0], sizes = [7, 32], strides = [1, 1]} : vector<32x32xbf16> to vector<7x32xbf16>
    %c0_14 = arith.constant 0 : index
    %c3 = arith.constant 3 : index
    %c0_15 = arith.constant 0 : index
    %c0_16 = arith.constant 0 : index
    %18 = vector.load %arg2[%c0_14, %c3, %c0_15, %c0_16] : memref<2x5x32x224xbf16, #tpu.memory_space<vmem>>, vector<1x1x32x224xbf16>
    %19 = vector.shape_cast %18 : vector<1x1x32x224xbf16> to vector<32x224xbf16>
    %cst_17 = arith.constant dense<0.000000e+00> : vector<7x224xf32>
    %20 = tpu.matmul %17, %19, %cst_17 {dimension_numbers = #tpu.dot_dimension_numbers<[1], [0], [0], [1], [0, 0, 1, 1], [], []>} : vector<7x32xbf16>, vector<32x224xbf16>, vector<7x224xf32> -> vector<7x224xf32>
    %21 = arith.addf %16, %20 : vector<7x224xf32>
    %22 = vector.extract_strided_slice %0 {offsets = [1, 0], sizes = [7, 32], strides = [1, 1]} : vector<32x32xbf16> to vector<7x32xbf16>
    %c0_18 = arith.constant 0 : index
    %c4 = arith.constant 4 : index
    %c0_19 = arith.constant 0 : index
    %c0_20 = arith.constant 0 : index
    %23 = vector.load %arg2[%c0_18, %c4, %c0_19, %c0_20] : memref<2x5x32x224xbf16, #tpu.memory_space<vmem>>, vector<1x1x32x224xbf16>
    %24 = vector.shape_cast %23 : vector<1x1x32x224xbf16> to vector<32x224xbf16>
    %cst_21 = arith.constant dense<0.000000e+00> : vector<7x224xf32>
    %25 = tpu.matmul %22, %24, %cst_21 {dimension_numbers = #tpu.dot_dimension_numbers<[1], [0], [0], [1], [0, 0, 1, 1], [], []>} : vector<7x32xbf16>, vector<32x224xbf16>, vector<7x224xf32> -> vector<7x224xf32>
    %26 = arith.addf %21, %25 : vector<7x224xf32>
    %cst_22 = arith.constant 0.000000e+00 : f32
    %27 = vector.broadcast %cst_22 : f32 to vector<7x224xf32>
    %28 = vector.extract_strided_slice %0 {offsets = [0, 0], sizes = [7, 32], strides = [1, 1]} : vector<32x32xbf16> to vector<7x32xbf16>
    %c1_23 = arith.constant 1 : index
    %c0_24 = arith.constant 0 : index
    %c0_25 = arith.constant 0 : index
    %c0_26 = arith.constant 0 : index
    %29 = vector.load %arg2[%c1_23, %c0_24, %c0_25, %c0_26] : memref<2x5x32x224xbf16, #tpu.memory_space<vmem>>, vector<1x1x32x224xbf16>
    %30 = vector.shape_cast %29 : vector<1x1x32x224xbf16> to vector<32x224xbf16>
    %cst_27 = arith.constant dense<0.000000e+00> : vector<7x224xf32>
    %31 = tpu.matmul %28, %30, %cst_27 {dimension_numbers = #tpu.dot_dimension_numbers<[1], [0], [0], [1], [0, 0, 1, 1], [], []>} : vector<7x32xbf16>, vector<32x224xbf16>, vector<7x224xf32> -> vector<7x224xf32>
    %32 = arith.addf %27, %31 : vector<7x224xf32>
    %33 = vector.extract_strided_slice %0 {offsets = [8, 0], sizes = [7, 32], strides = [1, 1]} : vector<32x32xbf16> to vector<7x32xbf16>
    %c1_28 = arith.constant 1 : index
    %c1_29 = arith.constant 1 : index
    %c0_30 = arith.constant 0 : index
    %c0_31 = arith.constant 0 : index
    %34 = vector.load %arg2[%c1_28, %c1_29, %c0_30, %c0_31] : memref<2x5x32x224xbf16, #tpu.memory_space<vmem>>, vector<1x1x32x224xbf16>
    %35 = vector.shape_cast %34 : vector<1x1x32x224xbf16> to vector<32x224xbf16>
    %cst_32 = arith.constant dense<0.000000e+00> : vector<7x224xf32>
    %36 = tpu.matmul %33, %35, %cst_32 {dimension_numbers = #tpu.dot_dimension_numbers<[1], [0], [0], [1], [0, 0, 1, 1], [], []>} : vector<7x32xbf16>, vector<32x224xbf16>, vector<7x224xf32> -> vector<7x224xf32>
    %37 = arith.addf %32, %36 : vector<7x224xf32>
    %38 = vector.extract_strided_slice %0 {offsets = [16, 0], sizes = [7, 32], strides = [1, 1]} : vector<32x32xbf16> to vector<7x32xbf16>
    %c1_33 = arith.constant 1 : index
    %c2_34 = arith.constant 2 : index
    %c0_35 = arith.constant 0 : index
    %c0_36 = arith.constant 0 : index
    %39 = vector.load %arg2[%c1_33, %c2_34, %c0_35, %c0_36] : memref<2x5x32x224xbf16, #tpu.memory_space<vmem>>, vector<1x1x32x224xbf16>
    %40 = vector.shape_cast %39 : vector<1x1x32x224xbf16> to vector<32x224xbf16>
    %cst_37 = arith.constant dense<0.000000e+00> : vector<7x224xf32>
    %41 = tpu.matmul %38, %40, %cst_37 {dimension_numbers = #tpu.dot_dimension_numbers<[1], [0], [0], [1], [0, 0, 1, 1], [], []>} : vector<7x32xbf16>, vector<32x224xbf16>, vector<7x224xf32> -> vector<7x224xf32>
    %42 = arith.addf %37, %41 : vector<7x224xf32>
    %43 = vector.extract_strided_slice %0 {offsets = [24, 0], sizes = [7, 32], strides = [1, 1]} : vector<32x32xbf16> to vector<7x32xbf16>
    %c1_38 = arith.constant 1 : index
    %c3_39 = arith.constant 3 : index
    %c0_40 = arith.constant 0 : index
    %c0_41 = arith.constant 0 : index
    %44 = vector.load %arg2[%c1_38, %c3_39, %c0_40, %c0_41] : memref<2x5x32x224xbf16, #tpu.memory_space<vmem>>, vector<1x1x32x224xbf16>
    %45 = vector.shape_cast %44 : vector<1x1x32x224xbf16> to vector<32x224xbf16>
    %cst_42 = arith.constant dense<0.000000e+00> : vector<7x224xf32>
    %46 = tpu.matmul %43, %45, %cst_42 {dimension_numbers = #tpu.dot_dimension_numbers<[1], [0], [0], [1], [0, 0, 1, 1], [], []>} : vector<7x32xbf16>, vector<32x224xbf16>, vector<7x224xf32> -> vector<7x224xf32>
    %47 = arith.addf %42, %46 : vector<7x224xf32>
    %48 = vector.extract_strided_slice %0 {offsets = [1, 0], sizes = [7, 32], strides = [1, 1]} : vector<32x32xbf16> to vector<7x32xbf16>
    %c1_43 = arith.constant 1 : index
    %c4_44 = arith.constant 4 : index
    %c0_45 = arith.constant 0 : index
    %c0_46 = arith.constant 0 : index
    %49 = vector.load %arg2[%c1_43, %c4_44, %c0_45, %c0_46] : memref<2x5x32x224xbf16, #tpu.memory_space<vmem>>, vector<1x1x32x224xbf16>
    %50 = vector.shape_cast %49 : vector<1x1x32x224xbf16> to vector<32x224xbf16>
    %cst_47 = arith.constant dense<0.000000e+00> : vector<7x224xf32>
    %51 = tpu.matmul %48, %50, %cst_47 {dimension_numbers = #tpu.dot_dimension_numbers<[1], [0], [0], [1], [0, 0, 1, 1], [], []>} : vector<7x32xbf16>, vector<32x224xbf16>, vector<7x224xf32> -> vector<7x224xf32>
    %52 = arith.addf %47, %51 : vector<7x224xf32>
    %53 = arith.maximumf %26, %52 : vector<7x224xf32>
    %cst_48 = arith.constant 0.000000e+00 : f32
    %54 = vector.broadcast %cst_48 : f32 to vector<7x224xf32>
    %55 = vector.extract_strided_slice %0 {offsets = [8, 0], sizes = [7, 32], strides = [1, 1]} : vector<32x32xbf16> to vector<7x32xbf16>
    %c0_49 = arith.constant 0 : index
    %c0_50 = arith.constant 0 : index
    %c0_51 = arith.constant 0 : index
    %c0_52 = arith.constant 0 : index
    %56 = vector.load %arg2[%c0_49, %c0_50, %c0_51, %c0_52] : memref<2x5x32x224xbf16, #tpu.memory_space<vmem>>, vector<1x1x32x224xbf16>
    %57 = vector.shape_cast %56 : vector<1x1x32x224xbf16> to vector<32x224xbf16>
    %cst_53 = arith.constant dense<0.000000e+00> : vector<7x224xf32>
    %58 = tpu.matmul %55, %57, %cst_53 {dimension_numbers = #tpu.dot_dimension_numbers<[1], [0], [0], [1], [0, 0, 1, 1], [], []>} : vector<7x32xbf16>, vector<32x224xbf16>, vector<7x224xf32> -> vector<7x224xf32>
    %59 = arith.addf %54, %58 : vector<7x224xf32>
    %60 = vector.extract_strided_slice %0 {offsets = [16, 0], sizes = [7, 32], strides = [1, 1]} : vector<32x32xbf16> to vector<7x32xbf16>
    %c0_54 = arith.constant 0 : index
    %c1_55 = arith.constant 1 : index
    %c0_56 = arith.constant 0 : index
    %c0_57 = arith.constant 0 : index
    %61 = vector.load %arg2[%c0_54, %c1_55, %c0_56, %c0_57] : memref<2x5x32x224xbf16, #tpu.memory_space<vmem>>, vector<1x1x32x224xbf16>
    %62 = vector.shape_cast %61 : vector<1x1x32x224xbf16> to vector<32x224xbf16>
    %cst_58 = arith.constant dense<0.000000e+00> : vector<7x224xf32>
    %63 = tpu.matmul %60, %62, %cst_58 {dimension_numbers = #tpu.dot_dimension_numbers<[1], [0], [0], [1], [0, 0, 1, 1], [], []>} : vector<7x32xbf16>, vector<32x224xbf16>, vector<7x224xf32> -> vector<7x224xf32>
    %64 = arith.addf %59, %63 : vector<7x224xf32>
    %65 = vector.extract_strided_slice %0 {offsets = [24, 0], sizes = [7, 32], strides = [1, 1]} : vector<32x32xbf16> to vector<7x32xbf16>
    %c0_59 = arith.constant 0 : index
    %c2_60 = arith.constant 2 : index
    %c0_61 = arith.constant 0 : index
    %c0_62 = arith.constant 0 : index
    %66 = vector.load %arg2[%c0_59, %c2_60, %c0_61, %c0_62] : memref<2x5x32x224xbf16, #tpu.memory_space<vmem>>, vector<1x1x32x224xbf16>
    %67 = vector.shape_cast %66 : vector<1x1x32x224xbf16> to vector<32x224xbf16>
    %cst_63 = arith.constant dense<0.000000e+00> : vector<7x224xf32>
    %68 = tpu.matmul %65, %67, %cst_63 {dimension_numbers = #tpu.dot_dimension_numbers<[1], [0], [0], [1], [0, 0, 1, 1], [], []>} : vector<7x32xbf16>, vector<32x224xbf16>, vector<7x224xf32> -> vector<7x224xf32>
    %69 = arith.addf %64, %68 : vector<7x224xf32>
    %70 = vector.extract_strided_slice %0 {offsets = [1, 0], sizes = [7, 32], strides = [1, 1]} : vector<32x32xbf16> to vector<7x32xbf16>
    %c0_64 = arith.constant 0 : index
    %c3_65 = arith.constant 3 : index
    %c0_66 = arith.constant 0 : index
    %c0_67 = arith.constant 0 : index
    %71 = vector.load %arg2[%c0_64, %c3_65, %c0_66, %c0_67] : memref<2x5x32x224xbf16, #tpu.memory_space<vmem>>, vector<1x1x32x224xbf16>
    %72 = vector.shape_cast %71 : vector<1x1x32x224xbf16> to vector<32x224xbf16>
    %cst_68 = arith.constant dense<0.000000e+00> : vector<7x224xf32>
    %73 = tpu.matmul %70, %72, %cst_68 {dimension_numbers = #tpu.dot_dimension_numbers<[1], [0], [0], [1], [0, 0, 1, 1], [], []>} : vector<7x32xbf16>, vector<32x224xbf16>, vector<7x224xf32> -> vector<7x224xf32>
    %74 = arith.addf %69, %73 : vector<7x224xf32>
    %75 = vector.extract_strided_slice %0 {offsets = [9, 0], sizes = [7, 32], strides = [1, 1]} : vector<32x32xbf16> to vector<7x32xbf16>
    %c0_69 = arith.constant 0 : index
    %c4_70 = arith.constant 4 : index
    %c0_71 = arith.constant 0 : index
    %c0_72 = arith.constant 0 : index
    %76 = vector.load %arg2[%c0_69, %c4_70, %c0_71, %c0_72] : memref<2x5x32x224xbf16, #tpu.memory_space<vmem>>, vector<1x1x32x224xbf16>
    %77 = vector.shape_cast %76 : vector<1x1x32x224xbf16> to vector<32x224xbf16>
    %cst_73 = arith.constant dense<0.000000e+00> : vector<7x224xf32>
    %78 = tpu.matmul %75, %77, %cst_73 {dimension_numbers = #tpu.dot_dimension_numbers<[1], [0], [0], [1], [0, 0, 1, 1], [], []>} : vector<7x32xbf16>, vector<32x224xbf16>, vector<7x224xf32> -> vector<7x224xf32>
    %79 = arith.addf %74, %78 : vector<7x224xf32>
    %80 = arith.maximumf %53, %79 : vector<7x224xf32>
    %cst_74 = arith.constant 0.000000e+00 : f32
    %81 = vector.broadcast %cst_74 : f32 to vector<7x224xf32>
    %82 = vector.extract_strided_slice %0 {offsets = [8, 0], sizes = [7, 32], strides = [1, 1]} : vector<32x32xbf16> to vector<7x32xbf16>
    %c1_75 = arith.constant 1 : index
    %c0_76 = arith.constant 0 : index
    %c0_77 = arith.constant 0 : index
    %c0_78 = arith.constant 0 : index
    %83 = vector.load %arg2[%c1_75, %c0_76, %c0_77, %c0_78] : memref<2x5x32x224xbf16, #tpu.memory_space<vmem>>, vector<1x1x32x224xbf16>
    %84 = vector.shape_cast %83 : vector<1x1x32x224xbf16> to vector<32x224xbf16>
    %cst_79 = arith.constant dense<0.000000e+00> : vector<7x224xf32>
    %85 = tpu.matmul %82, %84, %cst_79 {dimension_numbers = #tpu.dot_dimension_numbers<[1], [0], [0], [1], [0, 0, 1, 1], [], []>} : vector<7x32xbf16>, vector<32x224xbf16>, vector<7x224xf32> -> vector<7x224xf32>
    %86 = arith.addf %81, %85 : vector<7x224xf32>
    %87 = vector.extract_strided_slice %0 {offsets = [16, 0], sizes = [7, 32], strides = [1, 1]} : vector<32x32xbf16> to vector<7x32xbf16>
    %c1_80 = arith.constant 1 : index
    %c1_81 = arith.constant 1 : index
    %c0_82 = arith.constant 0 : index
    %c0_83 = arith.constant 0 : index
    %88 = vector.load %arg2[%c1_80, %c1_81, %c0_82, %c0_83] : memref<2x5x32x224xbf16, #tpu.memory_space<vmem>>, vector<1x1x32x224xbf16>
    %89 = vector.shape_cast %88 : vector<1x1x32x224xbf16> to vector<32x224xbf16>
    %cst_84 = arith.constant dense<0.000000e+00> : vector<7x224xf32>
    %90 = tpu.matmul %87, %89, %cst_84 {dimension_numbers = #tpu.dot_dimension_numbers<[1], [0], [0], [1], [0, 0, 1, 1], [], []>} : vector<7x32xbf16>, vector<32x224xbf16>, vector<7x224xf32> -> vector<7x224xf32>
    %91 = arith.addf %86, %90 : vector<7x224xf32>
    %92 = vector.extract_strided_slice %0 {offsets = [24, 0], sizes = [7, 32], strides = [1, 1]} : vector<32x32xbf16> to vector<7x32xbf16>
    %c1_85 = arith.constant 1 : index
    %c2_86 = arith.constant 2 : index
    %c0_87 = arith.constant 0 : index
    %c0_88 = arith.constant 0 : index
    %93 = vector.load %arg2[%c1_85, %c2_86, %c0_87, %c0_88] : memref<2x5x32x224xbf16, #tpu.memory_space<vmem>>, vector<1x1x32x224xbf16>
    %94 = vector.shape_cast %93 : vector<1x1x32x224xbf16> to vector<32x224xbf16>
    %cst_89 = arith.constant dense<0.000000e+00> : vector<7x224xf32>
    %95 = tpu.matmul %92, %94, %cst_89 {dimension_numbers = #tpu.dot_dimension_numbers<[1], [0], [0], [1], [0, 0, 1, 1], [], []>} : vector<7x32xbf16>, vector<32x224xbf16>, vector<7x224xf32> -> vector<7x224xf32>
    %96 = arith.addf %91, %95 : vector<7x224xf32>
    %97 = vector.extract_strided_slice %0 {offsets = [1, 0], sizes = [7, 32], strides = [1, 1]} : vector<32x32xbf16> to vector<7x32xbf16>
    %c1_90 = arith.constant 1 : index
    %c3_91 = arith.constant 3 : index
    %c0_92 = arith.constant 0 : index
    %c0_93 = arith.constant 0 : index
    %98 = vector.load %arg2[%c1_90, %c3_91, %c0_92, %c0_93] : memref<2x5x32x224xbf16, #tpu.memory_space<vmem>>, vector<1x1x32x224xbf16>
    %99 = vector.shape_cast %98 : vector<1x1x32x224xbf16> to vector<32x224xbf16>
    %cst_94 = arith.constant dense<0.000000e+00> : vector<7x224xf32>
    %100 = tpu.matmul %97, %99, %cst_94 {dimension_numbers = #tpu.dot_dimension_numbers<[1], [0], [0], [1], [0, 0, 1, 1], [], []>} : vector<7x32xbf16>, vector<32x224xbf16>, vector<7x224xf32> -> vector<7x224xf32>
    %101 = arith.addf %96, %100 : vector<7x224xf32>
    %102 = vector.extract_strided_slice %0 {offsets = [9, 0], sizes = [7, 32], strides = [1, 1]} : vector<32x32xbf16> to vector<7x32xbf16>
    %c1_95 = arith.constant 1 : index
    %c4_96 = arith.constant 4 : index
    %c0_97 = arith.constant 0 : index
    %c0_98 = arith.constant 0 : index
    %103 = vector.load %arg2[%c1_95, %c4_96, %c0_97, %c0_98] : memref<2x5x32x224xbf16, #tpu.memory_space<vmem>>, vector<1x1x32x224xbf16>
    %104 = vector.shape_cast %103 : vector<1x1x32x224xbf16> to vector<32x224xbf16>
    %cst_99 = arith.constant dense<0.000000e+00> : vector<7x224xf32>
    %105 = tpu.matmul %102, %104, %cst_99 {dimension_numbers = #tpu.dot_dimension_numbers<[1], [0], [0], [1], [0, 0, 1, 1], [], []>} : vector<7x32xbf16>, vector<32x224xbf16>, vector<7x224xf32> -> vector<7x224xf32>
    %106 = arith.addf %101, %105 : vector<7x224xf32>
    %107 = arith.maximumf %80, %106 : vector<7x224xf32>
    %c0_100 = arith.constant 0 : index
    %c0_101 = arith.constant 0 : index
    %108 = vector.load %arg3[%c0_100, %c0_101] : memref<1x224xf32, #tpu.memory_space<vmem>>, vector<1x224xf32>
    %109 = vector.broadcast %108 : vector<1x224xf32> to vector<7x224xf32>
    %110 = arith.addf %107, %109 : vector<7x224xf32>
    %cst_102 = arith.constant 0.000000e+00 : f32
    %111 = vector.broadcast %cst_102 : f32 to vector<7x224xf32>
    %112 = arith.maximumf %110, %111 : vector<7x224xf32>
    %113 = arith.truncf %112 : vector<7x224xf32> to vector<7x224xbf16>
    %cst_103 = arith.constant 0.000000e+00 : f32
    %114 = vector.broadcast %cst_103 : f32 to vector<7x224xf32>
    %115 = vector.extract_strided_slice %0 {offsets = [16, 0], sizes = [7, 32], strides = [1, 1]} : vector<32x32xbf16> to vector<7x32xbf16>
    %c0_104 = arith.constant 0 : index
    %c0_105 = arith.constant 0 : index
    %c0_106 = arith.constant 0 : index
    %c0_107 = arith.constant 0 : index
    %116 = vector.load %arg2[%c0_104, %c0_105, %c0_106, %c0_107] : memref<2x5x32x224xbf16, #tpu.memory_space<vmem>>, vector<1x1x32x224xbf16>
    %117 = vector.shape_cast %116 : vector<1x1x32x224xbf16> to vector<32x224xbf16>
    %cst_108 = arith.constant dense<0.000000e+00> : vector<7x224xf32>
    %118 = tpu.matmul %115, %117, %cst_108 {dimension_numbers = #tpu.dot_dimension_numbers<[1], [0], [0], [1], [0, 0, 1, 1], [], []>} : vector<7x32xbf16>, vector<32x224xbf16>, vector<7x224xf32> -> vector<7x224xf32>
    %119 = arith.addf %114, %118 : vector<7x224xf32>
    %120 = vector.extract_strided_slice %0 {offsets = [24, 0], sizes = [7, 32], strides = [1, 1]} : vector<32x32xbf16> to vector<7x32xbf16>
    %c0_109 = arith.constant 0 : index
    %c1_110 = arith.constant 1 : index
    %c0_111 = arith.constant 0 : index
    %c0_112 = arith.constant 0 : index
    %121 = vector.load %arg2[%c0_109, %c1_110, %c0_111, %c0_112] : memref<2x5x32x224xbf16, #tpu.memory_space<vmem>>, vector<1x1x32x224xbf16>
    %122 = vector.shape_cast %121 : vector<1x1x32x224xbf16> to vector<32x224xbf16>
    %cst_113 = arith.constant dense<0.000000e+00> : vector<7x224xf32>
    %123 = tpu.matmul %120, %122, %cst_113 {dimension_numbers = #tpu.dot_dimension_numbers<[1], [0], [0], [1], [0, 0, 1, 1], [], []>} : vector<7x32xbf16>, vector<32x224xbf16>, vector<7x224xf32> -> vector<7x224xf32>
    %124 = arith.addf %119, %123 : vector<7x224xf32>
    %125 = vector.extract_strided_slice %0 {offsets = [1, 0], sizes = [7, 32], strides = [1, 1]} : vector<32x32xbf16> to vector<7x32xbf16>
    %c0_114 = arith.constant 0 : index
    %c2_115 = arith.constant 2 : index
    %c0_116 = arith.constant 0 : index
    %c0_117 = arith.constant 0 : index
    %126 = vector.load %arg2[%c0_114, %c2_115, %c0_116, %c0_117] : memref<2x5x32x224xbf16, #tpu.memory_space<vmem>>, vector<1x1x32x224xbf16>
    %127 = vector.shape_cast %126 : vector<1x1x32x224xbf16> to vector<32x224xbf16>
    %cst_118 = arith.constant dense<0.000000e+00> : vector<7x224xf32>
    %128 = tpu.matmul %125, %127, %cst_118 {dimension_numbers = #tpu.dot_dimension_numbers<[1], [0], [0], [1], [0, 0, 1, 1], [], []>} : vector<7x32xbf16>, vector<32x224xbf16>, vector<7x224xf32> -> vector<7x224xf32>
    %129 = arith.addf %124, %128 : vector<7x224xf32>
    %130 = vector.extract_strided_slice %0 {offsets = [9, 0], sizes = [7, 32], strides = [1, 1]} : vector<32x32xbf16> to vector<7x32xbf16>
    %c0_119 = arith.constant 0 : index
    %c3_120 = arith.constant 3 : index
    %c0_121 = arith.constant 0 : index
    %c0_122 = arith.constant 0 : index
    %131 = vector.load %arg2[%c0_119, %c3_120, %c0_121, %c0_122] : memref<2x5x32x224xbf16, #tpu.memory_space<vmem>>, vector<1x1x32x224xbf16>
    %132 = vector.shape_cast %131 : vector<1x1x32x224xbf16> to vector<32x224xbf16>
    %cst_123 = arith.constant dense<0.000000e+00> : vector<7x224xf32>
    %133 = tpu.matmul %130, %132, %cst_123 {dimension_numbers = #tpu.dot_dimension_numbers<[1], [0], [0], [1], [0, 0, 1, 1], [], []>} : vector<7x32xbf16>, vector<32x224xbf16>, vector<7x224xf32> -> vector<7x224xf32>
    %134 = arith.addf %129, %133 : vector<7x224xf32>
    %135 = vector.extract_strided_slice %0 {offsets = [17, 0], sizes = [7, 32], strides = [1, 1]} : vector<32x32xbf16> to vector<7x32xbf16>
    %c0_124 = arith.constant 0 : index
    %c4_125 = arith.constant 4 : index
    %c0_126 = arith.constant 0 : index
    %c0_127 = arith.constant 0 : index
    %136 = vector.load %arg2[%c0_124, %c4_125, %c0_126, %c0_127] : memref<2x5x32x224xbf16, #tpu.memory_space<vmem>>, vector<1x1x32x224xbf16>
    %137 = vector.shape_cast %136 : vector<1x1x32x224xbf16> to vector<32x224xbf16>
    %cst_128 = arith.constant dense<0.000000e+00> : vector<7x224xf32>
    %138 = tpu.matmul %135, %137, %cst_128 {dimension_numbers = #tpu.dot_dimension_numbers<[1], [0], [0], [1], [0, 0, 1, 1], [], []>} : vector<7x32xbf16>, vector<32x224xbf16>, vector<7x224xf32> -> vector<7x224xf32>
    %139 = arith.addf %134, %138 : vector<7x224xf32>
    %cst_129 = arith.constant 0.000000e+00 : f32
    %140 = vector.broadcast %cst_129 : f32 to vector<7x224xf32>
    %141 = vector.extract_strided_slice %0 {offsets = [16, 0], sizes = [7, 32], strides = [1, 1]} : vector<32x32xbf16> to vector<7x32xbf16>
    %c1_130 = arith.constant 1 : index
    %c0_131 = arith.constant 0 : index
    %c0_132 = arith.constant 0 : index
    %c0_133 = arith.constant 0 : index
    %142 = vector.load %arg2[%c1_130, %c0_131, %c0_132, %c0_133] : memref<2x5x32x224xbf16, #tpu.memory_space<vmem>>, vector<1x1x32x224xbf16>
    %143 = vector.shape_cast %142 : vector<1x1x32x224xbf16> to vector<32x224xbf16>
    %cst_134 = arith.constant dense<0.000000e+00> : vector<7x224xf32>
    %144 = tpu.matmul %141, %143, %cst_134 {dimension_numbers = #tpu.dot_dimension_numbers<[1], [0], [0], [1], [0, 0, 1, 1], [], []>} : vector<7x32xbf16>, vector<32x224xbf16>, vector<7x224xf32> -> vector<7x224xf32>
    %145 = arith.addf %140, %144 : vector<7x224xf32>
    %146 = vector.extract_strided_slice %0 {offsets = [24, 0], sizes = [7, 32], strides = [1, 1]} : vector<32x32xbf16> to vector<7x32xbf16>
    %c1_135 = arith.constant 1 : index
    %c1_136 = arith.constant 1 : index
    %c0_137 = arith.constant 0 : index
    %c0_138 = arith.constant 0 : index
    %147 = vector.load %arg2[%c1_135, %c1_136, %c0_137, %c0_138] : memref<2x5x32x224xbf16, #tpu.memory_space<vmem>>, vector<1x1x32x224xbf16>
    %148 = vector.shape_cast %147 : vector<1x1x32x224xbf16> to vector<32x224xbf16>
    %cst_139 = arith.constant dense<0.000000e+00> : vector<7x224xf32>
    %149 = tpu.matmul %146, %148, %cst_139 {dimension_numbers = #tpu.dot_dimension_numbers<[1], [0], [0], [1], [0, 0, 1, 1], [], []>} : vector<7x32xbf16>, vector<32x224xbf16>, vector<7x224xf32> -> vector<7x224xf32>
    %150 = arith.addf %145, %149 : vector<7x224xf32>
    %151 = vector.extract_strided_slice %0 {offsets = [1, 0], sizes = [7, 32], strides = [1, 1]} : vector<32x32xbf16> to vector<7x32xbf16>
    %c1_140 = arith.constant 1 : index
    %c2_141 = arith.constant 2 : index
    %c0_142 = arith.constant 0 : index
    %c0_143 = arith.constant 0 : index
    %152 = vector.load %arg2[%c1_140, %c2_141, %c0_142, %c0_143] : memref<2x5x32x224xbf16, #tpu.memory_space<vmem>>, vector<1x1x32x224xbf16>
    %153 = vector.shape_cast %152 : vector<1x1x32x224xbf16> to vector<32x224xbf16>
    %cst_144 = arith.constant dense<0.000000e+00> : vector<7x224xf32>
    %154 = tpu.matmul %151, %153, %cst_144 {dimension_numbers = #tpu.dot_dimension_numbers<[1], [0], [0], [1], [0, 0, 1, 1], [], []>} : vector<7x32xbf16>, vector<32x224xbf16>, vector<7x224xf32> -> vector<7x224xf32>
    %155 = arith.addf %150, %154 : vector<7x224xf32>
    %156 = vector.extract_strided_slice %0 {offsets = [9, 0], sizes = [7, 32], strides = [1, 1]} : vector<32x32xbf16> to vector<7x32xbf16>
    %c1_145 = arith.constant 1 : index
    %c3_146 = arith.constant 3 : index
    %c0_147 = arith.constant 0 : index
    %c0_148 = arith.constant 0 : index
    %157 = vector.load %arg2[%c1_145, %c3_146, %c0_147, %c0_148] : memref<2x5x32x224xbf16, #tpu.memory_space<vmem>>, vector<1x1x32x224xbf16>
    %158 = vector.shape_cast %157 : vector<1x1x32x224xbf16> to vector<32x224xbf16>
    %cst_149 = arith.constant dense<0.000000e+00> : vector<7x224xf32>
    %159 = tpu.matmul %156, %158, %cst_149 {dimension_numbers = #tpu.dot_dimension_numbers<[1], [0], [0], [1], [0, 0, 1, 1], [], []>} : vector<7x32xbf16>, vector<32x224xbf16>, vector<7x224xf32> -> vector<7x224xf32>
    %160 = arith.addf %155, %159 : vector<7x224xf32>
    %161 = vector.extract_strided_slice %0 {offsets = [17, 0], sizes = [7, 32], strides = [1, 1]} : vector<32x32xbf16> to vector<7x32xbf16>
    %c1_150 = arith.constant 1 : index
    %c4_151 = arith.constant 4 : index
    %c0_152 = arith.constant 0 : index
    %c0_153 = arith.constant 0 : index
    %162 = vector.load %arg2[%c1_150, %c4_151, %c0_152, %c0_153] : memref<2x5x32x224xbf16, #tpu.memory_space<vmem>>, vector<1x1x32x224xbf16>
    %163 = vector.shape_cast %162 : vector<1x1x32x224xbf16> to vector<32x224xbf16>
    %cst_154 = arith.constant dense<0.000000e+00> : vector<7x224xf32>
    %164 = tpu.matmul %161, %163, %cst_154 {dimension_numbers = #tpu.dot_dimension_numbers<[1], [0], [0], [1], [0, 0, 1, 1], [], []>} : vector<7x32xbf16>, vector<32x224xbf16>, vector<7x224xf32> -> vector<7x224xf32>
    %165 = arith.addf %160, %164 : vector<7x224xf32>
    %166 = arith.maximumf %139, %165 : vector<7x224xf32>
    %cst_155 = arith.constant 0.000000e+00 : f32
    %167 = vector.broadcast %cst_155 : f32 to vector<7x224xf32>
    %168 = vector.extract_strided_slice %0 {offsets = [24, 0], sizes = [7, 32], strides = [1, 1]} : vector<32x32xbf16> to vector<7x32xbf16>
    %c0_156 = arith.constant 0 : index
    %c0_157 = arith.constant 0 : index
    %c0_158 = arith.constant 0 : index
    %c0_159 = arith.constant 0 : index
    %169 = vector.load %arg2[%c0_156, %c0_157, %c0_158, %c0_159] : memref<2x5x32x224xbf16, #tpu.memory_space<vmem>>, vector<1x1x32x224xbf16>
    %170 = vector.shape_cast %169 : vector<1x1x32x224xbf16> to vector<32x224xbf16>
    %cst_160 = arith.constant dense<0.000000e+00> : vector<7x224xf32>
    %171 = tpu.matmul %168, %170, %cst_160 {dimension_numbers = #tpu.dot_dimension_numbers<[1], [0], [0], [1], [0, 0, 1, 1], [], []>} : vector<7x32xbf16>, vector<32x224xbf16>, vector<7x224xf32> -> vector<7x224xf32>
    %172 = arith.addf %167, %171 : vector<7x224xf32>
    %173 = vector.extract_strided_slice %0 {offsets = [1, 0], sizes = [7, 32], strides = [1, 1]} : vector<32x32xbf16> to vector<7x32xbf16>
    %c0_161 = arith.constant 0 : index
    %c1_162 = arith.constant 1 : index
    %c0_163 = arith.constant 0 : index
    %c0_164 = arith.constant 0 : index
    %174 = vector.load %arg2[%c0_161, %c1_162, %c0_163, %c0_164] : memref<2x5x32x224xbf16, #tpu.memory_space<vmem>>, vector<1x1x32x224xbf16>
    %175 = vector.shape_cast %174 : vector<1x1x32x224xbf16> to vector<32x224xbf16>
    %cst_165 = arith.constant dense<0.000000e+00> : vector<7x224xf32>
    %176 = tpu.matmul %173, %175, %cst_165 {dimension_numbers = #tpu.dot_dimension_numbers<[1], [0], [0], [1], [0, 0, 1, 1], [], []>} : vector<7x32xbf16>, vector<32x224xbf16>, vector<7x224xf32> -> vector<7x224xf32>
    %177 = arith.addf %172, %176 : vector<7x224xf32>
    %178 = vector.extract_strided_slice %0 {offsets = [9, 0], sizes = [7, 32], strides = [1, 1]} : vector<32x32xbf16> to vector<7x32xbf16>
    %c0_166 = arith.constant 0 : index
    %c2_167 = arith.constant 2 : index
    %c0_168 = arith.constant 0 : index
    %c0_169 = arith.constant 0 : index
    %179 = vector.load %arg2[%c0_166, %c2_167, %c0_168, %c0_169] : memref<2x5x32x224xbf16, #tpu.memory_space<vmem>>, vector<1x1x32x224xbf16>
    %180 = vector.shape_cast %179 : vector<1x1x32x224xbf16> to vector<32x224xbf16>
    %cst_170 = arith.constant dense<0.000000e+00> : vector<7x224xf32>
    %181 = tpu.matmul %178, %180, %cst_170 {dimension_numbers = #tpu.dot_dimension_numbers<[1], [0], [0], [1], [0, 0, 1, 1], [], []>} : vector<7x32xbf16>, vector<32x224xbf16>, vector<7x224xf32> -> vector<7x224xf32>
    %182 = arith.addf %177, %181 : vector<7x224xf32>
    %183 = vector.extract_strided_slice %0 {offsets = [17, 0], sizes = [7, 32], strides = [1, 1]} : vector<32x32xbf16> to vector<7x32xbf16>
    %c0_171 = arith.constant 0 : index
    %c3_172 = arith.constant 3 : index
    %c0_173 = arith.constant 0 : index
    %c0_174 = arith.constant 0 : index
    %184 = vector.load %arg2[%c0_171, %c3_172, %c0_173, %c0_174] : memref<2x5x32x224xbf16, #tpu.memory_space<vmem>>, vector<1x1x32x224xbf16>
    %185 = vector.shape_cast %184 : vector<1x1x32x224xbf16> to vector<32x224xbf16>
    %cst_175 = arith.constant dense<0.000000e+00> : vector<7x224xf32>
    %186 = tpu.matmul %183, %185, %cst_175 {dimension_numbers = #tpu.dot_dimension_numbers<[1], [0], [0], [1], [0, 0, 1, 1], [], []>} : vector<7x32xbf16>, vector<32x224xbf16>, vector<7x224xf32> -> vector<7x224xf32>
    %187 = arith.addf %182, %186 : vector<7x224xf32>
    %188 = vector.extract_strided_slice %0 {offsets = [25, 0], sizes = [7, 32], strides = [1, 1]} : vector<32x32xbf16> to vector<7x32xbf16>
    %c0_176 = arith.constant 0 : index
    %c4_177 = arith.constant 4 : index
    %c0_178 = arith.constant 0 : index
    %c0_179 = arith.constant 0 : index
    %189 = vector.load %arg2[%c0_176, %c4_177, %c0_178, %c0_179] : memref<2x5x32x224xbf16, #tpu.memory_space<vmem>>, vector<1x1x32x224xbf16>
    %190 = vector.shape_cast %189 : vector<1x1x32x224xbf16> to vector<32x224xbf16>
    %cst_180 = arith.constant dense<0.000000e+00> : vector<7x224xf32>
    %191 = tpu.matmul %188, %190, %cst_180 {dimension_numbers = #tpu.dot_dimension_numbers<[1], [0], [0], [1], [0, 0, 1, 1], [], []>} : vector<7x32xbf16>, vector<32x224xbf16>, vector<7x224xf32> -> vector<7x224xf32>
    %192 = arith.addf %187, %191 : vector<7x224xf32>
    %193 = arith.maximumf %166, %192 : vector<7x224xf32>
    %cst_181 = arith.constant 0.000000e+00 : f32
    %194 = vector.broadcast %cst_181 : f32 to vector<7x224xf32>
    %195 = vector.extract_strided_slice %0 {offsets = [24, 0], sizes = [7, 32], strides = [1, 1]} : vector<32x32xbf16> to vector<7x32xbf16>
    %c1_182 = arith.constant 1 : index
    %c0_183 = arith.constant 0 : index
    %c0_184 = arith.constant 0 : index
    %c0_185 = arith.constant 0 : index
    %196 = vector.load %arg2[%c1_182, %c0_183, %c0_184, %c0_185] : memref<2x5x32x224xbf16, #tpu.memory_space<vmem>>, vector<1x1x32x224xbf16>
    %197 = vector.shape_cast %196 : vector<1x1x32x224xbf16> to vector<32x224xbf16>
    %cst_186 = arith.constant dense<0.000000e+00> : vector<7x224xf32>
    %198 = tpu.matmul %195, %197, %cst_186 {dimension_numbers = #tpu.dot_dimension_numbers<[1], [0], [0], [1], [0, 0, 1, 1], [], []>} : vector<7x32xbf16>, vector<32x224xbf16>, vector<7x224xf32> -> vector<7x224xf32>
    %199 = arith.addf %194, %198 : vector<7x224xf32>
    %200 = vector.extract_strided_slice %0 {offsets = [1, 0], sizes = [7, 32], strides = [1, 1]} : vector<32x32xbf16> to vector<7x32xbf16>
    %c1_187 = arith.constant 1 : index
    %c1_188 = arith.constant 1 : index
    %c0_189 = arith.constant 0 : index
    %c0_190 = arith.constant 0 : index
    %201 = vector.load %arg2[%c1_187, %c1_188, %c0_189, %c0_190] : memref<2x5x32x224xbf16, #tpu.memory_space<vmem>>, vector<1x1x32x224xbf16>
    %202 = vector.shape_cast %201 : vector<1x1x32x224xbf16> to vector<32x224xbf16>
    %cst_191 = arith.constant dense<0.000000e+00> : vector<7x224xf32>
    %203 = tpu.matmul %200, %202, %cst_191 {dimension_numbers = #tpu.dot_dimension_numbers<[1], [0], [0], [1], [0, 0, 1, 1], [], []>} : vector<7x32xbf16>, vector<32x224xbf16>, vector<7x224xf32> -> vector<7x224xf32>
    %204 = arith.addf %199, %203 : vector<7x224xf32>
    %205 = vector.extract_strided_slice %0 {offsets = [9, 0], sizes = [7, 32], strides = [1, 1]} : vector<32x32xbf16> to vector<7x32xbf16>
    %c1_192 = arith.constant 1 : index
    %c2_193 = arith.constant 2 : index
    %c0_194 = arith.constant 0 : index
    %c0_195 = arith.constant 0 : index
    %206 = vector.load %arg2[%c1_192, %c2_193, %c0_194, %c0_195] : memref<2x5x32x224xbf16, #tpu.memory_space<vmem>>, vector<1x1x32x224xbf16>
    %207 = vector.shape_cast %206 : vector<1x1x32x224xbf16> to vector<32x224xbf16>
    %cst_196 = arith.constant dense<0.000000e+00> : vector<7x224xf32>
    %208 = tpu.matmul %205, %207, %cst_196 {dimension_numbers = #tpu.dot_dimension_numbers<[1], [0], [0], [1], [0, 0, 1, 1], [], []>} : vector<7x32xbf16>, vector<32x224xbf16>, vector<7x224xf32> -> vector<7x224xf32>
    %209 = arith.addf %204, %208 : vector<7x224xf32>
    %210 = vector.extract_strided_slice %0 {offsets = [17, 0], sizes = [7, 32], strides = [1, 1]} : vector<32x32xbf16> to vector<7x32xbf16>
    %c1_197 = arith.constant 1 : index
    %c3_198 = arith.constant 3 : index
    %c0_199 = arith.constant 0 : index
    %c0_200 = arith.constant 0 : index
    %211 = vector.load %arg2[%c1_197, %c3_198, %c0_199, %c0_200] : memref<2x5x32x224xbf16, #tpu.memory_space<vmem>>, vector<1x1x32x224xbf16>
    %212 = vector.shape_cast %211 : vector<1x1x32x224xbf16> to vector<32x224xbf16>
    %cst_201 = arith.constant dense<0.000000e+00> : vector<7x224xf32>
    %213 = tpu.matmul %210, %212, %cst_201 {dimension_numbers = #tpu.dot_dimension_numbers<[1], [0], [0], [1], [0, 0, 1, 1], [], []>} : vector<7x32xbf16>, vector<32x224xbf16>, vector<7x224xf32> -> vector<7x224xf32>
    %214 = arith.addf %209, %213 : vector<7x224xf32>
    %215 = vector.extract_strided_slice %0 {offsets = [25, 0], sizes = [7, 32], strides = [1, 1]} : vector<32x32xbf16> to vector<7x32xbf16>
    %c1_202 = arith.constant 1 : index
    %c4_203 = arith.constant 4 : index
    %c0_204 = arith.constant 0 : index
    %c0_205 = arith.constant 0 : index
    %216 = vector.load %arg2[%c1_202, %c4_203, %c0_204, %c0_205] : memref<2x5x32x224xbf16, #tpu.memory_space<vmem>>, vector<1x1x32x224xbf16>
    %217 = vector.shape_cast %216 : vector<1x1x32x224xbf16> to vector<32x224xbf16>
    %cst_206 = arith.constant dense<0.000000e+00> : vector<7x224xf32>
    %218 = tpu.matmul %215, %217, %cst_206 {dimension_numbers = #tpu.dot_dimension_numbers<[1], [0], [0], [1], [0, 0, 1, 1], [], []>} : vector<7x32xbf16>, vector<32x224xbf16>, vector<7x224xf32> -> vector<7x224xf32>
    %219 = arith.addf %214, %218 : vector<7x224xf32>
    %220 = arith.maximumf %193, %219 : vector<7x224xf32>
    %c0_207 = arith.constant 0 : index
    %c0_208 = arith.constant 0 : index
    %221 = vector.load %arg3[%c0_207, %c0_208] : memref<1x224xf32, #tpu.memory_space<vmem>>, vector<1x224xf32>
    %222 = vector.broadcast %221 : vector<1x224xf32> to vector<7x224xf32>
    %223 = arith.addf %220, %222 : vector<7x224xf32>
    %cst_209 = arith.constant 0.000000e+00 : f32
    %224 = vector.broadcast %cst_209 : f32 to vector<7x224xf32>
    %225 = arith.maximumf %223, %224 : vector<7x224xf32>
    %226 = arith.truncf %225 : vector<7x224xf32> to vector<7x224xbf16>
    %cst_210 = arith.constant 0.000000e+00 : bf16
    %227 = vector.broadcast %cst_210 : bf16 to vector<1x224xbf16>
    %228 = tpu.concatenate %227, %113, %227 in 0 : vector<1x224xbf16>, vector<7x224xbf16>, vector<1x224xbf16> -> vector<9x224xbf16>
    %229 = tpu.concatenate %227, %226, %227 in 0 : vector<1x224xbf16>, vector<7x224xbf16>, vector<1x224xbf16> -> vector<9x224xbf16>
    %cst_211 = arith.constant 0.000000e+00 : f32
    %230 = vector.broadcast %cst_211 : f32 to vector<7x224xf32>
    %231 = vector.extract_strided_slice %228 {offsets = [0, 0], sizes = [7, 224], strides = [1, 1]} : vector<9x224xbf16> to vector<7x224xbf16>
    %c0_212 = arith.constant 0 : index
    %c0_213 = arith.constant 0 : index
    %c0_214 = arith.constant 0 : index
    %c0_215 = arith.constant 0 : index
    %232 = vector.load %arg4[%c0_212, %c0_213, %c0_214, %c0_215] : memref<2x5x224x224xbf16, #tpu.memory_space<vmem>>, vector<1x1x224x224xbf16>
    %233 = vector.shape_cast %232 : vector<1x1x224x224xbf16> to vector<224x224xbf16>
    %cst_216 = arith.constant dense<0.000000e+00> : vector<7x224xf32>
    %234 = tpu.matmul %231, %233, %cst_216 {dimension_numbers = #tpu.dot_dimension_numbers<[1], [0], [0], [1], [0, 0, 1, 1], [], []>} : vector<7x224xbf16>, vector<224x224xbf16>, vector<7x224xf32> -> vector<7x224xf32>
    %235 = arith.addf %230, %234 : vector<7x224xf32>
    %236 = vector.extract_strided_slice %229 {offsets = [0, 0], sizes = [7, 224], strides = [1, 1]} : vector<9x224xbf16> to vector<7x224xbf16>
    %c0_217 = arith.constant 0 : index
    %c1_218 = arith.constant 1 : index
    %c0_219 = arith.constant 0 : index
    %c0_220 = arith.constant 0 : index
    %237 = vector.load %arg4[%c0_217, %c1_218, %c0_219, %c0_220] : memref<2x5x224x224xbf16, #tpu.memory_space<vmem>>, vector<1x1x224x224xbf16>
    %238 = vector.shape_cast %237 : vector<1x1x224x224xbf16> to vector<224x224xbf16>
    %cst_221 = arith.constant dense<0.000000e+00> : vector<7x224xf32>
    %239 = tpu.matmul %236, %238, %cst_221 {dimension_numbers = #tpu.dot_dimension_numbers<[1], [0], [0], [1], [0, 0, 1, 1], [], []>} : vector<7x224xbf16>, vector<224x224xbf16>, vector<7x224xf32> -> vector<7x224xf32>
    %240 = arith.addf %235, %239 : vector<7x224xf32>
    %241 = vector.extract_strided_slice %228 {offsets = [1, 0], sizes = [7, 224], strides = [1, 1]} : vector<9x224xbf16> to vector<7x224xbf16>
    %c0_222 = arith.constant 0 : index
    %c2_223 = arith.constant 2 : index
    %c0_224 = arith.constant 0 : index
    %c0_225 = arith.constant 0 : index
    %242 = vector.load %arg4[%c0_222, %c2_223, %c0_224, %c0_225] : memref<2x5x224x224xbf16, #tpu.memory_space<vmem>>, vector<1x1x224x224xbf16>
    %243 = vector.shape_cast %242 : vector<1x1x224x224xbf16> to vector<224x224xbf16>
    %cst_226 = arith.constant dense<0.000000e+00> : vector<7x224xf32>
    %244 = tpu.matmul %241, %243, %cst_226 {dimension_numbers = #tpu.dot_dimension_numbers<[1], [0], [0], [1], [0, 0, 1, 1], [], []>} : vector<7x224xbf16>, vector<224x224xbf16>, vector<7x224xf32> -> vector<7x224xf32>
    %245 = arith.addf %240, %244 : vector<7x224xf32>
    %246 = vector.extract_strided_slice %229 {offsets = [1, 0], sizes = [7, 224], strides = [1, 1]} : vector<9x224xbf16> to vector<7x224xbf16>
    %c0_227 = arith.constant 0 : index
    %c3_228 = arith.constant 3 : index
    %c0_229 = arith.constant 0 : index
    %c0_230 = arith.constant 0 : index
    %247 = vector.load %arg4[%c0_227, %c3_228, %c0_229, %c0_230] : memref<2x5x224x224xbf16, #tpu.memory_space<vmem>>, vector<1x1x224x224xbf16>
    %248 = vector.shape_cast %247 : vector<1x1x224x224xbf16> to vector<224x224xbf16>
    %cst_231 = arith.constant dense<0.000000e+00> : vector<7x224xf32>
    %249 = tpu.matmul %246, %248, %cst_231 {dimension_numbers = #tpu.dot_dimension_numbers<[1], [0], [0], [1], [0, 0, 1, 1], [], []>} : vector<7x224xbf16>, vector<224x224xbf16>, vector<7x224xf32> -> vector<7x224xf32>
    %250 = arith.addf %245, %249 : vector<7x224xf32>
    %251 = vector.extract_strided_slice %228 {offsets = [2, 0], sizes = [7, 224], strides = [1, 1]} : vector<9x224xbf16> to vector<7x224xbf16>
    %c0_232 = arith.constant 0 : index
    %c4_233 = arith.constant 4 : index
    %c0_234 = arith.constant 0 : index
    %c0_235 = arith.constant 0 : index
    %252 = vector.load %arg4[%c0_232, %c4_233, %c0_234, %c0_235] : memref<2x5x224x224xbf16, #tpu.memory_space<vmem>>, vector<1x1x224x224xbf16>
    %253 = vector.shape_cast %252 : vector<1x1x224x224xbf16> to vector<224x224xbf16>
    %cst_236 = arith.constant dense<0.000000e+00> : vector<7x224xf32>
    %254 = tpu.matmul %251, %253, %cst_236 {dimension_numbers = #tpu.dot_dimension_numbers<[1], [0], [0], [1], [0, 0, 1, 1], [], []>} : vector<7x224xbf16>, vector<224x224xbf16>, vector<7x224xf32> -> vector<7x224xf32>
    %255 = arith.addf %250, %254 : vector<7x224xf32>
    %cst_237 = arith.constant 0.000000e+00 : f32
    %256 = vector.broadcast %cst_237 : f32 to vector<7x224xf32>
    %257 = vector.extract_strided_slice %228 {offsets = [0, 0], sizes = [7, 224], strides = [1, 1]} : vector<9x224xbf16> to vector<7x224xbf16>
    %c1_238 = arith.constant 1 : index
    %c0_239 = arith.constant 0 : index
    %c0_240 = arith.constant 0 : index
    %c0_241 = arith.constant 0 : index
    %258 = vector.load %arg4[%c1_238, %c0_239, %c0_240, %c0_241] : memref<2x5x224x224xbf16, #tpu.memory_space<vmem>>, vector<1x1x224x224xbf16>
    %259 = vector.shape_cast %258 : vector<1x1x224x224xbf16> to vector<224x224xbf16>
    %cst_242 = arith.constant dense<0.000000e+00> : vector<7x224xf32>
    %260 = tpu.matmul %257, %259, %cst_242 {dimension_numbers = #tpu.dot_dimension_numbers<[1], [0], [0], [1], [0, 0, 1, 1], [], []>} : vector<7x224xbf16>, vector<224x224xbf16>, vector<7x224xf32> -> vector<7x224xf32>
    %261 = arith.addf %256, %260 : vector<7x224xf32>
    %262 = vector.extract_strided_slice %229 {offsets = [0, 0], sizes = [7, 224], strides = [1, 1]} : vector<9x224xbf16> to vector<7x224xbf16>
    %c1_243 = arith.constant 1 : index
    %c1_244 = arith.constant 1 : index
    %c0_245 = arith.constant 0 : index
    %c0_246 = arith.constant 0 : index
    %263 = vector.load %arg4[%c1_243, %c1_244, %c0_245, %c0_246] : memref<2x5x224x224xbf16, #tpu.memory_space<vmem>>, vector<1x1x224x224xbf16>
    %264 = vector.shape_cast %263 : vector<1x1x224x224xbf16> to vector<224x224xbf16>
    %cst_247 = arith.constant dense<0.000000e+00> : vector<7x224xf32>
    %265 = tpu.matmul %262, %264, %cst_247 {dimension_numbers = #tpu.dot_dimension_numbers<[1], [0], [0], [1], [0, 0, 1, 1], [], []>} : vector<7x224xbf16>, vector<224x224xbf16>, vector<7x224xf32> -> vector<7x224xf32>
    %266 = arith.addf %261, %265 : vector<7x224xf32>
    %267 = vector.extract_strided_slice %228 {offsets = [1, 0], sizes = [7, 224], strides = [1, 1]} : vector<9x224xbf16> to vector<7x224xbf16>
    %c1_248 = arith.constant 1 : index
    %c2_249 = arith.constant 2 : index
    %c0_250 = arith.constant 0 : index
    %c0_251 = arith.constant 0 : index
    %268 = vector.load %arg4[%c1_248, %c2_249, %c0_250, %c0_251] : memref<2x5x224x224xbf16, #tpu.memory_space<vmem>>, vector<1x1x224x224xbf16>
    %269 = vector.shape_cast %268 : vector<1x1x224x224xbf16> to vector<224x224xbf16>
    %cst_252 = arith.constant dense<0.000000e+00> : vector<7x224xf32>
    %270 = tpu.matmul %267, %269, %cst_252 {dimension_numbers = #tpu.dot_dimension_numbers<[1], [0], [0], [1], [0, 0, 1, 1], [], []>} : vector<7x224xbf16>, vector<224x224xbf16>, vector<7x224xf32> -> vector<7x224xf32>
    %271 = arith.addf %266, %270 : vector<7x224xf32>
    %272 = vector.extract_strided_slice %229 {offsets = [1, 0], sizes = [7, 224], strides = [1, 1]} : vector<9x224xbf16> to vector<7x224xbf16>
    %c1_253 = arith.constant 1 : index
    %c3_254 = arith.constant 3 : index
    %c0_255 = arith.constant 0 : index
    %c0_256 = arith.constant 0 : index
    %273 = vector.load %arg4[%c1_253, %c3_254, %c0_255, %c0_256] : memref<2x5x224x224xbf16, #tpu.memory_space<vmem>>, vector<1x1x224x224xbf16>
    %274 = vector.shape_cast %273 : vector<1x1x224x224xbf16> to vector<224x224xbf16>
    %cst_257 = arith.constant dense<0.000000e+00> : vector<7x224xf32>
    %275 = tpu.matmul %272, %274, %cst_257 {dimension_numbers = #tpu.dot_dimension_numbers<[1], [0], [0], [1], [0, 0, 1, 1], [], []>} : vector<7x224xbf16>, vector<224x224xbf16>, vector<7x224xf32> -> vector<7x224xf32>
    %276 = arith.addf %271, %275 : vector<7x224xf32>
    %277 = vector.extract_strided_slice %228 {offsets = [2, 0], sizes = [7, 224], strides = [1, 1]} : vector<9x224xbf16> to vector<7x224xbf16>
    %c1_258 = arith.constant 1 : index
    %c4_259 = arith.constant 4 : index
    %c0_260 = arith.constant 0 : index
    %c0_261 = arith.constant 0 : index
    %278 = vector.load %arg4[%c1_258, %c4_259, %c0_260, %c0_261] : memref<2x5x224x224xbf16, #tpu.memory_space<vmem>>, vector<1x1x224x224xbf16>
    %279 = vector.shape_cast %278 : vector<1x1x224x224xbf16> to vector<224x224xbf16>
    %cst_262 = arith.constant dense<0.000000e+00> : vector<7x224xf32>
    %280 = tpu.matmul %277, %279, %cst_262 {dimension_numbers = #tpu.dot_dimension_numbers<[1], [0], [0], [1], [0, 0, 1, 1], [], []>} : vector<7x224xbf16>, vector<224x224xbf16>, vector<7x224xf32> -> vector<7x224xf32>
    %281 = arith.addf %276, %280 : vector<7x224xf32>
    %282 = arith.maximumf %255, %281 : vector<7x224xf32>
    %cst_263 = arith.constant 0.000000e+00 : f32
    %283 = vector.broadcast %cst_263 : f32 to vector<7x224xf32>
    %284 = vector.extract_strided_slice %229 {offsets = [0, 0], sizes = [7, 224], strides = [1, 1]} : vector<9x224xbf16> to vector<7x224xbf16>
    %c0_264 = arith.constant 0 : index
    %c0_265 = arith.constant 0 : index
    %c0_266 = arith.constant 0 : index
    %c0_267 = arith.constant 0 : index
    %285 = vector.load %arg4[%c0_264, %c0_265, %c0_266, %c0_267] : memref<2x5x224x224xbf16, #tpu.memory_space<vmem>>, vector<1x1x224x224xbf16>
    %286 = vector.shape_cast %285 : vector<1x1x224x224xbf16> to vector<224x224xbf16>
    %cst_268 = arith.constant dense<0.000000e+00> : vector<7x224xf32>
    %287 = tpu.matmul %284, %286, %cst_268 {dimension_numbers = #tpu.dot_dimension_numbers<[1], [0], [0], [1], [0, 0, 1, 1], [], []>} : vector<7x224xbf16>, vector<224x224xbf16>, vector<7x224xf32> -> vector<7x224xf32>
    %288 = arith.addf %283, %287 : vector<7x224xf32>
    %289 = vector.extract_strided_slice %228 {offsets = [1, 0], sizes = [7, 224], strides = [1, 1]} : vector<9x224xbf16> to vector<7x224xbf16>
    %c0_269 = arith.constant 0 : index
    %c1_270 = arith.constant 1 : index
    %c0_271 = arith.constant 0 : index
    %c0_272 = arith.constant 0 : index
    %290 = vector.load %arg4[%c0_269, %c1_270, %c0_271, %c0_272] : memref<2x5x224x224xbf16, #tpu.memory_space<vmem>>, vector<1x1x224x224xbf16>
    %291 = vector.shape_cast %290 : vector<1x1x224x224xbf16> to vector<224x224xbf16>
    %cst_273 = arith.constant dense<0.000000e+00> : vector<7x224xf32>
    %292 = tpu.matmul %289, %291, %cst_273 {dimension_numbers = #tpu.dot_dimension_numbers<[1], [0], [0], [1], [0, 0, 1, 1], [], []>} : vector<7x224xbf16>, vector<224x224xbf16>, vector<7x224xf32> -> vector<7x224xf32>
    %293 = arith.addf %288, %292 : vector<7x224xf32>
    %294 = vector.extract_strided_slice %229 {offsets = [1, 0], sizes = [7, 224], strides = [1, 1]} : vector<9x224xbf16> to vector<7x224xbf16>
    %c0_274 = arith.constant 0 : index
    %c2_275 = arith.constant 2 : index
    %c0_276 = arith.constant 0 : index
    %c0_277 = arith.constant 0 : index
    %295 = vector.load %arg4[%c0_274, %c2_275, %c0_276, %c0_277] : memref<2x5x224x224xbf16, #tpu.memory_space<vmem>>, vector<1x1x224x224xbf16>
    %296 = vector.shape_cast %295 : vector<1x1x224x224xbf16> to vector<224x224xbf16>
    %cst_278 = arith.constant dense<0.000000e+00> : vector<7x224xf32>
    %297 = tpu.matmul %294, %296, %cst_278 {dimension_numbers = #tpu.dot_dimension_numbers<[1], [0], [0], [1], [0, 0, 1, 1], [], []>} : vector<7x224xbf16>, vector<224x224xbf16>, vector<7x224xf32> -> vector<7x224xf32>
    %298 = arith.addf %293, %297 : vector<7x224xf32>
    %299 = vector.extract_strided_slice %228 {offsets = [2, 0], sizes = [7, 224], strides = [1, 1]} : vector<9x224xbf16> to vector<7x224xbf16>
    %c0_279 = arith.constant 0 : index
    %c3_280 = arith.constant 3 : index
    %c0_281 = arith.constant 0 : index
    %c0_282 = arith.constant 0 : index
    %300 = vector.load %arg4[%c0_279, %c3_280, %c0_281, %c0_282] : memref<2x5x224x224xbf16, #tpu.memory_space<vmem>>, vector<1x1x224x224xbf16>
    %301 = vector.shape_cast %300 : vector<1x1x224x224xbf16> to vector<224x224xbf16>
    %cst_283 = arith.constant dense<0.000000e+00> : vector<7x224xf32>
    %302 = tpu.matmul %299, %301, %cst_283 {dimension_numbers = #tpu.dot_dimension_numbers<[1], [0], [0], [1], [0, 0, 1, 1], [], []>} : vector<7x224xbf16>, vector<224x224xbf16>, vector<7x224xf32> -> vector<7x224xf32>
    %303 = arith.addf %298, %302 : vector<7x224xf32>
    %304 = vector.extract_strided_slice %229 {offsets = [2, 0], sizes = [7, 224], strides = [1, 1]} : vector<9x224xbf16> to vector<7x224xbf16>
    %c0_284 = arith.constant 0 : index
    %c4_285 = arith.constant 4 : index
    %c0_286 = arith.constant 0 : index
    %c0_287 = arith.constant 0 : index
    %305 = vector.load %arg4[%c0_284, %c4_285, %c0_286, %c0_287] : memref<2x5x224x224xbf16, #tpu.memory_space<vmem>>, vector<1x1x224x224xbf16>
    %306 = vector.shape_cast %305 : vector<1x1x224x224xbf16> to vector<224x224xbf16>
    %cst_288 = arith.constant dense<0.000000e+00> : vector<7x224xf32>
    %307 = tpu.matmul %304, %306, %cst_288 {dimension_numbers = #tpu.dot_dimension_numbers<[1], [0], [0], [1], [0, 0, 1, 1], [], []>} : vector<7x224xbf16>, vector<224x224xbf16>, vector<7x224xf32> -> vector<7x224xf32>
    %308 = arith.addf %303, %307 : vector<7x224xf32>
    %309 = arith.maximumf %282, %308 : vector<7x224xf32>
    %cst_289 = arith.constant 0.000000e+00 : f32
    %310 = vector.broadcast %cst_289 : f32 to vector<7x224xf32>
    %311 = vector.extract_strided_slice %229 {offsets = [0, 0], sizes = [7, 224], strides = [1, 1]} : vector<9x224xbf16> to vector<7x224xbf16>
    %c1_290 = arith.constant 1 : index
    %c0_291 = arith.constant 0 : index
    %c0_292 = arith.constant 0 : index
    %c0_293 = arith.constant 0 : index
    %312 = vector.load %arg4[%c1_290, %c0_291, %c0_292, %c0_293] : memref<2x5x224x224xbf16, #tpu.memory_space<vmem>>, vector<1x1x224x224xbf16>
    %313 = vector.shape_cast %312 : vector<1x1x224x224xbf16> to vector<224x224xbf16>
    %cst_294 = arith.constant dense<0.000000e+00> : vector<7x224xf32>
    %314 = tpu.matmul %311, %313, %cst_294 {dimension_numbers = #tpu.dot_dimension_numbers<[1], [0], [0], [1], [0, 0, 1, 1], [], []>} : vector<7x224xbf16>, vector<224x224xbf16>, vector<7x224xf32> -> vector<7x224xf32>
    %315 = arith.addf %310, %314 : vector<7x224xf32>
    %316 = vector.extract_strided_slice %228 {offsets = [1, 0], sizes = [7, 224], strides = [1, 1]} : vector<9x224xbf16> to vector<7x224xbf16>
    %c1_295 = arith.constant 1 : index
    %c1_296 = arith.constant 1 : index
    %c0_297 = arith.constant 0 : index
    %c0_298 = arith.constant 0 : index
    %317 = vector.load %arg4[%c1_295, %c1_296, %c0_297, %c0_298] : memref<2x5x224x224xbf16, #tpu.memory_space<vmem>>, vector<1x1x224x224xbf16>
    %318 = vector.shape_cast %317 : vector<1x1x224x224xbf16> to vector<224x224xbf16>
    %cst_299 = arith.constant dense<0.000000e+00> : vector<7x224xf32>
    %319 = tpu.matmul %316, %318, %cst_299 {dimension_numbers = #tpu.dot_dimension_numbers<[1], [0], [0], [1], [0, 0, 1, 1], [], []>} : vector<7x224xbf16>, vector<224x224xbf16>, vector<7x224xf32> -> vector<7x224xf32>
    %320 = arith.addf %315, %319 : vector<7x224xf32>
    %321 = vector.extract_strided_slice %229 {offsets = [1, 0], sizes = [7, 224], strides = [1, 1]} : vector<9x224xbf16> to vector<7x224xbf16>
    %c1_300 = arith.constant 1 : index
    %c2_301 = arith.constant 2 : index
    %c0_302 = arith.constant 0 : index
    %c0_303 = arith.constant 0 : index
    %322 = vector.load %arg4[%c1_300, %c2_301, %c0_302, %c0_303] : memref<2x5x224x224xbf16, #tpu.memory_space<vmem>>, vector<1x1x224x224xbf16>
    %323 = vector.shape_cast %322 : vector<1x1x224x224xbf16> to vector<224x224xbf16>
    %cst_304 = arith.constant dense<0.000000e+00> : vector<7x224xf32>
    %324 = tpu.matmul %321, %323, %cst_304 {dimension_numbers = #tpu.dot_dimension_numbers<[1], [0], [0], [1], [0, 0, 1, 1], [], []>} : vector<7x224xbf16>, vector<224x224xbf16>, vector<7x224xf32> -> vector<7x224xf32>
    %325 = arith.addf %320, %324 : vector<7x224xf32>
    %326 = vector.extract_strided_slice %228 {offsets = [2, 0], sizes = [7, 224], strides = [1, 1]} : vector<9x224xbf16> to vector<7x224xbf16>
    %c1_305 = arith.constant 1 : index
    %c3_306 = arith.constant 3 : index
    %c0_307 = arith.constant 0 : index
    %c0_308 = arith.constant 0 : index
    %327 = vector.load %arg4[%c1_305, %c3_306, %c0_307, %c0_308] : memref<2x5x224x224xbf16, #tpu.memory_space<vmem>>, vector<1x1x224x224xbf16>
    %328 = vector.shape_cast %327 : vector<1x1x224x224xbf16> to vector<224x224xbf16>
    %cst_309 = arith.constant dense<0.000000e+00> : vector<7x224xf32>
    %329 = tpu.matmul %326, %328, %cst_309 {dimension_numbers = #tpu.dot_dimension_numbers<[1], [0], [0], [1], [0, 0, 1, 1], [], []>} : vector<7x224xbf16>, vector<224x224xbf16>, vector<7x224xf32> -> vector<7x224xf32>
    %330 = arith.addf %325, %329 : vector<7x224xf32>
    %331 = vector.extract_strided_slice %229 {offsets = [2, 0], sizes = [7, 224], strides = [1, 1]} : vector<9x224xbf16> to vector<7x224xbf16>
    %c1_310 = arith.constant 1 : index
    %c4_311 = arith.constant 4 : index
    %c0_312 = arith.constant 0 : index
    %c0_313 = arith.constant 0 : index
    %332 = vector.load %arg4[%c1_310, %c4_311, %c0_312, %c0_313] : memref<2x5x224x224xbf16, #tpu.memory_space<vmem>>, vector<1x1x224x224xbf16>
    %333 = vector.shape_cast %332 : vector<1x1x224x224xbf16> to vector<224x224xbf16>
    %cst_314 = arith.constant dense<0.000000e+00> : vector<7x224xf32>
    %334 = tpu.matmul %331, %333, %cst_314 {dimension_numbers = #tpu.dot_dimension_numbers<[1], [0], [0], [1], [0, 0, 1, 1], [], []>} : vector<7x224xbf16>, vector<224x224xbf16>, vector<7x224xf32> -> vector<7x224xf32>
    %335 = arith.addf %330, %334 : vector<7x224xf32>
    %336 = arith.maximumf %309, %335 : vector<7x224xf32>
    %c0_315 = arith.constant 0 : index
    %c0_316 = arith.constant 0 : index
    %337 = vector.load %arg5[%c0_315, %c0_316] : memref<1x224xf32, #tpu.memory_space<vmem>>, vector<1x224xf32>
    %338 = vector.broadcast %337 : vector<1x224xf32> to vector<7x224xf32>
    %339 = arith.addf %336, %338 : vector<7x224xf32>
    %cst_317 = arith.constant 0.000000e+00 : f32
    %340 = vector.broadcast %cst_317 : f32 to vector<7x224xf32>
    %341 = arith.maximumf %339, %340 : vector<7x224xf32>
    %342 = arith.truncf %341 : vector<7x224xf32> to vector<7x224xbf16>
    %c0_318 = arith.constant 0 : index
    %c0_319 = arith.constant 0 : index
    %343 = vector.load %arg7[%c0_318, %c0_319] : memref<1x128xf32, #tpu.memory_space<vmem>>, vector<1x128xf32>
    %344 = vector.extract_strided_slice %342 {offsets = [0, 0], sizes = [1, 224], strides = [1, 1]} : vector<7x224xbf16> to vector<1x224xbf16>
    %c0_320 = arith.constant 0 : index
    %c0_321 = arith.constant 0 : index
    %c0_322 = arith.constant 0 : index
    %345 = vector.load %arg6[%c0_320, %c0_321, %c0_322] : memref<7x224x128xbf16, #tpu.memory_space<vmem>>, vector<1x224x128xbf16>
    %346 = vector.shape_cast %345 : vector<1x224x128xbf16> to vector<224x128xbf16>
    %cst_323 = arith.constant dense<0.000000e+00> : vector<1x128xf32>
    %347 = tpu.matmul %344, %346, %cst_323 {dimension_numbers = #tpu.dot_dimension_numbers<[1], [0], [0], [1], [0, 0, 1, 1], [], []>} : vector<1x224xbf16>, vector<224x128xbf16>, vector<1x128xf32> -> vector<1x128xf32>
    %348 = arith.addf %343, %347 : vector<1x128xf32>
    %349 = vector.extract_strided_slice %342 {offsets = [1, 0], sizes = [1, 224], strides = [1, 1]} : vector<7x224xbf16> to vector<1x224xbf16>
    %c1_324 = arith.constant 1 : index
    %c0_325 = arith.constant 0 : index
    %c0_326 = arith.constant 0 : index
    %350 = vector.load %arg6[%c1_324, %c0_325, %c0_326] : memref<7x224x128xbf16, #tpu.memory_space<vmem>>, vector<1x224x128xbf16>
    %351 = vector.shape_cast %350 : vector<1x224x128xbf16> to vector<224x128xbf16>
    %cst_327 = arith.constant dense<0.000000e+00> : vector<1x128xf32>
    %352 = tpu.matmul %349, %351, %cst_327 {dimension_numbers = #tpu.dot_dimension_numbers<[1], [0], [0], [1], [0, 0, 1, 1], [], []>} : vector<1x224xbf16>, vector<224x128xbf16>, vector<1x128xf32> -> vector<1x128xf32>
    %353 = arith.addf %348, %352 : vector<1x128xf32>
    %354 = vector.extract_strided_slice %342 {offsets = [2, 0], sizes = [1, 224], strides = [1, 1]} : vector<7x224xbf16> to vector<1x224xbf16>
    %c2_328 = arith.constant 2 : index
    %c0_329 = arith.constant 0 : index
    %c0_330 = arith.constant 0 : index
    %355 = vector.load %arg6[%c2_328, %c0_329, %c0_330] : memref<7x224x128xbf16, #tpu.memory_space<vmem>>, vector<1x224x128xbf16>
    %356 = vector.shape_cast %355 : vector<1x224x128xbf16> to vector<224x128xbf16>
    %cst_331 = arith.constant dense<0.000000e+00> : vector<1x128xf32>
    %357 = tpu.matmul %354, %356, %cst_331 {dimension_numbers = #tpu.dot_dimension_numbers<[1], [0], [0], [1], [0, 0, 1, 1], [], []>} : vector<1x224xbf16>, vector<224x128xbf16>, vector<1x128xf32> -> vector<1x128xf32>
    %358 = arith.addf %353, %357 : vector<1x128xf32>
    %359 = vector.extract_strided_slice %342 {offsets = [3, 0], sizes = [1, 224], strides = [1, 1]} : vector<7x224xbf16> to vector<1x224xbf16>
    %c3_332 = arith.constant 3 : index
    %c0_333 = arith.constant 0 : index
    %c0_334 = arith.constant 0 : index
    %360 = vector.load %arg6[%c3_332, %c0_333, %c0_334] : memref<7x224x128xbf16, #tpu.memory_space<vmem>>, vector<1x224x128xbf16>
    %361 = vector.shape_cast %360 : vector<1x224x128xbf16> to vector<224x128xbf16>
    %cst_335 = arith.constant dense<0.000000e+00> : vector<1x128xf32>
    %362 = tpu.matmul %359, %361, %cst_335 {dimension_numbers = #tpu.dot_dimension_numbers<[1], [0], [0], [1], [0, 0, 1, 1], [], []>} : vector<1x224xbf16>, vector<224x128xbf16>, vector<1x128xf32> -> vector<1x128xf32>
    %363 = arith.addf %358, %362 : vector<1x128xf32>
    %364 = vector.extract_strided_slice %342 {offsets = [4, 0], sizes = [1, 224], strides = [1, 1]} : vector<7x224xbf16> to vector<1x224xbf16>
    %c4_336 = arith.constant 4 : index
    %c0_337 = arith.constant 0 : index
    %c0_338 = arith.constant 0 : index
    %365 = vector.load %arg6[%c4_336, %c0_337, %c0_338] : memref<7x224x128xbf16, #tpu.memory_space<vmem>>, vector<1x224x128xbf16>
    %366 = vector.shape_cast %365 : vector<1x224x128xbf16> to vector<224x128xbf16>
    %cst_339 = arith.constant dense<0.000000e+00> : vector<1x128xf32>
    %367 = tpu.matmul %364, %366, %cst_339 {dimension_numbers = #tpu.dot_dimension_numbers<[1], [0], [0], [1], [0, 0, 1, 1], [], []>} : vector<1x224xbf16>, vector<224x128xbf16>, vector<1x128xf32> -> vector<1x128xf32>
    %368 = arith.addf %363, %367 : vector<1x128xf32>
    %369 = vector.extract_strided_slice %342 {offsets = [5, 0], sizes = [1, 224], strides = [1, 1]} : vector<7x224xbf16> to vector<1x224xbf16>
    %c5 = arith.constant 5 : index
    %c0_340 = arith.constant 0 : index
    %c0_341 = arith.constant 0 : index
    %370 = vector.load %arg6[%c5, %c0_340, %c0_341] : memref<7x224x128xbf16, #tpu.memory_space<vmem>>, vector<1x224x128xbf16>
    %371 = vector.shape_cast %370 : vector<1x224x128xbf16> to vector<224x128xbf16>
    %cst_342 = arith.constant dense<0.000000e+00> : vector<1x128xf32>
    %372 = tpu.matmul %369, %371, %cst_342 {dimension_numbers = #tpu.dot_dimension_numbers<[1], [0], [0], [1], [0, 0, 1, 1], [], []>} : vector<1x224xbf16>, vector<224x128xbf16>, vector<1x128xf32> -> vector<1x128xf32>
    %373 = arith.addf %368, %372 : vector<1x128xf32>
    %374 = vector.extract_strided_slice %342 {offsets = [6, 0], sizes = [1, 224], strides = [1, 1]} : vector<7x224xbf16> to vector<1x224xbf16>
    %c6 = arith.constant 6 : index
    %c0_343 = arith.constant 0 : index
    %c0_344 = arith.constant 0 : index
    %375 = vector.load %arg6[%c6, %c0_343, %c0_344] : memref<7x224x128xbf16, #tpu.memory_space<vmem>>, vector<1x224x128xbf16>
    %376 = vector.shape_cast %375 : vector<1x224x128xbf16> to vector<224x128xbf16>
    %cst_345 = arith.constant dense<0.000000e+00> : vector<1x128xf32>
    %377 = tpu.matmul %374, %376, %cst_345 {dimension_numbers = #tpu.dot_dimension_numbers<[1], [0], [0], [1], [0, 0, 1, 1], [], []>} : vector<1x224xbf16>, vector<224x128xbf16>, vector<1x128xf32> -> vector<1x128xf32>
    %378 = arith.addf %373, %377 : vector<1x128xf32>
    %379 = vector.shape_cast %378 : vector<1x128xf32> to vector<1x128xf32>
    %380 = vector.broadcast %379 : vector<1x128xf32> to vector<8x128xf32>
    %c0_346 = arith.constant 0 : index
    %c0_347 = arith.constant 0 : index
    %381 = vector.load %arg8[%c0_346, %c0_347] : memref<8x128xf32, #tpu.memory_space<vmem>>, vector<8x128xf32>
    tpu.vector_store %arg8[%c0_346, %c0_347], %380 {strides = array<i32>} : memref<8x128xf32, #tpu.memory_space<vmem>>, vector<8x128xf32>,
    return
  }
  func.func @transform_0(%arg0: i32) -> (i32, i32) {
    %c0_i32 = arith.constant 0 : i32
    %c0_i32_0 = arith.constant 0 : i32
    return %arg0, %c0_i32 : i32, i32
  }
  func.func @transform_1(%arg0: i32) -> (i32, i32, i32, i32) {
    %c0_i32 = arith.constant 0 : i32
    %c0_i32_0 = arith.constant 0 : i32
    %c0_i32_1 = arith.constant 0 : i32
    %c0_i32_2 = arith.constant 0 : i32
    %c0_i32_3 = arith.constant 0 : i32
    return %c0_i32, %c0_i32_0, %c0_i32_1, %c0_i32_2 : i32, i32, i32, i32
  }
  func.func @transform_2(%arg0: i32) -> (i32, i32) {
    %c0_i32 = arith.constant 0 : i32
    %c0_i32_0 = arith.constant 0 : i32
    %c0_i32_1 = arith.constant 0 : i32
    return %c0_i32, %c0_i32_0 : i32, i32
  }
  func.func @transform_3(%arg0: i32) -> (i32, i32, i32, i32) {
    %c0_i32 = arith.constant 0 : i32
    %c0_i32_0 = arith.constant 0 : i32
    %c0_i32_1 = arith.constant 0 : i32
    %c0_i32_2 = arith.constant 0 : i32
    %c0_i32_3 = arith.constant 0 : i32
    return %c0_i32, %c0_i32_0, %c0_i32_1, %c0_i32_2 : i32, i32, i32, i32
  }
  func.func @transform_4(%arg0: i32) -> (i32, i32) {
    %c0_i32 = arith.constant 0 : i32
    %c0_i32_0 = arith.constant 0 : i32
    %c0_i32_1 = arith.constant 0 : i32
    return %c0_i32, %c0_i32_0 : i32, i32
  }
  func.func @transform_5(%arg0: i32) -> (i32, i32, i32) {
    %c0_i32 = arith.constant 0 : i32
    %c0_i32_0 = arith.constant 0 : i32
    %c0_i32_1 = arith.constant 0 : i32
    %c0_i32_2 = arith.constant 0 : i32
    return %c0_i32, %c0_i32_0, %c0_i32_1 : i32, i32, i32
  }
  func.func @transform_6(%arg0: i32) -> (i32, i32) {
    %c0_i32 = arith.constant 0 : i32
    %c0_i32_0 = arith.constant 0 : i32
    %c0_i32_1 = arith.constant 0 : i32
    return %c0_i32, %c0_i32_0 : i32, i32
  }
  func.func @transform_7(%arg0: i32) -> (i32, i32) {
    %c0_i32 = arith.constant 0 : i32
    %c0_i32_0 = arith.constant 0 : i32
    return %arg0, %c0_i32 : i32, i32
  }
}

</mosaic_0001>

<bundles_post_ra>
// kernel: cnn_forward.1
= control target key start
LH: loop header
LB: loop body
LE: loop exit
PB: predicated region body
PF: predicated region fallthrough
CT: control target
= control target key end

     0   :  { %12 = vsyncpa [#allocation3], 0  ;;  %s9860_s0 = inlined_call_operand.vmem [shape: bf16[64,32], index: 0, kind: input, shape index: {}]   ;;  %s9861_s1 = inlined_call_operand.hbm [shape: bf16[2,5,32,224], index: 1, kind: input, shape index: {}]   ;;  %s9862_s2 = inlined_call_operand.hbm [shape: f32[1,224], index: 2, kind: input, shape index: {}]   ;;  %s9863_s3 = inlined_call_operand.hbm [shape: bf16[2,5,224,224], index: 3, kind: input, shape index: {}]   ;;  %s9864_s4 = inlined_call_operand.hbm [shape: f32[1,224], index: 4, kind: input, shape index: {}]   ;;  %s9865_s5 = inlined_call_operand.hbm [shape: bf16[7,224,128], index: 5, kind: input, shape index: {}]   ;;  %s9866_s6 = inlined_call_operand.hbm [shape: f32[1,128], index: 6, kind: input, shape index: {}]   ;;  %s9867_s7 = inlined_call_operand.vmem [shape: f32[16,128], index: 7, kind: output, shape index: {}]  }
   0x1   :  { %13 = vsyncpa [#allocation5], 0 }
   0x2   :  { %14 = vsyncpa [#allocation8], 0 }
   0x3   :  { %15 = vsyncpa [#allocation11], 0  ;;  %s8006_s24 = smov 0  }
   0x4 LB: > { %s7955_s25 = smov [#allocation4]   ;;  %s8012_s27 = sadd.s32 4294967295, %s7953_s24   ;;  %s7953_s24 = sphi %s8006_s24, %s21_s24  }
   0x5   : > { %s230_s26 = sshll.u32 %s7955_s25, 4  ;;  %p6309_p0 = scmp.ge.s32.totalorder %s7953_s24, 1  ;;  %s8017_s26 = int_to_ptr.vmem [resolvable:$true] %s230_s26 }
   0x6   : > { %p204_p1 = scmp.lt.s32.totalorder %s7953_s24, 3  ;;  %p9868_p2 = scmp.eq.s32.totalorder %s8012_s27, 0 }
   0x7   : > { %s7956_s29 = smov [#allocation7]   ;;  %s7957_s8 = smov [#allocation2]  }
   0x8   : > { %p8019_p3 = pnand %p6309_p0, %p204_p1  ;;  %s254_s30 = sshll.u32 %s7956_s29, 4  ;;  %s8025_s30 = int_to_ptr.vmem [resolvable:$true] %s254_s30 }
   0x9   : > { %s216_s9 = sshll.u32 %s7957_s8, 4  ;;  %s7958_s11 = smov [#allocation6]   ;;  %s8033_s9 = int_to_ptr.vmem [resolvable:$true] %s216_s9 }
   0xa   : > { %s10015_s28 = scalar_select %p8019_p3, 1, 0 }
   0xb   : > { %p7061_p4 = pneg %p8019_p3  ;;  %s8035_s12 = sshll.u32 %s7958_s11, 4  ;;  %s241_s12 = int_to_ptr.vmem [resolvable:$true] %s8035_s12 }
   0xc   : > { %s7763_s15 = scalar_lea.hbm %s9862_s2, 32 }
   0xd   : > { %p8029_p5 = pnand %p9868_p2, %p7061_p4  ;;  %p7764_p6 = scmp.ne.s32.totalorder %s9862_s2, %s7763_s15 }
   0xe   : > { %p7770_p10 = scmp.lt.u32.totalorder %s7763_s15, %s9862_s2 }
   0xf   : > { %p8045_p7 = pneg %p8029_p5 }
  0x11   : > { %p7766_p8 = pnand %p8045_p7, %p7764_p6 }
  0x13   : > { %p7767_p9 = pneg %p7766_p8 }
  0x15   : > { %p7772_p11 = pnand %p7770_p10, %p7767_p9 }
  0x17   : > { %7775 = shalt.err (!%p7772_p11)
}
  0x18   : > { %s7776_s21 = scalar_lea.vmem %s8017_s26, 32  ;;  %p7784_p1 = scmp.lt.s32.totalorder %s8017_s26, %s8017_s26 }
  0x19   : > { %p7777_p12 = scmp.ne.s32.totalorder %s8017_s26, %s7776_s21  ;;  %p7785_p4 = scmp.lt.s32.totalorder %s7776_s21, %s7776_s21 }
  0x1b   : > { %p7779_p13 = pnand %p7777_p12, %p8045_p7  ;;  %p7786_p6 = por %p7785_p4, %p7784_p1 }
  0x1d   : > { %p7780_p0 = pneg %p7779_p13 }
  0x1f   : > { %p7787_p8 = pnand %p7786_p6, %p7780_p0 }
  0x21   : > { %7790 = shalt.err (!%p7787_p8)
}
  0x22   : > { %7067 = dma.hbm_to_vmem [thread:$0]  (!%p8029_p5), %s9862_s2, 32, %s8017_s26, [#allocation5]  }
  0x23   : > { %s7791_s8 = scalar_lea.hbm %s9864_s4, 32 }
  0x24   : > { %p7792_p9 = scmp.ne.s32.totalorder %s9864_s4, %s7791_s8  ;;  %p7798_p12 = scmp.lt.u32.totalorder %s7791_s8, %s9864_s4 }
  0x26   : > { %p7794_p10 = pnand %p7792_p9, %p8045_p7 }
  0x28   : > { %p7795_p11 = pneg %p7794_p10 }
  0x2a   : > { %p7800_p13 = pnand %p7798_p12, %p7795_p11 }
  0x2c   : > { %7803 = shalt.err (!%p7800_p13)
}
  0x2d   : > { %s7804_s26 = scalar_lea.vmem %s8025_s30, 32  ;;  %p7812_p6 = scmp.lt.s32.totalorder %s8025_s30, %s8025_s30 }
  0x2e   : > { %p7805_p0 = scmp.ne.s32.totalorder %s8025_s30, %s7804_s26  ;;  %p7813_p8 = scmp.lt.s32.totalorder %s7804_s26, %s7804_s26 }
  0x30   : > { %p7807_p1 = pnand %p7805_p0, %p8045_p7  ;;  %p7814_p9 = por %p7813_p8, %p7812_p6 }
  0x32   : > { %p7808_p4 = pneg %p7807_p1 }
  0x34   : > { %p7815_p10 = pnand %p7814_p9, %p7808_p4 }
  0x36   : > { %7818 = shalt.err (!%p7815_p10)
}
  0x37   : > { %7073 = dma.hbm_to_vmem [thread:$0]  (!%p8029_p5), %s9864_s4, 32, %s8025_s30, [#allocation8]  }
  0x38   : > { %s7819_s21 = scalar_lea.hbm %s9861_s1, 5120 }
  0x39   : > { %p7820_p11 = scmp.ne.s32.totalorder %s9861_s1, %s7819_s21  ;;  %p7826_p0 = scmp.lt.u32.totalorder %s7819_s21, %s9861_s1 }
  0x3b   : > { %p7822_p12 = pnand %p7820_p11, %p8045_p7 }
  0x3d   : > { %p7823_p13 = pneg %p7822_p12 }
  0x3f   : > { %p7828_p1 = pnand %p7826_p0, %p7823_p13 }
  0x41   : > { %7831 = shalt.err (!%p7828_p1)
}
  0x42   : > { %s7832_s30 = scalar_lea.vmem %s8033_s9, 5120  ;;  %p7840_p9 = scmp.lt.s32.totalorder %s8033_s9, %s8033_s9 }
  0x43   : > { %p7833_p4 = scmp.ne.s32.totalorder %s8033_s9, %s7832_s30  ;;  %p7841_p10 = scmp.lt.s32.totalorder %s7832_s30, %s7832_s30 }
  0x45   : > { %p7835_p6 = pnand %p7833_p4, %p8045_p7  ;;  %p7842_p11 = por %p7841_p10, %p7840_p9 }
  0x47   : > { %p7836_p8 = pneg %p7835_p6 }
  0x49   : > { %p7843_p12 = pnand %p7842_p11, %p7836_p8 }
  0x4b   : > { %7846 = shalt.err (!%p7843_p12)
}
  0x4c   : > { %s7959_s8 = smov 128   ;;  %s7960_s11 = smov 8  }
  0x4d   : > { %7064 = dma.hbm_to_vmem [thread:$0]  (!%p8029_p5), %s9861_s1, 5120, %s8033_s9, [#allocation3], %s7959_s8, %s7959_s8, %s7960_s11  }
  0x4e   : > { %s7847_s16 = scalar_lea.hbm %s9863_s3, 35840 }
  0x4f   : > { %p7848_p13 = scmp.ne.s32.totalorder %s9863_s3, %s7847_s16  ;;  %p7854_p4 = scmp.lt.u32.totalorder %s7847_s16, %s9863_s3 }
  0x51   : > { %p7850_p0 = pnand %p7848_p13, %p8045_p7 }
  0x53   : > { %p7851_p1 = pneg %p7850_p0 }
  0x55   : > { %p7856_p6 = pnand %p7854_p4, %p7851_p1 }
  0x57   : > { %7859 = shalt.err (!%p7856_p6)
}
  0x58   : > { %s7860_s22 = scalar_lea.vmem %s241_s12, 35840  ;;  %p7868_p11 = scmp.lt.s32.totalorder %s241_s12, %s241_s12 }
  0x59   : > { %p7861_p8 = scmp.ne.s32.totalorder %s241_s12, %s7860_s22  ;;  %p7869_p12 = scmp.lt.s32.totalorder %s7860_s22, %s7860_s22 }
  0x5b   : > { %p7863_p9 = pnand %p7861_p8, %p8045_p7  ;;  %p7870_p2 = por %p7869_p12, %p7868_p11 }
  0x5d   : > { %p7864_p10 = pneg %p7863_p9 }
  0x5f   : > { %p7871_p3 = pnand %p7870_p2, %p7864_p10 }
  0x61   : > { %7874 = shalt.err (!%p7871_p3)
}
  0x62   : > { %7070 = dma.hbm_to_vmem [thread:$0]  (!%p8029_p5), %s9863_s3, 35840, %s241_s12, [#allocation5], %s7959_s8, %s7959_s8, %s7960_s11  }
  0x63   : > { %s7961_s25 = smov [#allocation9]   ;;  %s7875_s14 = scalar_lea.hbm %s9865_s5, 12544 }
  0x64   : > { %s264_s29 = sshll.u32 %s7961_s25, 4  ;;  %p7876_p13 = scmp.ne.s32.totalorder %s9865_s5, %s7875_s14  ;;  %s265_s29 = int_to_ptr.vmem [resolvable:$true] %s264_s29 }
  0x65   : > { %p7882_p0 = scmp.lt.u32.totalorder %s7875_s14, %s9865_s5 }
  0x66   : > { %p7878_p2 = pnand %p7876_p13, %p8045_p7 }
  0x68   : > { %p7879_p3 = pneg %p7878_p2 }
  0x6a   : > { %p7884_p1 = pnand %p7882_p0, %p7879_p3 }
  0x6c   : > { %7887 = shalt.err (!%p7884_p1)
}
  0x6d   : > { %s7888_s12 = scalar_lea.vmem %s265_s29, 12544  ;;  %p7896_p9 = scmp.lt.s32.totalorder %s265_s29, %s265_s29 }
  0x6e   : > { %p7889_p4 = scmp.ne.s32.totalorder %s265_s29, %s7888_s12  ;;  %p7897_p10 = scmp.lt.s32.totalorder %s7888_s12, %s7888_s12 }
  0x70   : > { %p7891_p6 = pnand %p7889_p4, %p8045_p7  ;;  %p7898_p11 = por %p7897_p10, %p7896_p9 }
  0x72   : > { %p7892_p8 = pneg %p7891_p6 }
  0x74   : > { %p7899_p12 = pnand %p7898_p11, %p7892_p8 }
  0x76   : > { %7902 = shalt.err (!%p7899_p12)
}
  0x77   : > { %s7962_s8 = smov 64   ;;  %s7963_s11 = smov 4  }
  0x78   : > { %7076 = dma.hbm_to_vmem [thread:$0]  (!%p8029_p5), %s9865_s5, 12544, %s265_s29, [#allocation8], %s7962_s8, %s7962_s8, %s7963_s11  }
  0x79   : > { %s7964_s21 = smov [#allocation10]   ;;  %s7903_s25 = scalar_lea.hbm %s9866_s6, 16 }
  0x7a   : > { %s278_s22 = sshll.u32 %s7964_s21, 4  ;;  %p7904_p13 = scmp.ne.s32.totalorder %s9866_s6, %s7903_s25  ;;  %s279_s22 = int_to_ptr.vmem [resolvable:$true] %s278_s22 }
  0x7b   : > { %p7910_p0 = scmp.lt.u32.totalorder %s7903_s25, %s9866_s6 }
  0x7c   : > { %p7906_p2 = pnand %p7904_p13, %p8045_p7 }
  0x7e   : > { %p7907_p3 = pneg %p7906_p2 }
  0x80   : > { %p7912_p1 = pnand %p7910_p0, %p7907_p3 }
  0x82   : > { %7915 = shalt.err (!%p7912_p1)
}
  0x83   : > { %s7916_s29 = scalar_lea.vmem %s279_s22, 16  ;;  %s7923_s26 = scalar_lea.vmem %s279_s22, 32 }
  0x84   : > { %p7917_p4 = scmp.ne.s32.totalorder %s279_s22, %s7916_s29  ;;  %p7924_p9 = scmp.lt.s32.totalorder %s279_s22, %s279_s22 }
  0x85   : > { %p7925_p10 = scmp.lt.s32.totalorder %s7923_s26, %s7916_s29 }
  0x86   : > { %p7919_p6 = pnand %p7917_p4, %p8045_p7 }
  0x87   : > { %p7926_p11 = por %p7925_p10, %p7924_p9 }
  0x88   : > { %p7920_p8 = pneg %p7919_p6 }
  0x8a   : > { %p7927_p12 = pnand %p7926_p11, %p7920_p8 }
  0x8c   : > { %7930 = shalt.err (!%p7927_p12)
}
  0x8d   : > { %7079 = dma.hbm_to_vmem [thread:$0]  (!%p8029_p5), %s9866_s6, 16, %s279_s22, [#allocation11]  }
  0x8e   : > { %p10018_p13 = scmp.ne.s32.totalorder %s10015_s28, 0 }
  0x90   : > { %300 = sbr.rel (%p10018_p13) target bundleno = 2099 (0x833), region = 48 }
  0x97   : > { %p10019_p2 = scmp.eq.s32.totalorder %s8012_s27, 0 }
  0x99   : > { %7936 = dma.done.wait (%p10019_p2), [#allocation3], 5120   ;;  %p10020_p7 = pmov %p10019_p2 }
  0x9a   : > { %p10021_p3 = pmov %p10019_p2 }
  0x9b   : > { %7938 = vsyncadd (%p10020_p7), [#allocation3], 4294962176 }
  0x9c   : > { %7940 = dma.done.wait (%p10021_p3), [#allocation5], 35872   ;;  %p10022_p0 = pmov %p10019_p2 }
  0x9e   : > { %7942 = vsyncadd (%p10022_p0), [#allocation5], 4294931424  ;;  %p10023_p1 = pmov %p10022_p0 }
  0x9f   : > { %p10024_p5 = pmov %p10022_p0 }
  0xa0   : > { %7944 = dma.done.wait (%p10023_p1), [#allocation8], 12576  }
  0xa1   : > { %7946 = vsyncadd (%p10024_p5), [#allocation8], 4294954720  ;;  %p10025_p4 = pmov %p10022_p0 }
  0xa2   : > { %p10026_p6 = pmov %p10022_p0 }
  0xa3   : > { %7948 = dma.done.wait (%p10025_p4), [#allocation11], 16  }
  0xa4   : > { %7950 = vsyncadd (%p10026_p6), [#allocation11], 4294967280  ;;  %s6324_s28 = sshll.u32 %s8012_s27, 2  ;;  %v9871_v0 = vmov 0   ;;  %v8188_v1 = vld [vmem:[#allocation2 + $0x24] ss:$8 sps:$4 sm:$0xff]  }
  0xa5   : > { %431 = vmatprep.mubr.bf16.mxu1 %v9871_v0  ;;  %p352_p8 = scmp.lt.s32.totalorder %s6324_s28, 7  ;;  %635 = vmatprep.mubr.bf16.mxu0 %v9871_v0  ;;  %v8190_v2 = vld [vmem:[#allocation2 + $0x20] ss:$8 sps:$4 sm:$0xff]   ;;  %v8193_v3 = vld [vmem:[#allocation2 + $0x34] ss:$8 sps:$4 sm:$0xff]   ;;  %vm395_vm0 = vcmask 261120  }
  0xa6   : > { %399 = vmatprep.subr.bf16.mxu1 %v8188_v1  ;;  %v8196_v4 = vld [vmem:[#allocation2 + $0x30] ss:$8 sps:$4 sm:$0xff]   ;;  %v8204_v5 = vld [vmem:[#allocation2 + $0x4] ss:$8 sps:$4 sm:$0xff]   ;;  %v8211_v8 = vld [vmem:[#allocation2 + $0x60] ss:$8 sps:$4 sm:$0xff]  }
  0xa7   : > { %s10296_s28 = smov (!%p352_p8, %s6324_s28), 7  ;;  %400 = vmatpush1.bf16.msra.mxu1 %v8190_v2  ;;  %v8206_v6 = vld [vmem:[#allocation2 + $0x64] ss:$8 sps:$4 sm:$0xff]   ;;  %v8214_v9 = vld [vmem:[#allocation2] ss:$8 sps:$4 sm:$0xff]   ;;  %vm2420_vm1 = vcmask 1040384  }
  0xa8   : > { %s6325_s10 = sshll.u32 %s10296_s28, 2  ;;  %401 = vmatprep.subr.bf16.mxu1 %v8193_v3  ;;  %603 = vmatprep.subr.bf16.mxu0 %v8206_v6  ;;  %v8219_v10 = vld [vmem:[#allocation2 + $0x14] ss:$8 sps:$4 sm:$0xff]   ;;  %v8223_v12 = vld [vmem:[#allocation2 + $0x70] ss:$8 sps:$4 sm:$0xff]   ;;  %vm2425_vm4 = vcmask 1043456  }
  0xa9   : > { %s8201_s8 = scalar_lea.vmem %s9860_s0, %s6325_s10  ;;  %604 = vmatpush1.bf16.msra.mxu0 %v8211_v8  ;;  %v8221_v11 = vld [vmem:[#allocation2 + $0x74] ss:$8 sps:$4 sm:$0xff]   ;;  %v8235_v15 = vld [vmem:[#allocation2 + $0x10] ss:$8 sps:$4 sm:$0xff]   ;;  %v8240_v17 = vld [vmem:[#allocation2 + $0x44] ss:$8 sps:$4 sm:$0xff]  }
  0xaa   : > { %v8209_v7 = vld [vmem:[%s8201_s8 + $0x4] sm:$0xf]  ;;  %v8226_v13 = vld [vmem:[%s8201_s8 + $0xc] sm:$0xf]  ;;  %605 = vmatprep.subr.bf16.mxu0 %v8221_v11  ;;  %v8232_v14 = vld [vmem:[%s8201_s8] sm:$0xf] }
  0xab   : > { %402 = vmatpush1.bf16.msra.mxu1 %v8196_v4  ;;  %v6347_v16 = vcombine.low %v8232_v14, %v8232_v14  ;;  %v8242_v18 = vld [vmem:[#allocation2 + $0x84] ss:$8 sps:$4 sm:$0xff]   ;;  %v8246_v19 = vld [vmem:[#allocation2 + $0x80] ss:$8 sps:$4 sm:$0xff]   ;;  %v8249_v20 = vld [vmem:[#allocation2 + $0x94] ss:$8 sps:$4 sm:$0xff]   ;;  %v6382_v47 = vcombine.low %v8209_v7, %v8209_v7  ;;  %v8444_v57 = vcombine.low %v8226_v13, %v8226_v13 }
  0xac   : > { %463 = vmatprep.subr.bf16.mxu1 %v8204_v5  ;;  %v8256_v22 = vld [vmem:[#allocation2 + $0x90] ss:$8 sps:$4 sm:$0xff]   ;;  %v8260_v25 = vld [vmem:[#allocation2 + $0x40] ss:$8 sps:$4 sm:$0xff]   ;;  %v8262_v26 = vld [vmem:[#allocation2 + $0x54] ss:$8 sps:$4 sm:$0xff]  }
  0xad   : > { %606 = vmatpush1.bf16.msra.mxu0 %v8223_v12  ;;  %v657_v21 = vshll.u32 %v6347_v16, 16  ;;  %v655_v23 = vshrl.u32 %v6347_v16, 16  ;;  %v8271_v28 = vld [vmem:[#allocation2 + $0x50] ss:$8 sps:$4 sm:$0xff]   ;;  %v8275_v29 = vld [vmem:[#allocation2 + $0xc4] ss:$8 sps:$4 sm:$0xff]  }
  0xae   : > { %6331 = vmatmul.mubr.msk.bf16.vlgmr.msra.gmra.mrb[0].mxu1 %vm395_vm0, %v8209_v7  ;;  %684 = vmatprep.subr.bf16.mxu0 %v8242_v18  ;;  %v8283_v30 = vld [vmem:[%s8201_s8 + $0x8] sm:$0xf]  ;;  %v8289_v32 = vld [vmem:[#allocation2 + $0xd4] ss:$8 sps:$4 sm:$0xff]   ;;  %v8292_v33 = vld [vmem:[#allocation2 + $0xd0] ss:$8 sps:$4 sm:$0xff]  }
  0xaf   : > { %464 = vmatpush1.bf16.msra.mxu1 %v8214_v9  ;;  %495 = vmatprep.mubr.bf16.mxu1 %v9871_v0  ;;  %v659_v24 = vrot.slane %v657_v21, 1  ;;  %v8285_v31 = vld [vmem:[#allocation2 + $0xc0] ss:$8 sps:$4 sm:$0xff]   ;;  %v8297_v34 = vld [vmem:[#allocation2 + $0xa4] ss:$8 sps:$4 sm:$0xff]   ;;  %v1239_v48 = vshll.u32 %v6382_v47, 16  ;;  %v6393_v55 = vcombine.low %v8283_v30, %v8283_v30 }
  0xb0   : > { %465 = vmatprep.subr.bf16.mxu1 %v8219_v10  ;;  %6346 = vmatmul.mubr.msk.bf16.vlgmr.msra.gmra.mrb[0].mxu0 %vm395_vm0, %v8226_v13  ;;  %v8304_v35 = vld [vmem:[#allocation2 + $0xa0] ss:$8 sps:$4 sm:$0xff]   ;;  %v8308_v36 = vld [vmem:[#allocation2 + $0xb4] ss:$8 sps:$4 sm:$0xff]   ;;  %v8313_v37 = vld [vmem:[#allocation2 + $0xb0] ss:$8 sps:$4 sm:$0xff]  }
  0xb1   : > { %685 = vmatpush1.bf16.msra.mxu0 %v8246_v19  ;;  %716 = vmatprep.mubr.bf16.mxu0 %v9871_v0  ;;  %v8268_v27 = vor.u32 %v659_v24, %v655_v23  ;;  %v8318_v38 = vld [vmem:[#allocation2 + $0xe4] ss:$8 sps:$4 sm:$0xff]   ;;  %v8328_v39 = vld [vmem:[#allocation2 + $0xe0] ss:$8 sps:$4 sm:$0xff]   ;;  %v8332_v40 = vld [vmem:[#allocation2 + $0xf4] ss:$8 sps:$4 sm:$0xff]  }
  0xb2   : > { %686 = vmatprep.subr.bf16.mxu0 %v8249_v20  ;;  %v8335_v41 = vld [vmem:[#allocation2 + $0xf0] ss:$8 sps:$4 sm:$0xff]   ;;  %v8340_v42 = vld [vmem:[#allocation2 + $0x104] ss:$8 sps:$4 sm:$0xff]   ;;  %v8350_v43 = vld [vmem:[#allocation2 + $0x100] ss:$8 sps:$4 sm:$0xff]  }
  0xb3   : > { %466 = vmatpush1.bf16.msra.mxu1 %v8235_v15  ;;  %v8354_v44 = vld [vmem:[#allocation2 + $0x114] ss:$8 sps:$4 sm:$0xff]   ;;  %v8357_v45 = vld [vmem:[#allocation2 + $0x110] ss:$8 sps:$4 sm:$0xff]   ;;  %v8362_v46 = vld [vmem:[#allocation2 + $0x124] ss:$8 sps:$4 sm:$0xff]  }
  0xb4   : > { %532 = vmatprep.subr.bf16.mxu1 %v8240_v17  ;;  %v8374_v49 = vld [vmem:[#allocation2 + $0x120] ss:$8 sps:$4 sm:$0xff]   ;;  %v8378_v50 = vld [vmem:[#allocation2 + $0x134] ss:$8 sps:$4 sm:$0xff]   ;;  %v1237_v51 = vshrl.u32 %v6382_v47, 16  ;;  %v1241_v52 = vrot.slane %v1239_v48, 1 }
  0xb5   : > { %687 = vmatpush1.bf16.msra.mxu0 %v8256_v22  ;;  %v8381_v53 = vld [vmem:[#allocation2 + $0x130] ss:$8 sps:$4 sm:$0xff]   ;;  %v1696_v56 = vshll.u32 %v6393_v55, 16  ;;  %v1694_v58 = vshrl.u32 %v6393_v55, 16  ;;  %v2133_v60 = vshll.u32 %v8444_v57, 16  ;;  %v2131_v21 = vshrl.u32 %v8444_v57, 16 }
  0xb6   : > { %1065 = vmatprep.subr.bf16.mxu0 %v8188_v1  ;;  %v8389_v54 = vor.u32 %v1241_v52, %v1237_v51  ;;  %v7693_v61 = vld [vmem:[#allocation2 + $0x24] ss:$8 sps:$4 sm:$0xff]   ;;  %v7694_v63 = vld [vmem:[#allocation2 + $0x20] ss:$8 sps:$4 sm:$0xff]   ;;  %v7710_v16 = vld [vmem:[#allocation2 + $0x74] ss:$8 sps:$4 sm:$0xff]  }
  0xb7   : > { %v1698_v59 = vrot.slane %v1696_v56, 1  ;;  %v7715_v23 = vld [vmem:[#allocation2 + $0x90] ss:$8 sps:$4 sm:$0xff]   ;;  %v7733_v52 = vld [vmem:[#allocation2 + $0x134] ss:$8 sps:$4 sm:$0xff]   ;;  %vm2652_vm5 = vcmask 785408  }
  0xb8   : > { %v8550_v55 = vld [vmem:[#allocation6 + $0xe4] ss:$8 sps:$4 sm:$0xff]   ;;  %v8552_v56 = vld [vmem:[#allocation6 + $0xf4] ss:$8 sps:$4 sm:$0xff]   ;;  %v7181_v57 = vld [vmem:[#allocation6 + $0x2a0] ss:$8 sps:$4 sm:$0xff]  }
  0xb9   : > { %v8468_v62 = vor.u32 %v1698_v59, %v1694_v58  ;;  %v7183_v58 = vld [vmem:[#allocation6 + $0x2a4] ss:$8 sps:$4 sm:$0xff]   ;;  %v8556_v59 = vld [vmem:[#allocation6 + $0xf0] ss:$8 sps:$4 sm:$0xff]   ;;  %vm2421_vm2 = vsmask.f32 256 }
  0xba   : > { %6336 = vmatmul.mubr.msk.bf16.vlgmr.msra.gmra.mrb[0].mxu1 %vm395_vm0, %v8232_v14  ;;  %vm8656_vm3 = vmand %vm2420_vm1, %vm2421_vm2  ;;  %p357_p9 = scmp.lt.s32.totalorder %s8012_s27, 1 }
  0xbb   : > { %533 = vmatpush1.bf16.msra.mxu1 %v8260_v25  ;;  %564 = vmatprep.mubr.bf16.mxu1 %v9871_v0 }
  0xbc   : > { %534 = vmatprep.subr.bf16.mxu1 %v8262_v26  ;;  %6352 = vmatmul.mubr.msk.bf16.vlgmr.msra.gmra.mrb[0].mxu0 %vm395_vm0, %v8268_v27  ;;  %s10298_s27 = smov (!%p357_p9, %s8012_s27), 1 }
  0xbd   : > { %1066 = vmatpush1.bf16.msra.mxu0 %v8190_v2  ;;  %1097 = vmatprep.mubr.bf16.mxu0 %v9871_v0  ;;  %s6326_s11 = sshll.u32 %s10298_s27, 3 }
  0xbe   : > { %1067 = vmatprep.subr.bf16.mxu0 %v8193_v3  ;;  %s360_s21 = scalar_lea.vmem %s9867_s7, %s6326_s11 }
  0xbf   : > { %535 = vmatpush1.bf16.msra.mxu1 %v8271_v28 }
  0xc0   : > { %757 = vmatprep.subr.bf16.mxu1 %v8275_v29 }
  0xc1   : > { %1068 = vmatpush1.bf16.msra.mxu0 %v8196_v4 }
  0xc2   : > { %1106 = vmatprep.subr.bf16.mxu0 %v8204_v5 }
  0xc4   : > { %6378 = vmatmul.mubr.msk.bf16.vlgmr.msra.gmra.mrb[4].mxu0 %vm395_vm0, %v8283_v30 }
  0xc5   : > { %1107 = vmatpush1.bf16.msra.mxu0 %v8214_v9  ;;  %1138 = vmatprep.mubr.bf16.mxu0 %v9871_v0 }
  0xc6   : > { %6341 = vmatmul.mubr.msk.bf16.vlgmr.msra.gmra.mrb[0].mxu1 %vm395_vm0, %v8283_v30  ;;  %1108 = vmatprep.subr.bf16.mxu0 %v8219_v10 }
  0xc7   : > { %758 = vmatpush1.bf16.msra.mxu1 %v8285_v31  ;;  %789 = vmatprep.mubr.bf16.mxu1 %v9871_v0 }
  0xc8   : > { %759 = vmatprep.subr.bf16.mxu1 %v8289_v32 }
  0xc9   : > { %1109 = vmatpush1.bf16.msra.mxu0 %v8235_v15 }
  0xca   : > { %1147 = vmatprep.subr.bf16.mxu0 %v8240_v17 }
  0xcb   : > { %760 = vmatpush1.bf16.msra.mxu1 %v8292_v33 }
  0xcc   : > { %818 = vmatprep.subr.bf16.mxu1 %v8297_v34 }
  0xce   : > { %6357 = vmatmul.mubr.msk.bf16.vlgmr.msra.gmra.mrb[4].mxu1 %vm395_vm0, %v8209_v7 }
  0xcf   : > { %819 = vmatpush1.bf16.msra.mxu1 %v8304_v35  ;;  %850 = vmatprep.mubr.bf16.mxu1 %v9871_v0 }
  0xd0   : > { %820 = vmatprep.subr.bf16.mxu1 %v8308_v36  ;;  %6379 = vmatmul.mubr.msk.bf16.vlgmr.msra.gmra.mrb[4].mxu0 %vm395_vm0, %v8209_v7 }
  0xd1   : > { %1148 = vmatpush1.bf16.msra.mxu0 %v8260_v25  ;;  %1179 = vmatprep.mubr.bf16.mxu0 %v9871_v0 }
  0xd2   : > { %1149 = vmatprep.subr.bf16.mxu0 %v8262_v26 }
  0xd3   : > { %821 = vmatpush1.bf16.msra.mxu1 %v8313_v37 }
  0xd4   : > { %884 = vmatprep.subr.bf16.mxu1 %v8318_v38 }
  0xd5   : > { %1150 = vmatpush1.bf16.msra.mxu0 %v8271_v28 }
  0xd6   : > { %1190 = vmatprep.subr.bf16.mxu0 %v8206_v6 }
  0xda   : > { %6362 = vmatmul.mubr.msk.bf16.vlgmr.msra.gmra.mrb[4].mxu1 %vm395_vm0, %v8232_v14  ;;  %v7708_v14 = vld [vmem:[#allocation2 + $0x64] ss:$8 sps:$4 sm:$0xff]  }
  0xdb   : > { %885 = vmatpush1.bf16.msra.mxu1 %v8328_v39  ;;  %916 = vmatprep.mubr.bf16.mxu1 %v9871_v0 }
  0xdc   : > { %886 = vmatprep.subr.bf16.mxu1 %v8332_v40  ;;  %6380 = vmatmul.mubr.msk.bf16.vlgmr.msra.gmra.mrb[4].mxu0 %vm395_vm0, %v8226_v13 }
  0xdd   : > { %1191 = vmatpush1.bf16.msra.mxu0 %v8211_v8  ;;  %1222 = vmatprep.mubr.bf16.mxu0 %v9871_v0 }
  0xde   : > { %1192 = vmatprep.subr.bf16.mxu0 %v8221_v11 }
  0xdf   : > { %887 = vmatpush1.bf16.msra.mxu1 %v8335_v41 }
  0xe0   : > { %952 = vmatprep.subr.bf16.mxu1 %v8340_v42 }
  0xe1   : > { %1193 = vmatpush1.bf16.msra.mxu0 %v8223_v12 }
  0xe2   : > { %1246 = vmatprep.subr.bf16.mxu0 %v8242_v18 }
  0xe6   : > { %6367 = vmatmul.mubr.msk.bf16.vlgmr.msra.gmra.mrb[4].mxu1 %vm395_vm0, %v8283_v30 }
  0xe7   : > { %953 = vmatpush1.bf16.msra.mxu1 %v8350_v43  ;;  %984 = vmatprep.mubr.bf16.mxu1 %v9871_v0 }
  0xe8   : > { %954 = vmatprep.subr.bf16.mxu1 %v8354_v44  ;;  %6381 = vmatmul.mubr.msk.bf16.vlgmr.msra.gmra.mrb[4].mxu0 %vm395_vm0, %v8268_v27 }
  0xe9   : > { %1247 = vmatpush1.bf16.msra.mxu0 %v8246_v19  ;;  %1278 = vmatprep.mubr.bf16.mxu0 %v9871_v0 }
  0xea   : > { %1248 = vmatprep.subr.bf16.mxu0 %v8249_v20 }
  0xeb   : > { %955 = vmatpush1.bf16.msra.mxu1 %v8357_v45 }
  0xec   : > { %1020 = vmatprep.subr.bf16.mxu1 %v8362_v46 }
  0xed   : > { %1249 = vmatpush1.bf16.msra.mxu0 %v8256_v22 }
  0xee   : > { %1522 = vmatprep.subr.bf16.mxu0 %v8188_v1  ;;  %v7695_v1 = vld [vmem:[#allocation2 + $0x34] ss:$8 sps:$4 sm:$0xff]  }
  0xf2   : > { %6372 = vmatmul.mubr.msk.bf16.vlgmr.msra.gmra.mrb[4].mxu1 %vm395_vm0, %v8226_v13 }
  0xf3   : > { %1021 = vmatpush1.bf16.msra.mxu1 %v8374_v49  ;;  %1052 = vmatprep.mubr.bf16.mxu1 %v9871_v0 }
  0xf4   : > { %1022 = vmatprep.subr.bf16.mxu1 %v8378_v50  ;;  %6383 = vmatmul.mubr.msk.bf16.vlgmr.msra.gmra.mrb[4].mxu0 %vm395_vm0, %v8389_v54 }
  0xf5   : > { %1523 = vmatpush1.bf16.msra.mxu0 %v8190_v2  ;;  %1554 = vmatprep.mubr.bf16.mxu0 %v9871_v0  ;;  %v7696_v2 = vld [vmem:[#allocation2 + $0x30] ss:$8 sps:$4 sm:$0xff]  }
  0xf6   : > { %1524 = vmatprep.subr.bf16.mxu0 %v8193_v3  ;;  %v7697_v3 = vld [vmem:[#allocation2 + $0x4] ss:$8 sps:$4 sm:$0xff]  }
  0xf7   : > { %1023 = vmatpush1.bf16.msra.mxu1 %v8381_v53 }
  0xf8   : > { %1291 = vmatprep.subr.bf16.mxu1 %v8275_v29 }
  0xf9   : > { %1525 = vmatpush1.bf16.msra.mxu0 %v8196_v4  ;;  %v7698_v4 = vld [vmem:[#allocation2] ss:$8 sps:$4 sm:$0xff]  }
  0xfa   : > { %1563 = vmatprep.subr.bf16.mxu0 %v8204_v5  ;;  %v7699_v5 = vld [vmem:[#allocation2 + $0x14] ss:$8 sps:$4 sm:$0xff]  }
  0xfc   : > { %6389 = vmatmul.mubr.msk.bf16.vlgmr.msra.gmra.mrb[8].mxu0 %vm395_vm0, %v8226_v13 }
  0xfd   : > { %1564 = vmatpush1.bf16.msra.mxu0 %v8214_v9  ;;  %1595 = vmatprep.mubr.bf16.mxu0 %v9871_v0  ;;  %v7703_v9 = vld [vmem:[#allocation2 + $0x44] ss:$8 sps:$4 sm:$0xff]  }
  0xfe   : > { %6377 = vmatmul.mubr.msk.bf16.vlgmr.msra.gmra.mrb[4].mxu1 %vm395_vm0, %v8268_v27  ;;  %1565 = vmatprep.subr.bf16.mxu0 %v8219_v10  ;;  %v7704_v10 = vld [vmem:[#allocation2 + $0x40] ss:$8 sps:$4 sm:$0xff]  }
  0xff   : > { %1292 = vmatpush1.bf16.msra.mxu1 %v8285_v31  ;;  %1323 = vmatprep.mubr.bf16.mxu1 %v9871_v0 }
 0x100   : > { %1293 = vmatprep.subr.bf16.mxu1 %v8289_v32 }
 0x101   : > { %1566 = vmatpush1.bf16.msra.mxu0 %v8235_v15  ;;  %v7709_v15 = vld [vmem:[#allocation2 + $0x60] ss:$8 sps:$4 sm:$0xff]  }
 0x102   : > { %1604 = vmatprep.subr.bf16.mxu0 %v8240_v17  ;;  %v7711_v17 = vld [vmem:[#allocation2 + $0x70] ss:$8 sps:$4 sm:$0xff]  }
 0x103   : > { %1294 = vmatpush1.bf16.msra.mxu1 %v8292_v33  ;;  %v7723_v33 = vld [vmem:[#allocation2 + $0xe4] ss:$8 sps:$4 sm:$0xff]  }
 0x104   : > { %1332 = vmatprep.subr.bf16.mxu1 %v8297_v34 }
 0x106   : > { %6384 = vmatmul.mubr.msk.bf16.vlgmr.msra.gmra.mrb[8].mxu1 %vm395_vm0, %v8283_v30 }
 0x107   : > { %1333 = vmatpush1.bf16.msra.mxu1 %v8304_v35  ;;  %1364 = vmatprep.mubr.bf16.mxu1 %v9871_v0 }
 0x108   : > { %1334 = vmatprep.subr.bf16.mxu1 %v8308_v36  ;;  %6390 = vmatmul.mubr.msk.bf16.vlgmr.msra.gmra.mrb[8].mxu0 %vm395_vm0, %v8283_v30  ;;  %v7720_v30 = vld [vmem:[#allocation2 + $0xa0] ss:$8 sps:$4 sm:$0xff]  }
 0x109   : > { %1605 = vmatpush1.bf16.msra.mxu0 %v8260_v25  ;;  %1636 = vmatprep.mubr.bf16.mxu0 %v9871_v0  ;;  %v7716_v25 = vld [vmem:[#allocation2 + $0xc4] ss:$8 sps:$4 sm:$0xff]  }
 0x10a   : > { %1606 = vmatprep.subr.bf16.mxu0 %v8262_v26  ;;  %v7717_v26 = vld [vmem:[#allocation2 + $0xc0] ss:$8 sps:$4 sm:$0xff]  }
 0x10b   : > { %1335 = vmatpush1.bf16.msra.mxu1 %v8313_v37 }
 0x10c   : > { %1373 = vmatprep.subr.bf16.mxu1 %v8318_v38 }
 0x10d   : > { %1607 = vmatpush1.bf16.msra.mxu0 %v8271_v28  ;;  %v7718_v28 = vld [vmem:[#allocation2 + $0xd4] ss:$8 sps:$4 sm:$0xff]  }
 0x10e   : > { %1647 = vmatprep.subr.bf16.mxu0 %v8206_v6  ;;  %v8483_v6 = vld [vmem:[#allocation2 + $0xd0] ss:$8 sps:$4 sm:$0xff]  }
 0x112   : > { %6385 = vmatmul.mubr.msk.bf16.vlgmr.msra.gmra.mrb[8].mxu1 %vm395_vm0, %v8209_v7  ;;  %v7701_v7 = vld [vmem:[#allocation2 + $0x10] ss:$8 sps:$4 sm:$0xff]  }
 0x113   : > { %1374 = vmatpush1.bf16.msra.mxu1 %v8328_v39  ;;  %1405 = vmatprep.mubr.bf16.mxu1 %v9871_v0 }
 0x114   : > { %1375 = vmatprep.subr.bf16.mxu1 %v8332_v40  ;;  %6391 = vmatmul.mubr.msk.bf16.vlgmr.msra.gmra.mrb[8].mxu0 %vm395_vm0, %v8268_v27 }
 0x115   : > { %1648 = vmatpush1.bf16.msra.mxu0 %v8211_v8  ;;  %1679 = vmatprep.mubr.bf16.mxu0 %v9871_v0  ;;  %v8488_v8 = vld [vmem:[%s8201_s8 + $0xc] sm:$0xf] }
 0x116   : > { %1649 = vmatprep.subr.bf16.mxu0 %v8221_v11  ;;  %v7705_v11 = vld [vmem:[#allocation2 + $0x54] ss:$8 sps:$4 sm:$0xff]  }
 0x117   : > { %1376 = vmatpush1.bf16.msra.mxu1 %v8335_v41 }
 0x118   : > { %1416 = vmatprep.subr.bf16.mxu1 %v8340_v42 }
 0x119   : > { %1650 = vmatpush1.bf16.msra.mxu0 %v8223_v12  ;;  %v7706_v12 = vld [vmem:[#allocation2 + $0x50] ss:$8 sps:$4 sm:$0xff]  }
 0x11a   : > { %1703 = vmatprep.subr.bf16.mxu0 %v8242_v18  ;;  %v7712_v18 = vld [vmem:[#allocation2 + $0x84] ss:$8 sps:$4 sm:$0xff]  }
 0x11e   : > { %6386 = vmatmul.mubr.msk.bf16.vlgmr.msra.gmra.mrb[8].mxu1 %vm395_vm0, %v8226_v13  ;;  %v7707_v13 = vld [vmem:[%s8201_s8 + $0x8] sm:$0xf] }
 0x11f   : > { %1417 = vmatpush1.bf16.msra.mxu1 %v8350_v43  ;;  %1448 = vmatprep.mubr.bf16.mxu1 %v9871_v0 }
 0x120   : > { %1418 = vmatprep.subr.bf16.mxu1 %v8354_v44  ;;  %6392 = vmatmul.mubr.msk.bf16.vlgmr.msra.gmra.mrb[8].mxu0 %vm395_vm0, %v8389_v54 }
 0x121   : > { %1704 = vmatpush1.bf16.msra.mxu0 %v8246_v19  ;;  %1735 = vmatprep.mubr.bf16.mxu0 %v9871_v0  ;;  %v7713_v19 = vld [vmem:[#allocation2 + $0x80] ss:$8 sps:$4 sm:$0xff]  }
 0x122   : > { %1705 = vmatprep.subr.bf16.mxu0 %v8249_v20  ;;  %v7714_v20 = vld [vmem:[#allocation2 + $0x94] ss:$8 sps:$4 sm:$0xff]  }
 0x123   : > { %1419 = vmatpush1.bf16.msra.mxu1 %v8357_v45 }
 0x124   : > { %1459 = vmatprep.subr.bf16.mxu1 %v8362_v46 }
 0x125   : > { %1706 = vmatpush1.bf16.msra.mxu0 %v8256_v22  ;;  %v2135_v22 = vrot.slane %v2133_v60, 1  ;;  %v7189_v60 = vld [vmem:[#allocation6 + $0x2b4] ss:$8 sps:$4 sm:$0xff]  }
 0x126   : > { %1959 = vmatprep.subr.bf16.mxu0 %v7693_v61  ;;  %v7187_v61 = vld [vmem:[#allocation6 + $0x2b0] ss:$8 sps:$4 sm:$0xff]  }
 0x127   : > { %v2136_v24 = vor.u32 %v2135_v22, %v2131_v21  ;;  %v8581_v21 = vld [vmem:[#allocation6 + $0x134] ss:$8 sps:$4 sm:$0xff]   ;;  %v7205_v22 = vld [vmem:[#allocation6 + $0x2e0] ss:$8 sps:$4 sm:$0xff]  }
 0x12a   : > { %6387 = vmatmul.mubr.msk.bf16.vlgmr.msra.gmra.mrb[8].mxu1 %vm395_vm0, %v8268_v27 }
 0x12b   : > { %1460 = vmatpush1.bf16.msra.mxu1 %v8374_v49  ;;  %1491 = vmatprep.mubr.bf16.mxu1 %v9871_v0 }
 0x12c   : > { %1461 = vmatprep.subr.bf16.mxu1 %v8378_v50  ;;  %6394 = vmatmul.mubr.msk.bf16.vlgmr.msra.gmra.mrb[8].mxu0 %vm395_vm0, %v8468_v62 }
 0x12d   : > { %1960 = vmatpush1.bf16.msra.mxu0 %v7694_v63  ;;  %1991 = vmatprep.mubr.bf16.mxu0 %v9871_v0 }
 0x12e   : > { %1961 = vmatprep.subr.bf16.mxu0 %v7695_v1 }
 0x12f   : > { %1462 = vmatpush1.bf16.msra.mxu1 %v8381_v53 }
 0x130   : > { %1746 = vmatprep.subr.bf16.mxu1 %v8275_v29  ;;  %v7719_v29 = vld [vmem:[#allocation2 + $0xa4] ss:$8 sps:$4 sm:$0xff]  }
 0x131   : > { %1962 = vmatpush1.bf16.msra.mxu0 %v7696_v2  ;;  %v8562_v2 = vld [vmem:[#allocation6 + $0x100] ss:$8 sps:$4 sm:$0xff]  }
 0x132   : > { %2000 = vmatprep.subr.bf16.mxu0 %v7697_v3 }
 0x134   : > { %6400 = vmatmul.mubr.msk.bf16.vlgmr.msra.gmra.mrb[12].mxu0 %vm395_vm0, %v8268_v27 }
 0x135   : > { %2001 = vmatpush1.bf16.msra.mxu0 %v7698_v4  ;;  %2032 = vmatprep.mubr.bf16.mxu0 %v9871_v0  ;;  %v8565_v4 = vld [vmem:[#allocation6 + $0x114] ss:$8 sps:$4 sm:$0xff]  }
 0x136   : > { %6388 = vmatmul.mubr.msk.bf16.vlgmr.msra.gmra.mrb[8].mxu1 %vm395_vm0, %v8389_v54  ;;  %2002 = vmatprep.subr.bf16.mxu0 %v7699_v5  ;;  %v7193_v5 = vld [vmem:[#allocation6 + $0x2c0] ss:$8 sps:$4 sm:$0xff]  }
 0x137   : > { %1747 = vmatpush1.bf16.msra.mxu1 %v8285_v31  ;;  %1778 = vmatprep.mubr.bf16.mxu1 %v9871_v0  ;;  %v7721_v31 = vld [vmem:[#allocation2 + $0xb4] ss:$8 sps:$4 sm:$0xff]  }
 0x138   : > { %1748 = vmatprep.subr.bf16.mxu1 %v8289_v32  ;;  %v7722_v32 = vld [vmem:[#allocation2 + $0xb0] ss:$8 sps:$4 sm:$0xff]  }
 0x139   : > { %2003 = vmatpush1.bf16.msra.mxu0 %v7701_v7  ;;  %v7201_v7 = vld [vmem:[#allocation6 + $0x2d4] ss:$8 sps:$4 sm:$0xff]  }
 0x13a   : > { %2041 = vmatprep.subr.bf16.mxu0 %v7703_v9 }
 0x13b   : > { %1749 = vmatpush1.bf16.msra.mxu1 %v8483_v6 }
 0x13c   : > { %1787 = vmatprep.subr.bf16.mxu1 %v8297_v34  ;;  %v7724_v34 = vld [vmem:[#allocation2 + $0xe0] ss:$8 sps:$4 sm:$0xff]  }
 0x13e   : > { %6395 = vmatmul.mubr.msk.bf16.vlgmr.msra.gmra.mrb[12].mxu1 %vm395_vm0, %v8488_v8 }
 0x13f   : > { %1788 = vmatpush1.bf16.msra.mxu1 %v8304_v35  ;;  %1819 = vmatprep.mubr.bf16.mxu1 %v9871_v0  ;;  %v7725_v35 = vld [vmem:[#allocation2 + $0xf4] ss:$8 sps:$4 sm:$0xff]  }
 0x140   : > { %1789 = vmatprep.subr.bf16.mxu1 %v8308_v36  ;;  %6401 = vmatmul.mubr.msk.bf16.vlgmr.msra.gmra.mrb[12].mxu0 %vm395_vm0, %v8488_v8  ;;  %v7727_v36 = vld [vmem:[#allocation2 + $0x104] ss:$8 sps:$4 sm:$0xff]  }
 0x141   : > { %2042 = vmatpush1.bf16.msra.mxu0 %v7704_v10  ;;  %2073 = vmatprep.mubr.bf16.mxu0 %v9871_v0  ;;  %v8571_v10 = vld [vmem:[#allocation6 + $0x124] ss:$8 sps:$4 sm:$0xff]  }
 0x142   : > { %2043 = vmatprep.subr.bf16.mxu0 %v7705_v11  ;;  %v7199_v11 = vld [vmem:[#allocation6 + $0x2d0] ss:$8 sps:$4 sm:$0xff]  }
 0x143   : > { %1790 = vmatpush1.bf16.msra.mxu1 %v8313_v37  ;;  %v7728_v37 = vld [vmem:[#allocation2 + $0x100] ss:$8 sps:$4 sm:$0xff]  }
 0x144   : > { %1828 = vmatprep.subr.bf16.mxu1 %v8318_v38  ;;  %v7729_v38 = vld [vmem:[#allocation2 + $0x114] ss:$8 sps:$4 sm:$0xff]  }
 0x145   : > { %2044 = vmatpush1.bf16.msra.mxu0 %v7706_v12 }
 0x146   : > { %2084 = vmatprep.subr.bf16.mxu0 %v7708_v14  ;;  %v7207_v14 = vld [vmem:[#allocation6 + $0x2e4] ss:$8 sps:$4 sm:$0xff]  }
 0x14a   : > { %6396 = vmatmul.mubr.msk.bf16.vlgmr.msra.gmra.mrb[12].mxu1 %vm395_vm0, %v7707_v13 }
 0x14b   : > { %1829 = vmatpush1.bf16.msra.mxu1 %v8328_v39  ;;  %1860 = vmatprep.mubr.bf16.mxu1 %v9871_v0 }
 0x14c   : > { %1830 = vmatprep.subr.bf16.mxu1 %v8332_v40  ;;  %6402 = vmatmul.mubr.msk.bf16.vlgmr.msra.gmra.mrb[12].mxu0 %vm395_vm0, %v8389_v54  ;;  %v7730_v40 = vld [vmem:[#allocation2 + $0x110] ss:$8 sps:$4 sm:$0xff]  }
 0x14d   : > { %2085 = vmatpush1.bf16.msra.mxu0 %v7709_v15  ;;  %2116 = vmatprep.mubr.bf16.mxu0 %v9871_v0 }
 0x14e   : > { %2086 = vmatprep.subr.bf16.mxu0 %v7710_v16 }
 0x14f   : > { %1831 = vmatpush1.bf16.msra.mxu1 %v8335_v41 }
 0x150   : > { %1871 = vmatprep.subr.bf16.mxu1 %v8340_v42  ;;  %v7731_v42 = vld [vmem:[#allocation2 + $0x124] ss:$8 sps:$4 sm:$0xff]  }
 0x151   : > { %2087 = vmatpush1.bf16.msra.mxu0 %v7711_v17 }
 0x152   : > { %2140 = vmatprep.subr.bf16.mxu0 %v7712_v18 }
 0x156   : > { %6397 = vmatmul.mubr.msk.bf16.vlgmr.msra.gmra.mrb[12].mxu1 %vm395_vm0, %v8268_v27 }
 0x157   : > { %1872 = vmatpush1.bf16.msra.mxu1 %v8350_v43  ;;  %1903 = vmatprep.mubr.bf16.mxu1 %v9871_v0 }
 0x158   : > { %1873 = vmatprep.subr.bf16.mxu1 %v8354_v44  ;;  %6403 = vmatmul.mubr.msk.bf16.vlgmr.msra.gmra.mrb[12].mxu0 %vm395_vm0, %v8468_v62 }
 0x159   : > { %2141 = vmatpush1.bf16.msra.mxu0 %v7713_v19  ;;  %2172 = vmatprep.mubr.bf16.mxu0 %v9871_v0  ;;  %v8576_v19 = vld [vmem:[#allocation6 + $0x120] ss:$8 sps:$4 sm:$0xff]  }
 0x15a   : > { %2142 = vmatprep.subr.bf16.mxu0 %v7714_v20 }
 0x15b   : > { %1874 = vmatpush1.bf16.msra.mxu1 %v8357_v45 }
 0x15c   : > { %1914 = vmatprep.subr.bf16.mxu1 %v8362_v46 }
 0x15d   : > { %2143 = vmatpush1.bf16.msra.mxu0 %v7715_v23  ;;  %v7213_v23 = vld [vmem:[#allocation6 + $0x2f4] ss:$8 sps:$4 sm:$0xff]  }
 0x15e   : > { %3292 = vmatprep.subr.bf16.mxu0 %v7183_v58 }
 0x162   : > { %6398 = vmatmul.mubr.msk.bf16.vlgmr.msra.gmra.mrb[12].mxu1 %vm395_vm0, %v8389_v54 }
 0x163   : > { %1915 = vmatpush1.bf16.msra.mxu1 %v8374_v49  ;;  %1946 = vmatprep.mubr.bf16.mxu1 %v9871_v0 }
 0x164   : > { %1916 = vmatprep.subr.bf16.mxu1 %v8378_v50  ;;  %6405 = vmatmul.mubr.msk.bf16.vlgmr.msra.gmra.mrb[12].mxu0 %vm395_vm0, %v2136_v24  ;;  %v7732_v50 = vld [vmem:[#allocation2 + $0x120] ss:$8 sps:$4 sm:$0xff]  }
 0x165   : > { %3293 = vmatpush1.bf16.msra.mxu0 %v7181_v57  ;;  %v7247_v57 = vld [vmem:[#allocation6 + $0x350] ss:$8 sps:$4 sm:$0xff]  }
 0x166   : > { %3294 = vmatprep.subr.bf16.mxu0 %v7189_v60  ;;  %v8630_v60 = vld [vmem:[#allocation6 + $0x1b4] ss:$8 sps:$4 sm:$0xff]  }
 0x167   : > { %1917 = vmatpush1.bf16.msra.mxu1 %v8381_v53 }
 0x168   : > { %2185 = vmatprep.subr.bf16.mxu1 %v7716_v25  ;;  %v8587_v25 = vld [vmem:[#allocation6 + $0x144] ss:$8 sps:$4 sm:$0xff]  }
 0x169   : > { %3295 = vmatpush1.bf16.msra.mxu0 %v7187_v61 }
 0x16e   : > { %6399 = vmatmul.mubr.msk.bf16.vlgmr.msra.gmra.mrb[12].mxu1 %vm395_vm0, %v8468_v62 }
 0x16f   : > { %2186 = vmatpush1.bf16.msra.mxu1 %v7717_v26  ;;  %2217 = vmatprep.mubr.bf16.mxu1 %v9871_v0  ;;  %v7211_v26 = vld [vmem:[#allocation6 + $0x2f0] ss:$8 sps:$4 sm:$0xff]  }
 0x170   : > { %2187 = vmatprep.subr.bf16.mxu1 %v7718_v28  ;;  %v7219_v28 = vld [vmem:[#allocation6 + $0x304] ss:$8 sps:$4 sm:$0xff]  }
 0x173   : > { %2188 = vmatpush1.bf16.msra.mxu1 %v8483_v6 }
 0x174   : > { %2226 = vmatprep.subr.bf16.mxu1 %v7719_v29  ;;  %v8590_v29 = vld [vmem:[#allocation6 + $0x140] ss:$8 sps:$4 sm:$0xff]  }
 0x176   : > { %6406 = vmatmul.mubr.msk.bf16.vlgmr.msra.gmra.mrb[16].mxu1 %vm395_vm0, %v8268_v27  ;;  %v7726_v27 = vld [vmem:[#allocation2 + $0xf0] ss:$8 sps:$4 sm:$0xff]  }
 0x177   : > { %2227 = vmatpush1.bf16.msra.mxu1 %v7720_v30  ;;  %2258 = vmatprep.mubr.bf16.mxu1 %v9871_v0  ;;  %v8593_v30 = vld [vmem:[#allocation6 + $0x154] ss:$8 sps:$4 sm:$0xff]  }
 0x178   : > { %2228 = vmatprep.subr.bf16.mxu1 %v7721_v31  ;;  %v7217_v31 = vld [vmem:[#allocation6 + $0x300] ss:$8 sps:$4 sm:$0xff]  }
 0x17b   : > { %2229 = vmatpush1.bf16.msra.mxu1 %v7722_v32  ;;  %v7225_v32 = vld [vmem:[#allocation6 + $0x314] ss:$8 sps:$4 sm:$0xff]  }
 0x17c   : > { %2267 = vmatprep.subr.bf16.mxu1 %v7723_v33  ;;  %v8596_v33 = vld [vmem:[#allocation6 + $0x150] ss:$8 sps:$4 sm:$0xff]  }
 0x182   : > { %6407 = vmatmul.mubr.msk.bf16.vlgmr.msra.gmra.mrb[16].mxu1 %vm395_vm0, %v8488_v8  ;;  %v8568_v8 = vld [vmem:[#allocation6 + $0x110] ss:$8 sps:$4 sm:$0xff]  }
 0x183   : > { %2268 = vmatpush1.bf16.msra.mxu1 %v7724_v34  ;;  %2299 = vmatprep.mubr.bf16.mxu1 %v9871_v0  ;;  %v8599_v34 = vld [vmem:[#allocation6 + $0x164] ss:$8 sps:$4 sm:$0xff]  }
 0x184   : > { %2269 = vmatprep.subr.bf16.mxu1 %v7725_v35  ;;  %v7223_v35 = vld [vmem:[#allocation6 + $0x310] ss:$8 sps:$4 sm:$0xff]  }
 0x187   : > { %2270 = vmatpush1.bf16.msra.mxu1 %v7726_v27  ;;  %v8602_v27 = vld [vmem:[#allocation6 + $0x160] ss:$8 sps:$4 sm:$0xff]  }
 0x188   : > { %2310 = vmatprep.subr.bf16.mxu1 %v7727_v36  ;;  %v8605_v36 = vld [vmem:[#allocation6 + $0x174] ss:$8 sps:$4 sm:$0xff]  }
 0x18e   : > { %6408 = vmatmul.mubr.msk.bf16.vlgmr.msra.gmra.mrb[16].mxu1 %vm395_vm0, %v8389_v54  ;;  %v8548_v54 = vld [vmem:[#allocation6 + $0xe0] ss:$8 sps:$4 sm:$0xff]  }
 0x18f   : > { %2311 = vmatpush1.bf16.msra.mxu1 %v7728_v37  ;;  %2342 = vmatprep.mubr.bf16.mxu1 %v9871_v0  ;;  %v718_v39 = vpop.f32.mrb[0].mxu0  ;;  %v8608_v37 = vld [vmem:[#allocation6 + $0x170] ss:$8 sps:$4 sm:$0xff]  }
 0x190   : > { %2312 = vmatprep.subr.bf16.mxu1 %v7729_v38  ;;  %v720_v41 = vpop.f32.mrb[1].mxu0  ;;  %v7231_v38 = vld [vmem:[#allocation6 + $0x324] ss:$8 sps:$4 sm:$0xff]  }
 0x191   : > { %v722_v43 = vpop.f32.mrb[2].mxu0 }
 0x192   : > { %v723_v44 = vpop.f32.mrb[3].mxu0  ;;  %v7235_v43 = vld [vmem:[#allocation6 + $0x330] ss:$8 sps:$4 sm:$0xff]  }
 0x193   : > { %2313 = vmatpush1.bf16.msra.mxu1 %v7730_v40  ;;  %v8612_v40 = vld [vmem:[#allocation6 + $0x184] ss:$8 sps:$4 sm:$0xff]   ;;  %v8618_v44 = vld [vmem:[#allocation6 + $0x194] ss:$8 sps:$4 sm:$0xff]  }
 0x194   : > { %2353 = vmatprep.subr.bf16.mxu1 %v7731_v42  ;;  %v7237_v42 = vld [vmem:[#allocation6 + $0x334] ss:$8 sps:$4 sm:$0xff]  }
 0x199   : > { %v566_v45 = vpop.f32.mrb[0].mxu1 }
 0x19a   : > { %v6824_v46 = vadd.f32 %v718_v39, %v566_v45  ;;  %v568_v47 = vpop.f32.mrb[1].mxu1  ;;  %6409 = vmatmul.mubr.msk.bf16.vlgmr.msra.gmra.mrb[16].mxu1 %vm395_vm0, %v8468_v62  ;;  %v7195_v62 = vld [vmem:[#allocation6 + $0x2c4] ss:$8 sps:$4 sm:$0xff]   ;;  %v7229_v39 = vld [vmem:[#allocation6 + $0x320] ss:$8 sps:$4 sm:$0xff]  }
 0x19b   : > { %v6825_v48 = vadd.f32 %v720_v41, %v568_v47  ;;  %v570_v49 = vpop.f32.mrb[2].mxu1  ;;  %2354 = vmatpush1.bf16.msra.mxu1 %v7732_v50  ;;  %2385 = vmatprep.mubr.bf16.mxu1 %v9871_v0  ;;  %v8614_v41 = vld [vmem:[#allocation6 + $0x180] ss:$8 sps:$4 sm:$0xff]   ;;  %v8620_v45 = vld [vmem:[#allocation6 + $0x190] ss:$8 sps:$4 sm:$0xff]  }
 0x19c   : > { %v571_v51 = vpop.f32.mrb[3].mxu1  ;;  %2355 = vmatprep.subr.bf16.mxu1 %v7733_v52  ;;  %3296 = vmatprep.subr.bf16.mxu0 %v7195_v62  ;;  %v7241_v47 = vld [vmem:[#allocation6 + $0x340] ss:$8 sps:$4 sm:$0xff]   ;;  %v8632_v62 = vld [vmem:[#allocation6 + $0x1b0] ss:$8 sps:$4 sm:$0xff]  }
 0x19d   : > { %3297 = vmatpush1.bf16.msra.mxu0 %v7193_v5  ;;  %v8626_v49 = vld [vmem:[#allocation6 + $0x1a0] ss:$8 sps:$4 sm:$0xff]   ;;  %v7249_v51 = vld [vmem:[#allocation6 + $0x354] ss:$8 sps:$4 sm:$0xff]   ;;  %v8638_v5 = vld [vmem:[#allocation6 + $0x4] ss:$8 sps:$4 sm:$0xff]  }
 0x19e   : > { %3298 = vmatprep.subr.bf16.mxu0 %v7201_v7  ;;  %v8757_v0 = vld [vmem:[#allocation6 + $0x3c0] ss:$8 sps:$4 sm:$0xff]  }
 0x19f   : > { %2356 = vmatpush1.bf16.msra.mxu1 %v8381_v53  ;;  %v8559_v53 = vld [vmem:[#allocation6 + $0x104] ss:$8 sps:$4 sm:$0xff]   ;;  %10044 = vst [vmem:[#allocation31_spill] sm:$0xff] %v8757_v0 }
 0x1a0   : > { %2655 = vmatprep.subr.bf16.mxu1 %v8550_v55 }
 0x1a1   : > { %3299 = vmatpush1.bf16.msra.mxu0 %v7199_v11 }
 0x1a2   : > { %3300 = vmatprep.subr.bf16.mxu0 %v7207_v14  ;;  %v7259_v14 = vld [vmem:[#allocation6 + $0x370] ss:$8 sps:$4 sm:$0xff]  }
 0x1a5   : > { %3301 = vmatpush1.bf16.msra.mxu0 %v7205_v22 }
 0x1a6   : > { %6410 = vmatmul.mubr.msk.bf16.vlgmr.msra.gmra.mrb[16].mxu1 %vm395_vm0, %v2136_v24  ;;  %v8584_v24 = vld [vmem:[#allocation6 + $0x130] ss:$8 sps:$4 sm:$0xff]   ;;  %3302 = vmatprep.subr.bf16.mxu0 %v7213_v23 }
 0x1a7   : > { %2656 = vmatpush1.bf16.msra.mxu1 %v8548_v54 }
 0x1a8   : > { %2657 = vmatprep.subr.bf16.mxu1 %v8552_v56 }
 0x1a9   : > { %3303 = vmatpush1.bf16.msra.mxu0 %v7211_v26 }
 0x1aa   : > { %3304 = vmatprep.subr.bf16.mxu0 %v7219_v28 }
 0x1ab   : > { %2658 = vmatpush1.bf16.msra.mxu1 %v8556_v59 }
 0x1ac   : > { %2659 = vmatprep.subr.bf16.mxu1 %v8559_v53 }
 0x1ad   : > { %3305 = vmatpush1.bf16.msra.mxu0 %v7217_v31 }
 0x1ae   : > { %3306 = vmatprep.subr.bf16.mxu0 %v7225_v32 }
 0x1af   : > { %2660 = vmatpush1.bf16.msra.mxu1 %v8562_v2 }
 0x1b0   : > { %2661 = vmatprep.subr.bf16.mxu1 %v8565_v4 }
 0x1b1   : > { %3307 = vmatpush1.bf16.msra.mxu0 %v7223_v35 }
 0x1b2   : > { %3308 = vmatprep.subr.bf16.mxu0 %v7231_v38 }
 0x1b3   : > { %2662 = vmatpush1.bf16.msra.mxu1 %v8568_v8 }
 0x1b4   : > { %2663 = vmatprep.subr.bf16.mxu1 %v8571_v10 }
 0x1b5   : > { %3309 = vmatpush1.bf16.msra.mxu0 %v7229_v39 }
 0x1b6   : > { %3310 = vmatprep.subr.bf16.mxu0 %v7237_v42  ;;  %v1506_v42 = vlaneseq }
 0x1b7   : > { %2664 = vmatpush1.bf16.msra.mxu1 %v8576_v19 }
 0x1b8   : > { %2665 = vmatprep.subr.bf16.mxu1 %v8581_v21 }
 0x1b9   : > { %3311 = vmatpush1.bf16.msra.mxu0 %v7235_v43  ;;  %v8644_v43 = vshrl.u32 %v1506_v42, 7 }
 0x1bb   : > { %2666 = vmatpush1.bf16.msra.mxu1 %v8584_v24  ;;  %10027 = vst [vmem:[#allocation16_spill] sm:$0xff] %v8644_v43 }
 0x1bc   : > { %2667 = vmatprep.subr.bf16.mxu1 %v8587_v25 }
 0x1bf   : > { %2668 = vmatpush1.bf16.msra.mxu1 %v8590_v29 }
 0x1c0   : > { %2669 = vmatprep.subr.bf16.mxu1 %v8593_v30 }
 0x1c3   : > { %2670 = vmatpush1.bf16.msra.mxu1 %v8596_v33 }
 0x1c4   : > { %2671 = vmatprep.subr.bf16.mxu1 %v8599_v34 }
 0x1c7   : > { %v1280_v63 = vpop.f32.mrb[4].mxu0  ;;  %2672 = vmatpush1.bf16.msra.mxu1 %v8602_v27 }
 0x1c8   : > { %v1282_v1 = vpop.f32.mrb[5].mxu0  ;;  %2673 = vmatprep.subr.bf16.mxu1 %v8605_v36 }
 0x1c9   : > { %v1284_v3 = vpop.f32.mrb[6].mxu0 }
 0x1ca   : > { %v1285_v6 = vpop.f32.mrb[7].mxu0 }
 0x1cb   : > { %2674 = vmatpush1.bf16.msra.mxu1 %v8608_v37  ;;  %v8760_v6 = vld [vmem:[#allocation6 + $0x3d4] ss:$8 sps:$4 sm:$0xff]  }
 0x1cc   : > { %2675 = vmatprep.subr.bf16.mxu1 %v8612_v40  ;;  %10045 = vst [vmem:[#allocation32_spill] sm:$0xff] %v8760_v6 }
 0x1cf   : > { %2676 = vmatpush1.bf16.msra.mxu1 %v8614_v41 }
 0x1d0   : > { %2677 = vmatprep.subr.bf16.mxu1 %v8618_v44 }
 0x1d1   : > { %v1054_v9 = vpop.f32.mrb[4].mxu1 }
 0x1d2   : > { %v1063_v12 = vmax.f32 %v6824_v46, %v1054_v9  ;;  %v1056_v13 = vpop.f32.mrb[5].mxu1  ;;  %v7243_v46 = vld [vmem:[#allocation6 + $0x344] ss:$8 sps:$4 sm:$0xff]  }
 0x1d3   : > { %v1064_v15 = vmax.f32 %v6825_v48, %v1056_v13  ;;  %v1058_v16 = vpop.f32.mrb[6].mxu1  ;;  %2678 = vmatpush1.bf16.msra.mxu1 %v8620_v45  ;;  %3312 = vmatprep.subr.bf16.mxu0 %v7243_v46  ;;  %v8624_v48 = vld [vmem:[#allocation6 + $0x1a4] ss:$8 sps:$4 sm:$0xff]   ;;  %v7261_v13 = vld [vmem:[#allocation6 + $0x374] ss:$8 sps:$4 sm:$0xff]   ;;  %v9870_v46 = vsub.s32 1, %v8644_v43 }
 0x1d4   : > { %v8573_v17 = vmax.f32 %v1063_v12, %v1280_v63  ;;  %v1059_v18 = vpop.f32.mrb[7].mxu1  ;;  %3313 = vmatpush1.bf16.msra.mxu0 %v7241_v47  ;;  %2679 = vmatprep.subr.bf16.mxu1 %v8624_v48  ;;  %v7255_v63 = vld [vmem:[#allocation6 + $0x364] ss:$8 sps:$4 sm:$0xff]   ;;  %v1504_v47 = vld [vmem:[#allocation4] sm:$0x3] }
 0x1d5   : > { %v8578_v20 = vmax.f32 %v1064_v15, %v1282_v1  ;;  %3314 = vmatprep.subr.bf16.mxu0 %v7249_v51  ;;  %v7253_v1 = vld [vmem:[#allocation6 + $0x360] ss:$8 sps:$4 sm:$0xff]   ;;  %v7267_v15 = vld [vmem:[#allocation6 + $0x384] ss:$8 sps:$4 sm:$0xff]   ;;  %v1513_v51 = vrot.slane %v1504_v47, %v9870_v46 }
 0x1d6   : > { %v8754_v46 = vld [vmem:[#allocation6 + $0x64] ss:$8 sps:$4 sm:$0xff]  }
 0x1d7   : > { %2680 = vmatpush1.bf16.msra.mxu1 %v8626_v49 }
 0x1d8   : > { %3315 = vmatpush1.bf16.msra.mxu0 %v7247_v57  ;;  %2681 = vmatprep.subr.bf16.mxu1 %v8630_v60 }
 0x1d9   : > { %3316 = vmatprep.subr.bf16.mxu0 %v7255_v63 }
 0x1db   : > { %2682 = vmatpush1.bf16.msra.mxu1 %v8632_v62 }
 0x1dc   : > { %3317 = vmatpush1.bf16.msra.mxu0 %v7253_v1  ;;  %2838 = vmatprep.subr.bf16.mxu1 %v8638_v5 }
 0x1dd   : > { %3318 = vmatprep.subr.bf16.mxu0 %v7261_v13 }
 0x1e0   : > { %3319 = vmatpush1.bf16.msra.mxu0 %v7259_v14 }
 0x1e1   : > { %3512 = vmatprep.subr.bf16.mxu0 %v7267_v15 }
 0x1ff   : > { %v1737_v50 = vpop.f32.mrb[8].mxu0 }
 0x200   : > { %v1739_v52 = vpop.f32.mrb[9].mxu0 }
 0x201   : > { %v1741_v58 = vpop.f32.mrb[10].mxu0 }
 0x202   : > { %v1742_v61 = vpop.f32.mrb[11].mxu0 }
 0x203   : > { %v8650_v61 = vsub.s32 0, %v8644_v43  ;;  %v8763_v43 = vld [vmem:[#allocation6 + $0x60] ss:$8 sps:$4 sm:$0xff]  }
 0x205   : > { %10028 = vst [vmem:[#allocation17_spill] sm:$0xff] %v8650_v61  ;;  %v8653_v63 = vrot.slane %v1504_v47, %v8650_v61  ;;  %v8766_v61 = vld [vmem:[#allocation6 + $0x74] ss:$8 sps:$4 sm:$0xff]  }
 0x209   : > { %v8636_v3 = vpop.f32.mrb[8].mxu1 }
 0x20a   : > { %v1495_v7 = vpop.f32.mrb[9].mxu1 }
 0x20b   : > { %v1503_v9 = vmax.f32 %v8578_v20, %v1495_v7  ;;  %v1497_v11 = vpop.f32.mrb[10].mxu1 }
 0x20c   : > { %v1498_v12 = vpop.f32.mrb[11].mxu1 }
 0x20d   : > { %v1517_v57 = vadd.f32 %v1513_v51, %v1503_v9 }
 0x20f   : > { %v1519_v58 = vmax.f32 %v1517_v57, 0.0 }
 0x237   : > { %v2174_v16 = vpop.f32.mrb[12].mxu0 }
 0x238   : > { %v2176_v18 = vpop.f32.mrb[13].mxu0 }
 0x239   : > { %v2178_v22 = vpop.f32.mrb[14].mxu0 }
 0x23a   : > { %v2179_v23 = vpop.f32.mrb[15].mxu0 }
 0x241   : > { %v1948_v26 = vpop.f32.mrb[12].mxu1 }
 0x242   : > { %v1957_v28 = vmax.f32 %v1737_v50, %v1948_v26  ;;  %v1950_v31 = vpop.f32.mrb[13].mxu1  ;;  %v1521_v50 = vpack.c.bf16 %v1519_v58, %v1519_v58 }
 0x243   : > { %v1958_v32 = vmax.f32 %v1739_v52, %v1950_v31  ;;  %v1952_v35 = vpop.f32.mrb[14].mxu1 }
 0x244   : > { %v2183_v20 = vmax.f32 %v1957_v28, %v2174_v16  ;;  %v1953_v38 = vpop.f32.mrb[15].mxu1  ;;  %v2412_v15 = vshrl.u32 %v1521_v50, 16  ;;  %v2415_v31 = vshll.u32 %v1521_v50, 16 }
 0x245   : > { %v2184_v39 = vmax.f32 %v1958_v32, %v2176_v18 }
 0x246   : > { %v2414_v23 = vrot.slane %v2412_v15, 7 }
 0x248   : > { %v2417_v38 = vor.u32 %v2415_v31, %v2414_v23  ;;  %v8700_v31 = vld [vmem:[#allocation6 + $0x380] ss:$8 sps:$4 sm:$0xff]  }
 0x249   : > { %10034 = vst [vmem:[#allocation21_spill] sm:$0xff] %v8700_v31 }
 0x279   : > { %v2387_v52 = vpop.f32.mrb[16].mxu1 }
 0x27a   : > { %v2396_v1 = vmax.f32 %v2183_v20, %v2387_v52  ;;  %v2389_v7 = vpop.f32.mrb[17].mxu1  ;;  %v8666_v52 = vld [vmem:[#allocation6] ss:$8 sps:$4 sm:$0xff]  }
 0x27b   : > { %v2397_v11 = vmax.f32 %v2184_v39, %v2389_v7  ;;  %v2391_v12 = vpop.f32.mrb[18].mxu1 }
 0x27c   : > { %v2398_v13 = vadd.f32 %v2396_v1, %v8653_v63  ;;  %v2392_v14 = vpop.f32.mrb[19].mxu1  ;;  %v2424_v1 = vsel %vm8656_vm3, 0, %v2417_v38  ;;  %v8677_v12 = vld [vmem:[#allocation6 + $0x14] ss:$8 sps:$4 sm:$0xff]  }
 0x27d   : > { %v2399_v16 = vadd.f32 %v2397_v11, %v1513_v51  ;;  %v8686_v15 = vsel %vm2425_vm4, %v2424_v1, 0  ;;  %v8733_v1 = vld [vmem:[#allocation6 + $0x3a0] ss:$8 sps:$4 sm:$0xff]  }
 0x27e   : > { %v2400_v18 = vmax.f32 %v2398_v13, 0.0  ;;  %v8712_v38 = vrot.slane %v8686_v15, 1  ;;  %10040 = vst [vmem:[#allocation27_spill] sm:$0xff] %v8733_v1 }
 0x27f   : > { %v2401_v9 = vmax.f32 %v2399_v16, 0.0 }
 0x280   : > { %v2402_v22 = vpack.c.bf16 %v2400_v18, %v2400_v18  ;;  %v8691_v18 = vld [vmem:[#allocation6 + $0x10] ss:$8 sps:$4 sm:$0xff]   ;;  %10037 = vst [vmem:[#allocation24_spill] sm:$0xff] %v8712_v38 }
 0x281   : > { %v2403_v26 = vpack.c.bf16 %v2401_v9, %v2401_v9 }
 0x282   : > { %v2433_v28 = vshrl.u32 %v2402_v22, 16  ;;  %v2436_v20 = vshll.u32 %v2402_v22, 16 }
 0x283   : > { %v2440_v32 = vshrl.u32 %v2403_v26, 16  ;;  %v2443_v42 = vshll.u32 %v2403_v26, 16  ;;  %v8696_v26 = vld [vmem:[#allocation6 + $0x24] ss:$8 sps:$4 sm:$0xff]  }
 0x284   : > { %v2435_v35 = vrot.slane %v2433_v28, 7 }
 0x285   : > { %v2442_v39 = vrot.slane %v2440_v32, 7 }
 0x286   : > { %v2438_v47 = vor.u32 %v2436_v20, %v2435_v35  ;;  %v8704_v35 = vld [vmem:[#allocation6 + $0x394] ss:$8 sps:$4 sm:$0xff]   ;;  %v8709_v20 = vld [vmem:[#allocation6 + $0x20] ss:$8 sps:$4 sm:$0xff]  }
 0x287   : > { %v2445_v51 = vor.u32 %v2443_v42, %v2442_v39  ;;  %10036 = vst [vmem:[#allocation23_spill] sm:$0xff] %v8704_v35  ;;  %v8716_v39 = vld [vmem:[#allocation6 + $0x34] ss:$8 sps:$4 sm:$0xff]   ;;  %v8721_v42 = vld [vmem:[#allocation6 + $0x390] ss:$8 sps:$4 sm:$0xff]  }
 0x288   : > { %v8662_v58 = vsel %vm8656_vm3, 0, %v2438_v47  ;;  %10038 = vst [vmem:[#allocation25_spill] sm:$0xff] %v8721_v42  ;;  %v8724_v47 = vld [vmem:[#allocation6 + $0x3a4] ss:$8 sps:$4 sm:$0xff]  }
 0x289   : > { %10031 = vst [vmem:[#allocation18_spill] sm:$0xff] %v8662_v58  ;;  %v2449_v50 = vsel %vm8656_vm3, 0, %v2445_v51  ;;  %v8672_v7 = vsel %vm2425_vm4, %v8662_v58, 0  ;;  %10039 = vst [vmem:[#allocation26_spill] sm:$0xff] %v8724_v47  ;;  %v8727_v51 = vld [vmem:[#allocation6 + $0x30] ss:$8 sps:$4 sm:$0xff]  }
 0x28a   : > { %10032 = vst [vmem:[#allocation19_spill] sm:$0xff] %v8672_v7  ;;  %v8675_v11 = vsel %vm2425_vm4, %v2449_v50, 0  ;;  %v3138_v13 = vshll.u32 %v8672_v7, 16  ;;  %v3136_v23 = vshrl.u32 %v8672_v7, 16  ;;  %v8730_v50 = vld [vmem:[#allocation6 + $0x44] ss:$8 sps:$4 sm:$0xff]  }
 0x28b   : > { %6439 = vmatprep.mubr.msk.bf16.mxu1 %vm2652_vm5, %v8675_v11  ;;  %v3144_v14 = vshll.u32 %v8675_v11, 16  ;;  %v3142_v9 = vshrl.u32 %v8675_v11, 16  ;;  %v8769_v7 = vld [vmem:[#allocation6 + $0x3d0] ss:$8 sps:$4 sm:$0xff]  }
 0x28c   : > { %6440 = vmatmul.mubr.msk.bf16.vlgmr.msra.gmra.mrb[20].mxu1 %vm2425_vm4, %v8662_v58  ;;  %v3140_v16 = vrot.slane %v3138_v13, 1  ;;  %v8736_v13 = vld [vmem:[#allocation6 + $0x3b4] ss:$8 sps:$4 sm:$0xff]   ;;  %10046 = vst [vmem:[#allocation33_spill] sm:$0xff] %v8769_v7 }
 0x28d   : > { %2839 = vmatpush1.bf16.msra.mxu1 %v8666_v52  ;;  %6469 = vmatprep.mubr.msk.bf16.mxu1 %vm2652_vm5, %v8686_v15  ;;  %v3146_v22 = vrot.slane %v3144_v14, 1  ;;  %10041 = vst [vmem:[#allocation28_spill] sm:$0xff] %v8736_v13  ;;  %v8739_v14 = vld [vmem:[#allocation6 + $0x40] ss:$8 sps:$4 sm:$0xff]  }
 0x28e   : > { %2840 = vmatprep.subr.bf16.mxu1 %v8677_v12  ;;  %v8702_v32 = vor.u32 %v3140_v16, %v3136_v23  ;;  %v8742_v16 = vld [vmem:[#allocation6 + $0x54] ss:$8 sps:$4 sm:$0xff]   ;;  %v8751_v23 = vld [vmem:[#allocation6 + $0x50] ss:$8 sps:$4 sm:$0xff]  }
 0x28f   : > { %v8698_v28 = vor.u32 %v3146_v22, %v3142_v9  ;;  %v8745_v9 = vld [vmem:[#allocation6 + $0x3b0] ss:$8 sps:$4 sm:$0xff]   ;;  %v8748_v22 = vld [vmem:[#allocation6 + $0x3c4] ss:$8 sps:$4 sm:$0xff]  }
 0x290   : > { %10035 = vst [vmem:[#allocation22_spill] sm:$0xff] %v8702_v32  ;;  %10042 = vst [vmem:[#allocation29_spill] sm:$0xff] %v8745_v9 }
 0x291   : > { %10033 = vst [vmem:[#allocation20_spill] sm:$0xff] %v8698_v28  ;;  %2841 = vmatpush1.bf16.msra.mxu1 %v8691_v18  ;;  %6528 = vmatprep.mubr.msk.bf16.mxu0 %vm2652_vm5, %v8698_v28  ;;  %10043 = vst [vmem:[#allocation30_spill] sm:$0xff] %v8748_v22  ;;  %v8833_v28 = vld [vmem:[#allocation6 + $0x420] ss:$8 sps:$4 sm:$0xff]  }
 0x292   : > { %3325 = vmatmul.mubr.bf16.vlgmr.msra.gmra.mrb[16].mxu0 %v8702_v32  ;;  %2842 = vmatprep.subr.bf16.mxu1 %v8696_v26  ;;  %10063 = vst [vmem:[#allocation49_spill] sm:$0xff] %v8833_v28 }
 0x293   : > { %3513 = vmatpush1.bf16.msra.mxu0 %v8700_v31  ;;  %6557 = vmatprep.mubr.msk.bf16.mxu0 %vm2652_vm5, %v8712_v38  ;;  %v8803_v31 = vld [vmem:[#allocation6 + $0x90] ss:$8 sps:$4 sm:$0xff]  }
 0x294   : > { %3514 = vmatprep.subr.bf16.mxu0 %v8704_v35  ;;  %v8794_v35 = vld [vmem:[#allocation6 + $0x94] ss:$8 sps:$4 sm:$0xff]   ;;  %10053 = vst [vmem:[#allocation39_spill] sm:$0xff] %v8803_v31 }
 0x295   : > { %2843 = vmatpush1.bf16.msra.mxu1 %v8709_v20 }
 0x296   : > { %2844 = vmatprep.subr.bf16.mxu1 %v8716_v39 }
 0x297   : > { %3515 = vmatpush1.bf16.msra.mxu0 %v8721_v42 }
 0x298   : > { %3516 = vmatprep.subr.bf16.mxu0 %v8724_v47  ;;  %v10050_v47 = vmax.f32 %v8573_v17, %v8636_v3  ;;  %v8806_v17 = vld [vmem:[#allocation6 + $0xa4] ss:$8 sps:$4 sm:$0xff]   ;;  %v8809_v3 = vld [vmem:[#allocation6 + $0x400] ss:$8 sps:$4 sm:$0xff]  }
 0x299   : > { %2845 = vmatpush1.bf16.msra.mxu1 %v8727_v51  ;;  %10054 = vst [vmem:[#allocation40_spill] sm:$0xff] %v8806_v17  ;;  %10055 = vst [vmem:[#allocation41_spill] sm:$0xff] %v8809_v3 }
 0x29a   : > { %2846 = vmatprep.subr.bf16.mxu1 %v8730_v50  ;;  %v1516_v42 = vadd.f32 %v8653_v63, %v10050_v47  ;;  %v8812_v63 = vld [vmem:[#allocation6 + $0x414] ss:$8 sps:$4 sm:$0xff]   ;;  %v8815_v47 = vld [vmem:[#allocation6 + $0xa0] ss:$8 sps:$4 sm:$0xff]  }
 0x29b   : > { %3517 = vmatpush1.bf16.msra.mxu0 %v8733_v1  ;;  %v8781_v1 = vld [vmem:[#allocation6 + $0x3e0] ss:$8 sps:$4 sm:$0xff]   ;;  %10056 = vst [vmem:[#allocation42_spill] sm:$0xff] %v8812_v63  ;;  %10057 = vst [vmem:[#allocation43_spill] sm:$0xff] %v8815_v47 }
 0x29c   : > { %3518 = vmatprep.subr.bf16.mxu0 %v8736_v13  ;;  %v8778_v13 = vld [vmem:[#allocation6 + $0x84] ss:$8 sps:$4 sm:$0xff]   ;;  %10048 = vst [vmem:[#allocation35_spill] sm:$0xff] %v8781_v1  ;;  %v1518_v38 = vmax.f32 %v1516_v42, 0.0  ;;  %v8818_v42 = vld [vmem:[#allocation6 + $0xb4] ss:$8 sps:$4 sm:$0xff]  }
 0x29d   : > { %2847 = vmatpush1.bf16.msra.mxu1 %v8739_v14  ;;  %10058 = vst [vmem:[#allocation44_spill] sm:$0xff] %v8818_v42 }
 0x29e   : > { %2848 = vmatprep.subr.bf16.mxu1 %v8742_v16 }
 0x29f   : > { %3519 = vmatpush1.bf16.msra.mxu0 %v8745_v9  ;;  %v8772_v9 = vld [vmem:[#allocation6 + $0x3e4] ss:$8 sps:$4 sm:$0xff]  }
 0x2a0   : > { %3520 = vmatprep.subr.bf16.mxu0 %v8748_v22  ;;  %10047 = vst [vmem:[#allocation34_spill] sm:$0xff] %v8772_v9  ;;  %v8775_v22 = vld [vmem:[#allocation6 + $0x70] ss:$8 sps:$4 sm:$0xff]  }
 0x2a1   : > { %2849 = vmatpush1.bf16.msra.mxu1 %v8751_v23 }
 0x2a2   : > { %2850 = vmatprep.subr.bf16.mxu1 %v8754_v46 }
 0x2a3   : > { %3521 = vmatpush1.bf16.msra.mxu0 %v8757_v0  ;;  %v8784_v0 = vld [vmem:[#allocation6 + $0x3f4] ss:$8 sps:$4 sm:$0xff]  }
 0x2a4   : > { %3522 = vmatprep.subr.bf16.mxu0 %v8760_v6  ;;  %10049 = vst [vmem:[#allocation36_spill] sm:$0xff] %v8784_v0  ;;  %v8787_v6 = vld [vmem:[#allocation6 + $0x80] ss:$8 sps:$4 sm:$0xff]  }
 0x2a5   : > { %2851 = vmatpush1.bf16.msra.mxu1 %v8763_v43 }
 0x2a6   : > { %2852 = vmatprep.subr.bf16.mxu1 %v8766_v61 }
 0x2a7   : > { %3523 = vmatpush1.bf16.msra.mxu0 %v8769_v7  ;;  %v8797_v7 = vld [vmem:[#allocation6 + $0x3f0] ss:$8 sps:$4 sm:$0xff]  }
 0x2a8   : > { %3524 = vmatprep.subr.bf16.mxu0 %v8772_v9  ;;  %10051 = vst [vmem:[#allocation37_spill] sm:$0xff] %v8797_v7  ;;  %v8800_v9 = vld [vmem:[#allocation6 + $0x404] ss:$8 sps:$4 sm:$0xff]  }
 0x2a9   : > { %2853 = vmatpush1.bf16.msra.mxu1 %v8775_v22  ;;  %10052 = vst [vmem:[#allocation38_spill] sm:$0xff] %v8800_v9 }
 0x2aa   : > { %2854 = vmatprep.subr.bf16.mxu1 %v8778_v13 }
 0x2ab   : > { %3525 = vmatpush1.bf16.msra.mxu0 %v8781_v1  ;;  %v8821_v1 = vld [vmem:[#allocation6 + $0x410] ss:$8 sps:$4 sm:$0xff]  }
 0x2ac   : > { %3526 = vmatprep.subr.bf16.mxu0 %v8784_v0  ;;  %v1520_v0 = vpack.c.bf16 %v1518_v38, %v1518_v38  ;;  %10059 = vst [vmem:[#allocation45_spill] sm:$0xff] %v8821_v1  ;;  %v8830_v38 = vld [vmem:[#allocation6 + $0xc4] ss:$8 sps:$4 sm:$0xff]  }
 0x2ad   : > { %2855 = vmatpush1.bf16.msra.mxu1 %v8787_v6  ;;  %10062 = vst [vmem:[#allocation48_spill] sm:$0xff] %v8830_v38 }
 0x2ae   : > { %2856 = vmatprep.subr.bf16.mxu1 %v8794_v35  ;;  %v2405_v32 = vshrl.u32 %v1520_v0, 16 }
 0x2af   : > { %3527 = vmatpush1.bf16.msra.mxu0 %v8797_v7  ;;  %v8824_v7 = vld [vmem:[#allocation6 + $0x424] ss:$8 sps:$4 sm:$0xff]  }
 0x2b0   : > { %3528 = vmatprep.subr.bf16.mxu0 %v8800_v9  ;;  %10060 = vst [vmem:[#allocation46_spill] sm:$0xff] %v8824_v7  ;;  %v8827_v9 = vld [vmem:[#allocation6 + $0xb0] ss:$8 sps:$4 sm:$0xff]   ;;  %v2407_v58 = vrot.slane %v2405_v32, 7 }
 0x2b1   : > { %2857 = vmatpush1.bf16.msra.mxu1 %v8803_v31  ;;  %10061 = vst [vmem:[#allocation47_spill] sm:$0xff] %v8827_v9 }
 0x2b2   : > { %2858 = vmatprep.subr.bf16.mxu1 %v8806_v17  ;;  %v2408_v17 = vshll.u32 %v1520_v0, 16  ;;  %v8861_v0 = vld [vmem:[#allocation6 + $0x454] ss:$8 sps:$4 sm:$0xff]  }
 0x2b3   : > { %3529 = vmatpush1.bf16.msra.mxu0 %v8809_v3  ;;  %v8836_v3 = vld [vmem:[#allocation6 + $0x434] ss:$8 sps:$4 sm:$0xff]   ;;  %10069 = vst [vmem:[#allocation55_spill] sm:$0xff] %v8861_v0 }
 0x2b4   : > { %3530 = vmatprep.subr.bf16.mxu0 %v8812_v63  ;;  %10064 = vst [vmem:[#allocation50_spill] sm:$0xff] %v8836_v3  ;;  %v8839_v63 = vld [vmem:[#allocation6 + $0xc0] ss:$8 sps:$4 sm:$0xff]   ;;  %v2410_v32 = vor.u32 %v2408_v17, %v2407_v58  ;;  %v8872_v17 = vld [vmem:[#allocation6 + $0x1d4] ss:$8 sps:$4 sm:$0xff]  }
 0x2b5   : > { %2859 = vmatpush1.bf16.msra.mxu1 %v8815_v47  ;;  %10065 = vst [vmem:[#allocation51_spill] sm:$0xff] %v8839_v63  ;;  %v8842_v47 = vld [vmem:[#allocation6 + $0xd4] ss:$8 sps:$4 sm:$0xff]  }
 0x2b6   : > { %2860 = vmatprep.subr.bf16.mxu1 %v8818_v42  ;;  %v8845_v42 = vld [vmem:[#allocation6 + $0x430] ss:$8 sps:$4 sm:$0xff]   ;;  %v8869_v58 = vsel %vm8656_vm3, 0, %v2410_v32 }
 0x2b7   : > { %3531 = vmatpush1.bf16.msra.mxu0 %v8821_v1  ;;  %10066 = vst [vmem:[#allocation52_spill] sm:$0xff] %v8845_v42  ;;  %v2916_v1 = vshll.u32 %v8686_v15, 16  ;;  %10070 = vst [vmem:[#allocation56_spill] sm:$0xff] %v8869_v58  ;;  %v8884_v57 = vsel %vm2425_vm4, %v8869_v58, 0  ;;  %v8889_v32 = vld [vmem:[#allocation6 + $0x1d0] ss:$8 sps:$4 sm:$0xff]  }
 0x2b8   : > { %3532 = vmatprep.subr.bf16.mxu0 %v8824_v7  ;;  %v8849_v7 = vld [vmem:[#allocation6 + $0x444] ss:$8 sps:$4 sm:$0xff]  }
 0x2b9   : > { %2861 = vmatpush1.bf16.msra.mxu1 %v8827_v9  ;;  %10067 = vst [vmem:[#allocation53_spill] sm:$0xff] %v8849_v7  ;;  %v8852_v9 = vld [vmem:[#allocation6 + $0xd0] ss:$8 sps:$4 sm:$0xff]   ;;  %v2918_v31 = vrot.slane %v2916_v1, 1 }
 0x2ba   : > { %2862 = vmatprep.subr.bf16.mxu1 %v8830_v38  ;;  %v8855_v38 = vld [vmem:[#allocation6 + $0x1c4] ss:$8 sps:$4 sm:$0xff]  }
 0x2bb   : > { %3533 = vmatpush1.bf16.msra.mxu0 %v8833_v28  ;;  %v8858_v28 = vld [vmem:[#allocation6 + $0x440] ss:$8 sps:$4 sm:$0xff]  }
 0x2bc   : > { %3534 = vmatprep.subr.bf16.mxu0 %v8836_v3  ;;  %10068 = vst [vmem:[#allocation54_spill] sm:$0xff] %v8858_v28  ;;  %v8864_v3 = vld [vmem:[#allocation6 + $0x1c0] ss:$8 sps:$4 sm:$0xff]  }
 0x2bd   : > { %2863 = vmatpush1.bf16.msra.mxu1 %v8839_v63  ;;  %v2914_v63 = vshrl.u32 %v8686_v15, 16 }
 0x2be   : > { %2864 = vmatprep.subr.bf16.mxu1 %v8842_v47 }
 0x2bf   : > { %3535 = vmatpush1.bf16.msra.mxu0 %v8845_v42  ;;  %v8875_v1 = vor.u32 %v2918_v31, %v2914_v63  ;;  %v8892_v31 = vld [vmem:[#allocation6 + $0x1e4] ss:$8 sps:$4 sm:$0xff]   ;;  %v8896_v63 = vrot.slane %v8884_v57, 1  ;;  %v8922_v42 = vld [vmem:[#allocation6 + $0x214] ss:$8 sps:$4 sm:$0xff]  }
 0x2c0   : > { %3536 = vmatprep.subr.bf16.mxu0 %v8849_v7  ;;  %v8877_v7 = vld [vmem:[#allocation6 + $0x450] ss:$8 sps:$4 sm:$0xff]  }
 0x2c1   : > { %2865 = vmatpush1.bf16.msra.mxu1 %v8852_v9  ;;  %10071 = vst [vmem:[#allocation57_spill] sm:$0xff] %v8875_v1  ;;  %10072 = vst [vmem:[#allocation58_spill] sm:$0xff] %v8877_v7 }
 0x2c2   : > { %3064 = vmatprep.subr.bf16.mxu1 %v8855_v38  ;;  %10073 = vst [vmem:[#allocation59_spill] sm:$0xff] %v8896_v63 }
 0x2c3   : > { %3537 = vmatpush1.bf16.msra.mxu0 %v8858_v28  ;;  %v8904_v28 = vld [vmem:[#allocation6 + $0x1f4] ss:$8 sps:$4 sm:$0xff]  }
 0x2c4   : > { %6470 = vmatmul.mubr.msk.bf16.vlgmr.msra.gmra.mrb[20].mxu1 %vm2425_vm4, %v8869_v58  ;;  %3538 = vmatprep.subr.bf16.mxu0 %v8861_v0  ;;  %v8900_v0 = vld [vmem:[#allocation6 + $0x1e0] ss:$8 sps:$4 sm:$0xff]   ;;  %v9006_v58 = vld [vmem:[#allocation6 + $0x554] ss:$8 sps:$4 sm:$0xff]  }
 0x2c5   : > { %3065 = vmatpush1.bf16.msra.mxu1 %v8864_v3  ;;  %6499 = vmatprep.mubr.msk.bf16.mxu1 %vm2652_vm5, %v8875_v1 }
 0x2c6   : > { %3066 = vmatprep.subr.bf16.mxu1 %v8872_v17 }
 0x2c7   : > { %3539 = vmatpush1.bf16.msra.mxu0 %v8877_v7  ;;  %v8914_v7 = vld [vmem:[#allocation6 + $0x204] ss:$8 sps:$4 sm:$0xff]  }
 0x2c8   : > { %4613 = vmatprep.subr.bf16.mxu0 %v8550_v55  ;;  %v8911_v55 = vld [vmem:[#allocation6 + $0x1f0] ss:$8 sps:$4 sm:$0xff]  }
 0x2c9   : > { %3067 = vmatpush1.bf16.msra.mxu1 %v8889_v32 }
 0x2ca   : > { %3545 = vmatmul.mubr.bf16.vlgmr.msra.gmra.mrb[16].mxu0 %v8896_v63  ;;  %3068 = vmatprep.subr.bf16.mxu1 %v8892_v31  ;;  %v8992_v63 = vld [vmem:[#allocation6 + $0x290] ss:$8 sps:$4 sm:$0xff]  }
 0x2cb   : > { %4614 = vmatpush1.bf16.msra.mxu0 %v8548_v54  ;;  %6705 = vmatprep.mubr.msk.bf16.mxu0 %vm2652_vm5, %v8875_v1  ;;  %v8919_v54 = vld [vmem:[#allocation6 + $0x200] ss:$8 sps:$4 sm:$0xff]   ;;  %v2908_v1 = vshrl.u32 %v8884_v57, 16 }
 0x2cc   : > { %4615 = vmatprep.subr.bf16.mxu0 %v8552_v56  ;;  %v8927_v56 = vld [vmem:[#allocation6 + $0x210] ss:$8 sps:$4 sm:$0xff]  }
 0x2cd   : > { %3069 = vmatpush1.bf16.msra.mxu1 %v8900_v0 }
 0x2ce   : > { %3070 = vmatprep.subr.bf16.mxu1 %v8904_v28 }
 0x2cf   : > { %4616 = vmatpush1.bf16.msra.mxu0 %v8556_v59  ;;  %v8930_v59 = vld [vmem:[#allocation6 + $0x224] ss:$8 sps:$4 sm:$0xff]  }
 0x2d0   : > { %4617 = vmatprep.subr.bf16.mxu0 %v8559_v53  ;;  %v8935_v53 = vld [vmem:[#allocation6 + $0x220] ss:$8 sps:$4 sm:$0xff]  }
 0x2d1   : > { %3071 = vmatpush1.bf16.msra.mxu1 %v8911_v55 }
 0x2d2   : > { %3072 = vmatprep.subr.bf16.mxu1 %v8914_v7 }
 0x2d3   : > { %4618 = vmatpush1.bf16.msra.mxu0 %v8562_v2  ;;  %v8938_v2 = vld [vmem:[#allocation6 + $0x234] ss:$8 sps:$4 sm:$0xff]  }
 0x2d4   : > { %4619 = vmatprep.subr.bf16.mxu0 %v8565_v4  ;;  %v8943_v4 = vld [vmem:[#allocation6 + $0x230] ss:$8 sps:$4 sm:$0xff]  }
 0x2d5   : > { %3073 = vmatpush1.bf16.msra.mxu1 %v8919_v54 }
 0x2d6   : > { %3074 = vmatprep.subr.bf16.mxu1 %v8922_v42 }
 0x2d7   : > { %4620 = vmatpush1.bf16.msra.mxu0 %v8568_v8  ;;  %v8946_v8 = vld [vmem:[#allocation6 + $0x244] ss:$8 sps:$4 sm:$0xff]  }
 0x2d8   : > { %4621 = vmatprep.subr.bf16.mxu0 %v8571_v10  ;;  %v8951_v10 = vld [vmem:[#allocation6 + $0x240] ss:$8 sps:$4 sm:$0xff]  }
 0x2d9   : > { %3075 = vmatpush1.bf16.msra.mxu1 %v8927_v56 }
 0x2da   : > { %3076 = vmatprep.subr.bf16.mxu1 %v8930_v59 }
 0x2db   : > { %4622 = vmatpush1.bf16.msra.mxu0 %v8576_v19  ;;  %v8954_v19 = vld [vmem:[#allocation6 + $0x254] ss:$8 sps:$4 sm:$0xff]  }
 0x2dc   : > { %4623 = vmatprep.subr.bf16.mxu0 %v8581_v21  ;;  %v8959_v21 = vld [vmem:[#allocation6 + $0x250] ss:$8 sps:$4 sm:$0xff]  }
 0x2dd   : > { %3077 = vmatpush1.bf16.msra.mxu1 %v8935_v53 }
 0x2de   : > { %3078 = vmatprep.subr.bf16.mxu1 %v8938_v2 }
 0x2df   : > { %4624 = vmatpush1.bf16.msra.mxu0 %v8584_v24  ;;  %v8962_v24 = vld [vmem:[#allocation6 + $0x264] ss:$8 sps:$4 sm:$0xff]  }
 0x2e0   : > { %4625 = vmatprep.subr.bf16.mxu0 %v8587_v25  ;;  %v8967_v25 = vld [vmem:[#allocation6 + $0x260] ss:$8 sps:$4 sm:$0xff]  }
 0x2e1   : > { %3079 = vmatpush1.bf16.msra.mxu1 %v8943_v4 }
 0x2e2   : > { %3080 = vmatprep.subr.bf16.mxu1 %v8946_v8 }
 0x2e3   : > { %4626 = vmatpush1.bf16.msra.mxu0 %v8590_v29  ;;  %v8970_v29 = vld [vmem:[#allocation6 + $0x274] ss:$8 sps:$4 sm:$0xff]  }
 0x2e4   : > { %4627 = vmatprep.subr.bf16.mxu0 %v8593_v30  ;;  %v8975_v30 = vld [vmem:[#allocation6 + $0x270] ss:$8 sps:$4 sm:$0xff]  }
 0x2e5   : > { %3081 = vmatpush1.bf16.msra.mxu1 %v8951_v10 }
 0x2e6   : > { %3082 = vmatprep.subr.bf16.mxu1 %v8954_v19 }
 0x2e7   : > { %4628 = vmatpush1.bf16.msra.mxu0 %v8596_v33  ;;  %v8978_v33 = vld [vmem:[#allocation6 + $0x284] ss:$8 sps:$4 sm:$0xff]  }
 0x2e8   : > { %4629 = vmatprep.subr.bf16.mxu0 %v8599_v34  ;;  %v8983_v34 = vld [vmem:[#allocation6 + $0x280] ss:$8 sps:$4 sm:$0xff]  }
 0x2e9   : > { %3083 = vmatpush1.bf16.msra.mxu1 %v8959_v21 }
 0x2ea   : > { %3084 = vmatprep.subr.bf16.mxu1 %v8962_v24 }
 0x2eb   : > { %4630 = vmatpush1.bf16.msra.mxu0 %v8602_v27  ;;  %v8986_v27 = vld [vmem:[#allocation6 + $0x294] ss:$8 sps:$4 sm:$0xff]  }
 0x2ec   : > { %4631 = vmatprep.subr.bf16.mxu0 %v8605_v36  ;;  %v2910_v36 = vshll.u32 %v8884_v57, 16  ;;  %v10078_v57 = vld [vmem:[#allocation40_spill] sm:$0xff] }
 0x2ed   : > { %3085 = vmatpush1.bf16.msra.mxu1 %v8967_v25 }
 0x2ee   : > { %3086 = vmatprep.subr.bf16.mxu1 %v8970_v29 }
 0x2ef   : > { %4632 = vmatpush1.bf16.msra.mxu0 %v8608_v37  ;;  %v2912_v37 = vrot.slane %v2910_v36, 1  ;;  %v9105_v36 = vld [vmem:[#allocation6 + $0x600] ss:$8 sps:$4 sm:$0xff]  }
 0x2f0   : > { %4633 = vmatprep.subr.bf16.mxu0 %v8612_v40  ;;  %v8995_v40 = vld [vmem:[#allocation6 + $0x544] ss:$8 sps:$4 sm:$0xff]  }
 0x2f1   : > { %3087 = vmatpush1.bf16.msra.mxu1 %v8975_v30 }
 0x2f2   : > { %3088 = vmatprep.subr.bf16.mxu1 %v8978_v33 }
 0x2f3   : > { %4634 = vmatpush1.bf16.msra.mxu0 %v8614_v41  ;;  %v9001_v41 = vld [vmem:[#allocation6 + $0x540] ss:$8 sps:$4 sm:$0xff]  }
 0x2f4   : > { %4635 = vmatprep.subr.bf16.mxu0 %v8618_v44  ;;  %v9003_v44 = vor.u32 %v2912_v37, %v2908_v1  ;;  %v9044_v1 = vld [vmem:[#allocation6 + $0x594] ss:$8 sps:$4 sm:$0xff]  }
 0x2f5   : > { %3089 = vmatpush1.bf16.msra.mxu1 %v8983_v34  ;;  %v10081_v37 = vld [vmem:[#allocation44_spill] sm:$0xff] }
 0x2f6   : > { %3090 = vmatprep.subr.bf16.mxu1 %v8986_v27 }
 0x2f7   : > { %4636 = vmatpush1.bf16.msra.mxu0 %v8620_v45  ;;  %v9014_v45 = vld [vmem:[#allocation6 + $0x550] ss:$8 sps:$4 sm:$0xff]  }
 0x2f8   : > { %4637 = vmatprep.subr.bf16.mxu0 %v8624_v48  ;;  %v9017_v48 = vld [vmem:[#allocation6 + $0x564] ss:$8 sps:$4 sm:$0xff]  }
 0x2f9   : > { %3091 = vmatpush1.bf16.msra.mxu1 %v8992_v63 }
 0x2fa   : > { %3753 = vmatprep.subr.bf16.mxu1 %v8995_v40 }
 0x2fb   : > { %4638 = vmatpush1.bf16.msra.mxu0 %v8626_v49  ;;  %v9022_v49 = vld [vmem:[#allocation6 + $0x560] ss:$8 sps:$4 sm:$0xff]  }
 0x2fc   : > { %3097 = vmatmul.mubr.bf16.vlgmr.msra.gmra.mrb[20].mxu1 %v9003_v44  ;;  %4639 = vmatprep.subr.bf16.mxu0 %v8630_v60  ;;  %v9026_v60 = vld [vmem:[#allocation6 + $0x574] ss:$8 sps:$4 sm:$0xff]  }
 0x2fd   : > { %3754 = vmatpush1.bf16.msra.mxu1 %v9001_v41  ;;  %6586 = vmatprep.mubr.msk.bf16.mxu1 %vm2652_vm5, %v8675_v11 }
 0x2fe   : > { %3755 = vmatprep.subr.bf16.mxu1 %v9006_v58 }
 0x2ff   : > { %4640 = vmatpush1.bf16.msra.mxu0 %v8632_v62  ;;  %v9033_v62 = vld [vmem:[#allocation6 + $0x570] ss:$8 sps:$4 sm:$0xff]  }
 0x300   : > { %4654 = vmatprep.subr.bf16.mxu0 %v8638_v5  ;;  %v9036_v5 = vld [vmem:[#allocation6 + $0x584] ss:$8 sps:$4 sm:$0xff]  }
 0x301   : > { %3756 = vmatpush1.bf16.msra.mxu1 %v9014_v45 }
 0x302   : > { %4646 = vmatmul.mubr.bf16.vlgmr.msra.gmra.mrb[20].mxu0 %v9003_v44  ;;  %3757 = vmatprep.subr.bf16.mxu1 %v9017_v48 }
 0x303   : > { %4655 = vmatpush1.bf16.msra.mxu0 %v8666_v52  ;;  %6706 = vmatprep.mubr.msk.bf16.mxu0 %vm2652_vm5, %v8675_v11  ;;  %v9041_v52 = vld [vmem:[#allocation6 + $0x580] ss:$8 sps:$4 sm:$0xff]  }
 0x304   : > { %4656 = vmatprep.subr.bf16.mxu0 %v8677_v12  ;;  %v9049_v12 = vld [vmem:[#allocation6 + $0x590] ss:$8 sps:$4 sm:$0xff]  }
 0x305   : > { %3758 = vmatpush1.bf16.msra.mxu1 %v9022_v49 }
 0x306   : > { %3759 = vmatprep.subr.bf16.mxu1 %v9026_v60 }
 0x307   : > { %4657 = vmatpush1.bf16.msra.mxu0 %v8691_v18  ;;  %v9052_v18 = vld [vmem:[#allocation6 + $0x5a4] ss:$8 sps:$4 sm:$0xff]  }
 0x308   : > { %4658 = vmatprep.subr.bf16.mxu0 %v8696_v26  ;;  %v9057_v26 = vld [vmem:[#allocation6 + $0x5a0] ss:$8 sps:$4 sm:$0xff]  }
 0x309   : > { %3760 = vmatpush1.bf16.msra.mxu1 %v9033_v62 }
 0x30a   : > { %3761 = vmatprep.subr.bf16.mxu1 %v9036_v5 }
 0x30b   : > { %4659 = vmatpush1.bf16.msra.mxu0 %v8709_v20  ;;  %v9060_v20 = vld [vmem:[#allocation6 + $0x5b4] ss:$8 sps:$4 sm:$0xff]  }
 0x30c   : > { %4660 = vmatprep.subr.bf16.mxu0 %v8716_v39  ;;  %v9065_v39 = vld [vmem:[#allocation6 + $0x5b0] ss:$8 sps:$4 sm:$0xff]  }
 0x30d   : > { %3762 = vmatpush1.bf16.msra.mxu1 %v9041_v52 }
 0x30e   : > { %3763 = vmatprep.subr.bf16.mxu1 %v9044_v1 }
 0x30f   : > { %4661 = vmatpush1.bf16.msra.mxu0 %v8727_v51  ;;  %v9068_v51 = vld [vmem:[#allocation6 + $0x5c4] ss:$8 sps:$4 sm:$0xff]  }
 0x310   : > { %4662 = vmatprep.subr.bf16.mxu0 %v8730_v50  ;;  %v9073_v50 = vld [vmem:[#allocation6 + $0x5c0] ss:$8 sps:$4 sm:$0xff]  }
 0x311   : > { %3764 = vmatpush1.bf16.msra.mxu1 %v9049_v12 }
 0x312   : > { %3765 = vmatprep.subr.bf16.mxu1 %v9052_v18 }
 0x313   : > { %4663 = vmatpush1.bf16.msra.mxu0 %v8739_v14  ;;  %v9076_v14 = vld [vmem:[#allocation6 + $0x5d4] ss:$8 sps:$4 sm:$0xff]  }
 0x314   : > { %4664 = vmatprep.subr.bf16.mxu0 %v8742_v16  ;;  %v9081_v16 = vld [vmem:[#allocation6 + $0x5d0] ss:$8 sps:$4 sm:$0xff]  }
 0x315   : > { %3766 = vmatpush1.bf16.msra.mxu1 %v9057_v26 }
 0x316   : > { %3767 = vmatprep.subr.bf16.mxu1 %v9060_v20 }
 0x317   : > { %4665 = vmatpush1.bf16.msra.mxu0 %v8751_v23  ;;  %v9084_v23 = vld [vmem:[#allocation6 + $0x5e4] ss:$8 sps:$4 sm:$0xff]  }
 0x318   : > { %4666 = vmatprep.subr.bf16.mxu0 %v8754_v46  ;;  %v9089_v46 = vld [vmem:[#allocation6 + $0x5e0] ss:$8 sps:$4 sm:$0xff]  }
 0x319   : > { %3768 = vmatpush1.bf16.msra.mxu1 %v9065_v39 }
 0x31a   : > { %3769 = vmatprep.subr.bf16.mxu1 %v9068_v51 }
 0x31b   : > { %4667 = vmatpush1.bf16.msra.mxu0 %v8763_v43  ;;  %v9092_v43 = vld [vmem:[#allocation6 + $0x5f4] ss:$8 sps:$4 sm:$0xff]  }
 0x31c   : > { %4668 = vmatprep.subr.bf16.mxu0 %v8766_v61  ;;  %10074 = vst [vmem:[#allocation60_spill] sm:$0xff] %v9092_v43  ;;  %v9097_v61 = vld [vmem:[#allocation6 + $0x5f0] ss:$8 sps:$4 sm:$0xff]  }
 0x31d   : > { %3770 = vmatpush1.bf16.msra.mxu1 %v9073_v50  ;;  %10075 = vst [vmem:[#allocation61_spill] sm:$0xff] %v9097_v61 }
 0x31e   : > { %3771 = vmatprep.subr.bf16.mxu1 %v9076_v14 }
 0x31f   : > { %4669 = vmatpush1.bf16.msra.mxu0 %v8775_v22  ;;  %v9100_v22 = vld [vmem:[#allocation6 + $0x604] ss:$8 sps:$4 sm:$0xff]  }
 0x320   : > { %4670 = vmatprep.subr.bf16.mxu0 %v8778_v13  ;;  %10076 = vst [vmem:[#allocation62_spill] sm:$0xff] %v9100_v22  ;;  %v10077_v13 = vld [vmem:[#allocation39_spill] sm:$0xff] }
 0x321   : > { %3772 = vmatpush1.bf16.msra.mxu1 %v9081_v16  ;;  %10079 = vst [vmem:[#allocation39_spill] sm:$0xff] %v9105_v36 }
 0x322   : > { %3773 = vmatprep.subr.bf16.mxu1 %v9084_v23 }
 0x323   : > { %4671 = vmatpush1.bf16.msra.mxu0 %v8787_v6  ;;  %v9108_v6 = vld [vmem:[#allocation6 + $0x614] ss:$8 sps:$4 sm:$0xff]  }
 0x324   : > { %4672 = vmatprep.subr.bf16.mxu0 %v8794_v35  ;;  %v10080_v35 = vld [vmem:[#allocation43_spill] sm:$0xff] }
 0x325   : > { %3774 = vmatpush1.bf16.msra.mxu1 %v9089_v46 }
 0x326   : > { %3775 = vmatprep.subr.bf16.mxu1 %v9092_v43  ;;  %v9113_v43 = vld [vmem:[#allocation6 + $0x610] ss:$8 sps:$4 sm:$0xff]  }
 0x327   : > { %4673 = vmatpush1.bf16.msra.mxu0 %v10077_v13  ;;  %v9116_v13 = vld [vmem:[#allocation6 + $0x464] ss:$8 sps:$4 sm:$0xff]  }
 0x328   : > { %4674 = vmatprep.subr.bf16.mxu0 %v10078_v57  ;;  %v10082_v57 = vld [vmem:[#allocation47_spill] sm:$0xff] }
 0x329   : > { %3776 = vmatpush1.bf16.msra.mxu1 %v9097_v61  ;;  %v10083_v61 = vld [vmem:[#allocation48_spill] sm:$0xff] }
 0x32a   : > { %3777 = vmatprep.subr.bf16.mxu1 %v9100_v22  ;;  %v9121_v22 = vld [vmem:[#allocation6 + $0x460] ss:$8 sps:$4 sm:$0xff]  }
 0x32b   : > { %4675 = vmatpush1.bf16.msra.mxu0 %v10080_v35  ;;  %v9124_v35 = vld [vmem:[#allocation6 + $0x474] ss:$8 sps:$4 sm:$0xff]  }
 0x32c   : > { %4676 = vmatprep.subr.bf16.mxu0 %v10081_v37  ;;  %v10084_v37 = vld [vmem:[#allocation51_spill] sm:$0xff] }
 0x32d   : > { %3778 = vmatpush1.bf16.msra.mxu1 %v9105_v36  ;;  %v10085_v36 = vld [vmem:[#allocation18_spill] sm:$0xff] }
 0x32e   : > { %3779 = vmatprep.subr.bf16.mxu1 %v9108_v6 }
 0x32f   : > { %4677 = vmatpush1.bf16.msra.mxu0 %v10082_v57  ;;  %v9136_v57 = vld [vmem:[#allocation6 + $0x484] ss:$8 sps:$4 sm:$0xff]  }
 0x330   : > { %4678 = vmatprep.subr.bf16.mxu0 %v10083_v61  ;;  %v9133_v61 = vld [vmem:[#allocation6 + $0x470] ss:$8 sps:$4 sm:$0xff]  }
 0x331   : > { %3780 = vmatpush1.bf16.msra.mxu1 %v9113_v43 }
 0x332   : > { %3934 = vmatprep.subr.bf16.mxu1 %v9116_v13 }
 0x333   : > { %4679 = vmatpush1.bf16.msra.mxu0 %v10084_v37  ;;  %v9141_v37 = vld [vmem:[#allocation6 + $0x480] ss:$8 sps:$4 sm:$0xff]  }
 0x334   : > { %6587 = vmatmul.mubr.msk.bf16.vlgmr.msra.gmra.mrb[24].mxu1 %vm2425_vm4, %v10085_v36  ;;  %4680 = vmatprep.subr.bf16.mxu0 %v8842_v47  ;;  %v10086_v47 = vld [vmem:[#allocation20_spill] sm:$0xff] }
 0x335   : > { %3935 = vmatpush1.bf16.msra.mxu1 %v9121_v22  ;;  %6616 = vmatprep.mubr.msk.bf16.mxu1 %vm2652_vm5, %v8686_v15  ;;  %v9146_v15 = vld [vmem:[#allocation6 + $0x494] ss:$8 sps:$4 sm:$0xff]  }
 0x336   : > { %3936 = vmatprep.subr.bf16.mxu1 %v9124_v35 }
 0x337   : > { %4681 = vmatpush1.bf16.msra.mxu0 %v8852_v9  ;;  %v9153_v9 = vld [vmem:[#allocation6 + $0x490] ss:$8 sps:$4 sm:$0xff]  }
 0x338   : > { %4695 = vmatprep.subr.bf16.mxu0 %v8855_v38  ;;  %v9156_v38 = vld [vmem:[#allocation6 + $0x4a4] ss:$8 sps:$4 sm:$0xff]  }
 0x339   : > { %3937 = vmatpush1.bf16.msra.mxu1 %v9133_v61 }
 0x33a   : > { %6707 = vmatmul.mubr.msk.bf16.vlgmr.msra.gmra.mrb[20].mxu0 %vm2425_vm4, %v10085_v36  ;;  %3938 = vmatprep.subr.bf16.mxu1 %v9136_v57  ;;  %v9164_v36 = vld [vmem:[#allocation6 + $0x4b4] ss:$8 sps:$4 sm:$0xff]  }
 0x33b   : > { %4696 = vmatpush1.bf16.msra.mxu0 %v8864_v3  ;;  %6708 = vmatprep.mubr.msk.bf16.mxu0 %vm2652_vm5, %v10086_v47  ;;  %v9161_v3 = vld [vmem:[#allocation6 + $0x4a0] ss:$8 sps:$4 sm:$0xff]  }
 0x33c   : > { %4697 = vmatprep.subr.bf16.mxu0 %v8872_v17  ;;  %v9169_v17 = vld [vmem:[#allocation6 + $0x4b0] ss:$8 sps:$4 sm:$0xff]  }
 0x33d   : > { %3939 = vmatpush1.bf16.msra.mxu1 %v9141_v37 }
 0x33e   : > { %3940 = vmatprep.subr.bf16.mxu1 %v9146_v15 }
 0x33f   : > { %4698 = vmatpush1.bf16.msra.mxu0 %v8889_v32  ;;  %v9172_v32 = vld [vmem:[#allocation6 + $0x4c4] ss:$8 sps:$4 sm:$0xff]  }
 0x340   : > { %4699 = vmatprep.subr.bf16.mxu0 %v8892_v31  ;;  %v9177_v31 = vld [vmem:[#allocation6 + $0x4c0] ss:$8 sps:$4 sm:$0xff]  }
 0x341   : > { %3941 = vmatpush1.bf16.msra.mxu1 %v9153_v9 }
 0x342   : > { %3942 = vmatprep.subr.bf16.mxu1 %v9156_v38 }
 0x343   : > { %4700 = vmatpush1.bf16.msra.mxu0 %v8900_v0  ;;  %v9180_v0 = vld [vmem:[#allocation6 + $0x4d4] ss:$8 sps:$4 sm:$0xff]  }
 0x344   : > { %4701 = vmatprep.subr.bf16.mxu0 %v8904_v28  ;;  %v9185_v28 = vld [vmem:[#allocation6 + $0x4d0] ss:$8 sps:$4 sm:$0xff]  }
 0x345   : > { %3943 = vmatpush1.bf16.msra.mxu1 %v9161_v3 }
 0x346   : > { %3944 = vmatprep.subr.bf16.mxu1 %v9164_v36 }
 0x347   : > { %4702 = vmatpush1.bf16.msra.mxu0 %v8911_v55  ;;  %v9188_v55 = vld [vmem:[#allocation6 + $0x4e4] ss:$8 sps:$4 sm:$0xff]  }
 0x348   : > { %4703 = vmatprep.subr.bf16.mxu0 %v8914_v7  ;;  %v9193_v7 = vld [vmem:[#allocation6 + $0x4e0] ss:$8 sps:$4 sm:$0xff]  }
 0x349   : > { %3945 = vmatpush1.bf16.msra.mxu1 %v9169_v17 }
 0x34a   : > { %3946 = vmatprep.subr.bf16.mxu1 %v9172_v32 }
 0x34b   : > { %4704 = vmatpush1.bf16.msra.mxu0 %v8919_v54  ;;  %v9196_v54 = vld [vmem:[#allocation6 + $0x4f4] ss:$8 sps:$4 sm:$0xff]  }
 0x34c   : > { %4705 = vmatprep.subr.bf16.mxu0 %v8922_v42  ;;  %v9201_v42 = vld [vmem:[#allocation6 + $0x4f0] ss:$8 sps:$4 sm:$0xff]  }
 0x34d   : > { %3947 = vmatpush1.bf16.msra.mxu1 %v9177_v31 }
 0x34e   : > { %3948 = vmatprep.subr.bf16.mxu1 %v9180_v0 }
 0x34f   : > { %4706 = vmatpush1.bf16.msra.mxu0 %v8927_v56  ;;  %v9204_v56 = vld [vmem:[#allocation6 + $0x504] ss:$8 sps:$4 sm:$0xff]  }
 0x350   : > { %4707 = vmatprep.subr.bf16.mxu0 %v8930_v59  ;;  %10087 = vst [vmem:[#allocation40_spill] sm:$0xff] %v9204_v56  ;;  %v9209_v59 = vld [vmem:[#allocation6 + $0x500] ss:$8 sps:$4 sm:$0xff]  }
 0x351   : > { %3949 = vmatpush1.bf16.msra.mxu1 %v9185_v28  ;;  %10088 = vst [vmem:[#allocation43_spill] sm:$0xff] %v9209_v59 }
 0x352   : > { %3950 = vmatprep.subr.bf16.mxu1 %v9188_v55 }
 0x353   : > { %4708 = vmatpush1.bf16.msra.mxu0 %v8935_v53  ;;  %v9212_v53 = vld [vmem:[#allocation6 + $0x514] ss:$8 sps:$4 sm:$0xff]  }
 0x354   : > { %4709 = vmatprep.subr.bf16.mxu0 %v8938_v2  ;;  %10089 = vst [vmem:[#allocation44_spill] sm:$0xff] %v9212_v53  ;;  %v9217_v2 = vld [vmem:[#allocation6 + $0x510] ss:$8 sps:$4 sm:$0xff]  }
 0x355   : > { %3951 = vmatpush1.bf16.msra.mxu1 %v9193_v7  ;;  %10090 = vst [vmem:[#allocation47_spill] sm:$0xff] %v9217_v2 }
 0x356   : > { %3952 = vmatprep.subr.bf16.mxu1 %v9196_v54 }
 0x357   : > { %4710 = vmatpush1.bf16.msra.mxu0 %v8943_v4  ;;  %v9220_v4 = vld [vmem:[#allocation6 + $0x524] ss:$8 sps:$4 sm:$0xff]  }
 0x358   : > { %4711 = vmatprep.subr.bf16.mxu0 %v8946_v8  ;;  %10091 = vst [vmem:[#allocation48_spill] sm:$0xff] %v9220_v4  ;;  %v9225_v8 = vld [vmem:[#allocation6 + $0x520] ss:$8 sps:$4 sm:$0xff]  }
 0x359   : > { %3953 = vmatpush1.bf16.msra.mxu1 %v9201_v42  ;;  %10092 = vst [vmem:[#allocation51_spill] sm:$0xff] %v9225_v8 }
 0x35a   : > { %3954 = vmatprep.subr.bf16.mxu1 %v9204_v56  ;;  %v9448_v56 = vld [vmem:[#allocation6 + $0x7d4] ss:$8 sps:$4 sm:$0xff]  }
 0x35b   : > { %4712 = vmatpush1.bf16.msra.mxu0 %v8951_v10  ;;  %v9228_v10 = vld [vmem:[#allocation6 + $0x534] ss:$8 sps:$4 sm:$0xff]  }
 0x35c   : > { %4713 = vmatprep.subr.bf16.mxu0 %v8954_v19  ;;  %10093 = vst [vmem:[#allocation63_spill] sm:$0xff] %v9228_v10  ;;  %v9233_v19 = vld [vmem:[#allocation6 + $0x530] ss:$8 sps:$4 sm:$0xff]  }
 0x35d   : > { %3955 = vmatpush1.bf16.msra.mxu1 %v9209_v59  ;;  %10094 = vst [vmem:[#allocation64_spill] sm:$0xff] %v9233_v19  ;;  %v10170_v59 = vld [vmem:[#allocation46_spill] sm:$0xff] }
 0x35e   : > { %3956 = vmatprep.subr.bf16.mxu1 %v9212_v53  ;;  %v7758_v53 = vld [vmem:[#allocation6 + $0x364] ss:$8 sps:$4 sm:$0xff]  }
 0x35f   : > { %4714 = vmatpush1.bf16.msra.mxu0 %v8959_v21  ;;  %v9236_v21 = vld [vmem:[#allocation6 + $0x624] ss:$8 sps:$4 sm:$0xff]  }
 0x360   : > { %4715 = vmatprep.subr.bf16.mxu0 %v8962_v24  ;;  %10095 = vst [vmem:[#allocation65_spill] sm:$0xff] %v9236_v21  ;;  %v9241_v24 = vld [vmem:[#allocation6 + $0x620] ss:$8 sps:$4 sm:$0xff]  }
 0x361   : > { %3957 = vmatpush1.bf16.msra.mxu1 %v9217_v2  ;;  %10096 = vst [vmem:[#allocation66_spill] sm:$0xff] %v9241_v24 }
 0x362   : > { %3958 = vmatprep.subr.bf16.mxu1 %v9220_v4 }
 0x363   : > { %4716 = vmatpush1.bf16.msra.mxu0 %v8967_v25  ;;  %v9244_v25 = vld [vmem:[#allocation6 + $0x634] ss:$8 sps:$4 sm:$0xff]  }
 0x364   : > { %4717 = vmatprep.subr.bf16.mxu0 %v8970_v29  ;;  %10097 = vst [vmem:[#allocation67_spill] sm:$0xff] %v9244_v25  ;;  %v10098_v29 = vld [vmem:[#allocation56_spill] sm:$0xff] }
 0x365   : > { %3959 = vmatpush1.bf16.msra.mxu1 %v9225_v8  ;;  %v9278_v8 = vld [vmem:[#allocation6 + $0x674] ss:$8 sps:$4 sm:$0xff]  }
 0x366   : > { %3960 = vmatprep.subr.bf16.mxu1 %v9228_v10  ;;  %v10105_v10 = vld [vmem:[#allocation24_spill] sm:$0xff]  ;;  %10109 = vst [vmem:[#allocation71_spill] sm:$0xff] %v9278_v8 }
 0x367   : > { %4718 = vmatpush1.bf16.msra.mxu0 %v8975_v30  ;;  %v10099_v30 = vld [vmem:[#allocation57_spill] sm:$0xff] }
 0x368   : > { %4719 = vmatprep.subr.bf16.mxu0 %v8978_v33  ;;  %v9253_v33 = vld [vmem:[#allocation6 + $0x630] ss:$8 sps:$4 sm:$0xff]  }
 0x369   : > { %3961 = vmatpush1.bf16.msra.mxu1 %v9233_v19  ;;  %10100 = vst [vmem:[#allocation56_spill] sm:$0xff] %v9253_v33  ;;  %v9256_v19 = vld [vmem:[#allocation6 + $0x644] ss:$8 sps:$4 sm:$0xff]  }
 0x36a   : > { %4144 = vmatprep.subr.bf16.mxu1 %v9236_v21  ;;  %10101 = vst [vmem:[#allocation57_spill] sm:$0xff] %v9256_v19  ;;  %v7734_v21 = vld [vmem:[#allocation6 + $0x2a4] ss:$8 sps:$4 sm:$0xff]  }
 0x36b   : > { %4720 = vmatpush1.bf16.msra.mxu0 %v8983_v34  ;;  %v9260_v34 = vld [vmem:[#allocation6 + $0x640] ss:$8 sps:$4 sm:$0xff]  }
 0x36c   : > { %6617 = vmatmul.mubr.msk.bf16.vlgmr.msra.gmra.mrb[24].mxu1 %vm2425_vm4, %v10098_v29  ;;  %4721 = vmatprep.subr.bf16.mxu0 %v8986_v27  ;;  %10102 = vst [vmem:[#allocation68_spill] sm:$0xff] %v9260_v34  ;;  %v10103_v27 = vld [vmem:[#allocation22_spill] sm:$0xff]  ;;  %v9264_v29 = vld [vmem:[#allocation6 + $0x654] ss:$8 sps:$4 sm:$0xff]  }
 0x36d   : > { %4145 = vmatpush1.bf16.msra.mxu1 %v9241_v24  ;;  %6646 = vmatprep.mubr.msk.bf16.mxu1 %vm2652_vm5, %v10099_v30  ;;  %10104 = vst [vmem:[#allocation22_spill] sm:$0xff] %v9264_v29  ;;  %v7735_v24 = vld [vmem:[#allocation6 + $0x2a0] ss:$8 sps:$4 sm:$0xff]  }
 0x36e   : > { %4146 = vmatprep.subr.bf16.mxu1 %v9244_v25  ;;  %v7736_v25 = vld [vmem:[#allocation6 + $0x2b4] ss:$8 sps:$4 sm:$0xff]  }
 0x36f   : > { %4722 = vmatpush1.bf16.msra.mxu0 %v8992_v63  ;;  %v9269_v63 = vld [vmem:[#allocation6 + $0x650] ss:$8 sps:$4 sm:$0xff]  }
 0x370   : > { %4738 = vmatprep.subr.bf16.mxu0 %v7734_v21  ;;  %10106 = vst [vmem:[#allocation24_spill] sm:$0xff] %v9269_v63  ;;  %v9272_v21 = vld [vmem:[#allocation6 + $0x664] ss:$8 sps:$4 sm:$0xff]  }
 0x371   : > { %4147 = vmatpush1.bf16.msra.mxu1 %v9253_v33  ;;  %10107 = vst [vmem:[#allocation69_spill] sm:$0xff] %v9272_v21  ;;  %v7737_v33 = vld [vmem:[#allocation6 + $0x2b0] ss:$8 sps:$4 sm:$0xff]  }
 0x372   : > { %4728 = vmatmul.mubr.bf16.vlgmr.msra.gmra.mrb[20].mxu0 %v10103_v27  ;;  %4148 = vmatprep.subr.bf16.mxu1 %v9256_v19  ;;  %v7738_v19 = vld [vmem:[#allocation6 + $0x2c4] ss:$8 sps:$4 sm:$0xff]  }
 0x373   : > { %4739 = vmatpush1.bf16.msra.mxu0 %v7735_v24  ;;  %6709 = vmatprep.mubr.msk.bf16.mxu0 %vm2652_vm5, %v10105_v10  ;;  %v9275_v24 = vld [vmem:[#allocation6 + $0x660] ss:$8 sps:$4 sm:$0xff]  }
 0x374   : > { %4740 = vmatprep.subr.bf16.mxu0 %v7736_v25  ;;  %10108 = vst [vmem:[#allocation70_spill] sm:$0xff] %v9275_v24  ;;  %v7739_v25 = vld [vmem:[#allocation6 + $0x2c0] ss:$8 sps:$4 sm:$0xff]  }
 0x375   : > { %4149 = vmatpush1.bf16.msra.mxu1 %v9260_v34  ;;  %v7740_v34 = vld [vmem:[#allocation6 + $0x2d4] ss:$8 sps:$4 sm:$0xff]  }
 0x376   : > { %4150 = vmatprep.subr.bf16.mxu1 %v9264_v29  ;;  %v9281_v29 = vld [vmem:[#allocation6 + $0x670] ss:$8 sps:$4 sm:$0xff]  }
 0x377   : > { %4741 = vmatpush1.bf16.msra.mxu0 %v7737_v33  ;;  %10110 = vst [vmem:[#allocation72_spill] sm:$0xff] %v9281_v29  ;;  %v9284_v33 = vld [vmem:[#allocation6 + $0x684] ss:$8 sps:$4 sm:$0xff]  }
 0x378   : > { %4742 = vmatprep.subr.bf16.mxu0 %v7738_v19  ;;  %10111 = vst [vmem:[#allocation73_spill] sm:$0xff] %v9284_v33  ;;  %v7741_v19 = vld [vmem:[#allocation6 + $0x2d0] ss:$8 sps:$4 sm:$0xff]  }
 0x379   : > { %4151 = vmatpush1.bf16.msra.mxu1 %v9269_v63  ;;  %v7742_v63 = vld [vmem:[#allocation6 + $0x2e4] ss:$8 sps:$4 sm:$0xff]  }
 0x37a   : > { %4152 = vmatprep.subr.bf16.mxu1 %v9272_v21  ;;  %v9287_v21 = vld [vmem:[#allocation6 + $0x680] ss:$8 sps:$4 sm:$0xff]  }
 0x37b   : > { %4743 = vmatpush1.bf16.msra.mxu0 %v7739_v25  ;;  %10112 = vst [vmem:[#allocation74_spill] sm:$0xff] %v9287_v21  ;;  %v9290_v25 = vld [vmem:[#allocation6 + $0x694] ss:$8 sps:$4 sm:$0xff]  }
 0x37c   : > { %4744 = vmatprep.subr.bf16.mxu0 %v7740_v34  ;;  %10113 = vst [vmem:[#allocation75_spill] sm:$0xff] %v9290_v25  ;;  %v7743_v34 = vld [vmem:[#allocation6 + $0x2e0] ss:$8 sps:$4 sm:$0xff]  }
 0x37d   : > { %4153 = vmatpush1.bf16.msra.mxu1 %v9275_v24  ;;  %v7744_v24 = vld [vmem:[#allocation6 + $0x2f4] ss:$8 sps:$4 sm:$0xff]  }
 0x37e   : > { %4154 = vmatprep.subr.bf16.mxu1 %v9278_v8  ;;  %v9293_v8 = vld [vmem:[#allocation6 + $0x690] ss:$8 sps:$4 sm:$0xff]  }
 0x37f   : > { %4745 = vmatpush1.bf16.msra.mxu0 %v7741_v19  ;;  %10114 = vst [vmem:[#allocation76_spill] sm:$0xff] %v9293_v8  ;;  %v9296_v19 = vld [vmem:[#allocation6 + $0x6a4] ss:$8 sps:$4 sm:$0xff]  }
 0x380   : > { %4746 = vmatprep.subr.bf16.mxu0 %v7742_v63  ;;  %10115 = vst [vmem:[#allocation77_spill] sm:$0xff] %v9296_v19  ;;  %v7745_v63 = vld [vmem:[#allocation6 + $0x2f0] ss:$8 sps:$4 sm:$0xff]  }
 0x381   : > { %4155 = vmatpush1.bf16.msra.mxu1 %v9281_v29  ;;  %v7746_v29 = vld [vmem:[#allocation6 + $0x304] ss:$8 sps:$4 sm:$0xff]  }
 0x382   : > { %4156 = vmatprep.subr.bf16.mxu1 %v9284_v33  ;;  %v9299_v33 = vld [vmem:[#allocation6 + $0x6a0] ss:$8 sps:$4 sm:$0xff]  }
 0x383   : > { %4747 = vmatpush1.bf16.msra.mxu0 %v7743_v34  ;;  %10116 = vst [vmem:[#allocation78_spill] sm:$0xff] %v9299_v33  ;;  %v9302_v34 = vld [vmem:[#allocation6 + $0x6b4] ss:$8 sps:$4 sm:$0xff]  }
 0x384   : > { %4748 = vmatprep.subr.bf16.mxu0 %v7744_v24  ;;  %10117 = vst [vmem:[#allocation79_spill] sm:$0xff] %v9302_v34  ;;  %v7747_v24 = vld [vmem:[#allocation6 + $0x300] ss:$8 sps:$4 sm:$0xff]  }
 0x385   : > { %4157 = vmatpush1.bf16.msra.mxu1 %v9287_v21  ;;  %v7748_v21 = vld [vmem:[#allocation6 + $0x314] ss:$8 sps:$4 sm:$0xff]  }
 0x386   : > { %4158 = vmatprep.subr.bf16.mxu1 %v9290_v25  ;;  %v9305_v25 = vld [vmem:[#allocation6 + $0x6b0] ss:$8 sps:$4 sm:$0xff]  }
 0x387   : > { %4749 = vmatpush1.bf16.msra.mxu0 %v7745_v63  ;;  %10118 = vst [vmem:[#allocation80_spill] sm:$0xff] %v9305_v25  ;;  %v9308_v63 = vld [vmem:[#allocation6 + $0x6c4] ss:$8 sps:$4 sm:$0xff]  }
 0x388   : > { %4750 = vmatprep.subr.bf16.mxu0 %v7746_v29  ;;  %10119 = vst [vmem:[#allocation81_spill] sm:$0xff] %v9308_v63  ;;  %v7749_v29 = vld [vmem:[#allocation6 + $0x310] ss:$8 sps:$4 sm:$0xff]  }
 0x389   : > { %4159 = vmatpush1.bf16.msra.mxu1 %v9293_v8  ;;  %v7750_v8 = vld [vmem:[#allocation6 + $0x324] ss:$8 sps:$4 sm:$0xff]  }
 0x38a   : > { %4160 = vmatprep.subr.bf16.mxu1 %v9296_v19  ;;  %v9311_v19 = vld [vmem:[#allocation6 + $0x6c0] ss:$8 sps:$4 sm:$0xff]  }
 0x38b   : > { %4751 = vmatpush1.bf16.msra.mxu0 %v7747_v24  ;;  %10120 = vst [vmem:[#allocation82_spill] sm:$0xff] %v9311_v19  ;;  %v9314_v24 = vld [vmem:[#allocation6 + $0x6d4] ss:$8 sps:$4 sm:$0xff]  }
 0x38c   : > { %4752 = vmatprep.subr.bf16.mxu0 %v7748_v21  ;;  %10121 = vst [vmem:[#allocation83_spill] sm:$0xff] %v9314_v24  ;;  %v7751_v21 = vld [vmem:[#allocation6 + $0x320] ss:$8 sps:$4 sm:$0xff]  }
 0x38d   : > { %4161 = vmatpush1.bf16.msra.mxu1 %v9299_v33  ;;  %v7752_v33 = vld [vmem:[#allocation6 + $0x334] ss:$8 sps:$4 sm:$0xff]  }
 0x38e   : > { %4162 = vmatprep.subr.bf16.mxu1 %v9302_v34  ;;  %v9317_v34 = vld [vmem:[#allocation6 + $0x6d0] ss:$8 sps:$4 sm:$0xff]  }
 0x38f   : > { %4753 = vmatpush1.bf16.msra.mxu0 %v7749_v29  ;;  %10122 = vst [vmem:[#allocation84_spill] sm:$0xff] %v9317_v34  ;;  %v9320_v29 = vld [vmem:[#allocation6 + $0x6e4] ss:$8 sps:$4 sm:$0xff]  }
 0x390   : > { %4754 = vmatprep.subr.bf16.mxu0 %v7750_v8  ;;  %10123 = vst [vmem:[#allocation85_spill] sm:$0xff] %v9320_v29  ;;  %v7753_v8 = vld [vmem:[#allocation6 + $0x330] ss:$8 sps:$4 sm:$0xff]  }
 0x391   : > { %4163 = vmatpush1.bf16.msra.mxu1 %v9305_v25  ;;  %v7754_v25 = vld [vmem:[#allocation6 + $0x344] ss:$8 sps:$4 sm:$0xff]  }
 0x392   : > { %4164 = vmatprep.subr.bf16.mxu1 %v9308_v63  ;;  %v9323_v63 = vld [vmem:[#allocation6 + $0x6e0] ss:$8 sps:$4 sm:$0xff]  }
 0x393   : > { %4755 = vmatpush1.bf16.msra.mxu0 %v7751_v21  ;;  %10124 = vst [vmem:[#allocation86_spill] sm:$0xff] %v9323_v63  ;;  %v9326_v21 = vld [vmem:[#allocation6 + $0x6f4] ss:$8 sps:$4 sm:$0xff]  }
 0x394   : > { %4756 = vmatprep.subr.bf16.mxu0 %v7752_v33  ;;  %10125 = vst [vmem:[#allocation87_spill] sm:$0xff] %v9326_v21  ;;  %v7755_v33 = vld [vmem:[#allocation6 + $0x340] ss:$8 sps:$4 sm:$0xff]  }
 0x395   : > { %4165 = vmatpush1.bf16.msra.mxu1 %v9311_v19  ;;  %v7756_v19 = vld [vmem:[#allocation6 + $0x354] ss:$8 sps:$4 sm:$0xff]  }
 0x396   : > { %4166 = vmatprep.subr.bf16.mxu1 %v9314_v24  ;;  %v9331_v24 = vld [vmem:[#allocation6 + $0x6f0] ss:$8 sps:$4 sm:$0xff]  }
 0x397   : > { %4757 = vmatpush1.bf16.msra.mxu0 %v7753_v8  ;;  %10126 = vst [vmem:[#allocation88_spill] sm:$0xff] %v9331_v24 }
 0x398   : > { %4758 = vmatprep.subr.bf16.mxu0 %v7754_v25  ;;  %v9336_v25 = vld [vmem:[#allocation6 + $0x704] ss:$8 sps:$4 sm:$0xff]  }
 0x399   : > { %4167 = vmatpush1.bf16.msra.mxu1 %v9317_v34  ;;  %10127 = vst [vmem:[#allocation89_spill] sm:$0xff] %v9336_v25 }
 0x39a   : > { %4168 = vmatprep.subr.bf16.mxu1 %v9320_v29  ;;  %v7757_v29 = vld [vmem:[#allocation6 + $0x350] ss:$8 sps:$4 sm:$0xff]  }
 0x39b   : > { %4759 = vmatpush1.bf16.msra.mxu0 %v7755_v33  ;;  %v9342_v33 = vld [vmem:[#allocation6 + $0x714] ss:$8 sps:$4 sm:$0xff]  }
 0x39c   : > { %4760 = vmatprep.subr.bf16.mxu0 %v7756_v19  ;;  %v9339_v19 = vld [vmem:[#allocation6 + $0x700] ss:$8 sps:$4 sm:$0xff]   ;;  %10129 = vst [vmem:[#allocation91_spill] sm:$0xff] %v9342_v33 }
 0x39d   : > { %v9328_v4 = vpop.f32.mrb[16].mxu0  ;;  %4169 = vmatpush1.bf16.msra.mxu1 %v9323_v63  ;;  %10128 = vst [vmem:[#allocation90_spill] sm:$0xff] %v9339_v19  ;;  %v7759_v63 = vld [vmem:[#allocation6 + $0x360] ss:$8 sps:$4 sm:$0xff]  }
 0x39e   : > { %v9333_v8 = vpop.f32.mrb[17].mxu0  ;;  %4170 = vmatprep.subr.bf16.mxu1 %v9326_v21  ;;  %v7760_v21 = vld [vmem:[#allocation6 + $0x374] ss:$8 sps:$4 sm:$0xff]  }
 0x39f   : > { %v3550_v34 = vpop.f32.mrb[18].mxu0  ;;  %4761 = vmatpush1.bf16.msra.mxu0 %v7757_v29  ;;  %v7762_v29 = vld [vmem:[#allocation6 + $0x384] ss:$8 sps:$4 sm:$0xff]  }
 0x3a0   : > { %v3551_v2 = vpop.f32.mrb[19].mxu0  ;;  %4762 = vmatprep.subr.bf16.mxu0 %v7758_v53  ;;  %v9348_v53 = vld [vmem:[#allocation6 + $0x710] ss:$8 sps:$4 sm:$0xff]  }
 0x3a1   : > { %4171 = vmatpush1.bf16.msra.mxu1 %v9331_v24  ;;  %10130 = vst [vmem:[#allocation92_spill] sm:$0xff] %v9348_v53  ;;  %v9351_v2 = vld [vmem:[#allocation6 + $0x724] ss:$8 sps:$4 sm:$0xff]   ;;  %v7761_v34 = vld [vmem:[#allocation6 + $0x370] ss:$8 sps:$4 sm:$0xff]   ;;  %v10135_v24 = vld [vmem:[#allocation21_spill] sm:$0xff] }
 0x3a2   : > { %4356 = vmatprep.subr.bf16.mxu1 %v9336_v25  ;;  %10131 = vst [vmem:[#allocation93_spill] sm:$0xff] %v9351_v2  ;;  %v9359_v25 = vld [vmem:[#allocation6 + $0x734] ss:$8 sps:$4 sm:$0xff]  }
 0x3a3   : > { %4763 = vmatpush1.bf16.msra.mxu0 %v7759_v63  ;;  %v9969_v63 = vrot.slane %v8675_v11, 1 }
 0x3a4   : > { %4177 = vmatmul.mubr.bf16.vlgmr.msra.gmra.mrb[24].mxu1 %v9003_v44  ;;  %4764 = vmatprep.subr.bf16.mxu0 %v7760_v21  ;;  %v9355_v21 = vld [vmem:[#allocation6 + $0x720] ss:$8 sps:$4 sm:$0xff]  }
 0x3a5   : > { %4357 = vmatpush1.bf16.msra.mxu1 %v9339_v19  ;;  %6675 = vmatprep.mubr.msk.bf16.mxu1 %vm2652_vm5, %v10086_v47  ;;  %10132 = vst [vmem:[#allocation94_spill] sm:$0xff] %v9355_v21  ;;  %v10133_v19 = vld [vmem:[#allocation59_spill] sm:$0xff] }
 0x3a6   : > { %4358 = vmatprep.subr.bf16.mxu1 %v9342_v33  ;;  %10134 = vst [vmem:[#allocation59_spill] sm:$0xff] %v9359_v25  ;;  %v10139_v33 = vld [vmem:[#allocation25_spill] sm:$0xff] }
 0x3a7   : > { %4765 = vmatpush1.bf16.msra.mxu0 %v7761_v34  ;;  %v10136_v34 = vld [vmem:[#allocation23_spill] sm:$0xff] }
 0x3a8   : > { %4789 = vmatprep.subr.bf16.mxu0 %v7762_v29  ;;  %v9367_v29 = vld [vmem:[#allocation6 + $0x730] ss:$8 sps:$4 sm:$0xff]  }
 0x3a9   : > { %4359 = vmatpush1.bf16.msra.mxu1 %v9348_v53  ;;  %10137 = vst [vmem:[#allocation21_spill] sm:$0xff] %v9367_v29  ;;  %v9370_v53 = vld [vmem:[#allocation6 + $0x744] ss:$8 sps:$4 sm:$0xff]  }
 0x3aa   : > { %4771 = vmatmul.mubr.bf16.vlgmr.msra.gmra.mrb[20].mxu0 %v10133_v19  ;;  %4360 = vmatprep.subr.bf16.mxu1 %v9351_v2  ;;  %10138 = vst [vmem:[#allocation23_spill] sm:$0xff] %v9370_v53  ;;  %v10140_v2 = vld [vmem:[#allocation26_spill] sm:$0xff] }
 0x3ab   : > { %4790 = vmatpush1.bf16.msra.mxu0 %v10135_v24  ;;  %6710 = vmatprep.mubr.msk.bf16.mxu0 %vm2652_vm5, %v9969_v63  ;;  %v9375_v24 = vld [vmem:[#allocation6 + $0x740] ss:$8 sps:$4 sm:$0xff]   ;;  %v9378_v63 = vld [vmem:[#allocation6 + $0x754] ss:$8 sps:$4 sm:$0xff]  }
 0x3ac   : > { %4791 = vmatprep.subr.bf16.mxu0 %v10136_v34  ;;  %10141 = vst [vmem:[#allocation25_spill] sm:$0xff] %v9375_v24  ;;  %10142 = vst [vmem:[#allocation26_spill] sm:$0xff] %v9378_v63  ;;  %v10143_v34 = vld [vmem:[#allocation27_spill] sm:$0xff] }
 0x3ad   : > { %4361 = vmatpush1.bf16.msra.mxu1 %v9355_v21  ;;  %v10144_v21 = vld [vmem:[#allocation28_spill] sm:$0xff] }
 0x3ae   : > { %4362 = vmatprep.subr.bf16.mxu1 %v9359_v25  ;;  %v9383_v25 = vld [vmem:[#allocation6 + $0x750] ss:$8 sps:$4 sm:$0xff]  }
 0x3af   : > { %4792 = vmatpush1.bf16.msra.mxu0 %v10139_v33  ;;  %10145 = vst [vmem:[#allocation27_spill] sm:$0xff] %v9383_v25  ;;  %v9386_v33 = vld [vmem:[#allocation6 + $0x764] ss:$8 sps:$4 sm:$0xff]  }
 0x3b0   : > { %4793 = vmatprep.subr.bf16.mxu0 %v10140_v2  ;;  %10146 = vst [vmem:[#allocation28_spill] sm:$0xff] %v9386_v33  ;;  %v10147_v2 = vld [vmem:[#allocation29_spill] sm:$0xff] }
 0x3b1   : > { %4363 = vmatpush1.bf16.msra.mxu1 %v9367_v29  ;;  %v10148_v29 = vld [vmem:[#allocation30_spill] sm:$0xff] }
 0x3b2   : > { %4364 = vmatprep.subr.bf16.mxu1 %v9370_v53  ;;  %v9391_v53 = vld [vmem:[#allocation6 + $0x760] ss:$8 sps:$4 sm:$0xff]  }
 0x3b3   : > { %4794 = vmatpush1.bf16.msra.mxu0 %v10143_v34  ;;  %10149 = vst [vmem:[#allocation29_spill] sm:$0xff] %v9391_v53  ;;  %v9394_v34 = vld [vmem:[#allocation6 + $0x774] ss:$8 sps:$4 sm:$0xff]  }
 0x3b4   : > { %4795 = vmatprep.subr.bf16.mxu0 %v10144_v21  ;;  %10150 = vst [vmem:[#allocation30_spill] sm:$0xff] %v9394_v34  ;;  %v10151_v21 = vld [vmem:[#allocation31_spill] sm:$0xff] }
 0x3b5   : > { %4365 = vmatpush1.bf16.msra.mxu1 %v9375_v24  ;;  %v10152_v24 = vld [vmem:[#allocation32_spill] sm:$0xff] }
 0x3b6   : > { %4366 = vmatprep.subr.bf16.mxu1 %v9378_v63  ;;  %v9399_v63 = vld [vmem:[#allocation6 + $0x770] ss:$8 sps:$4 sm:$0xff]  }
 0x3b7   : > { %4796 = vmatpush1.bf16.msra.mxu0 %v10147_v2  ;;  %10153 = vst [vmem:[#allocation31_spill] sm:$0xff] %v9399_v63  ;;  %v9402_v2 = vld [vmem:[#allocation6 + $0x784] ss:$8 sps:$4 sm:$0xff]  }
 0x3b8   : > { %4797 = vmatprep.subr.bf16.mxu0 %v10148_v29  ;;  %10154 = vst [vmem:[#allocation32_spill] sm:$0xff] %v9402_v2  ;;  %v10155_v29 = vld [vmem:[#allocation33_spill] sm:$0xff] }
 0x3b9   : > { %4367 = vmatpush1.bf16.msra.mxu1 %v9383_v25  ;;  %v10156_v25 = vld [vmem:[#allocation34_spill] sm:$0xff] }
 0x3ba   : > { %4368 = vmatprep.subr.bf16.mxu1 %v9386_v33  ;;  %v9407_v33 = vld [vmem:[#allocation6 + $0x780] ss:$8 sps:$4 sm:$0xff]  }
 0x3bb   : > { %4798 = vmatpush1.bf16.msra.mxu0 %v10151_v21  ;;  %10157 = vst [vmem:[#allocation33_spill] sm:$0xff] %v9407_v33  ;;  %v9410_v21 = vld [vmem:[#allocation6 + $0x794] ss:$8 sps:$4 sm:$0xff]  }
 0x3bc   : > { %4799 = vmatprep.subr.bf16.mxu0 %v10152_v24  ;;  %10158 = vst [vmem:[#allocation34_spill] sm:$0xff] %v9410_v21  ;;  %v10159_v24 = vld [vmem:[#allocation35_spill] sm:$0xff] }
 0x3bd   : > { %4369 = vmatpush1.bf16.msra.mxu1 %v9391_v53  ;;  %v10160_v53 = vld [vmem:[#allocation36_spill] sm:$0xff] }
 0x3be   : > { %4370 = vmatprep.subr.bf16.mxu1 %v9394_v34  ;;  %v9415_v34 = vld [vmem:[#allocation6 + $0x790] ss:$8 sps:$4 sm:$0xff]  }
 0x3bf   : > { %4800 = vmatpush1.bf16.msra.mxu0 %v10155_v29  ;;  %10161 = vst [vmem:[#allocation35_spill] sm:$0xff] %v9415_v34  ;;  %v9418_v29 = vld [vmem:[#allocation6 + $0x7a4] ss:$8 sps:$4 sm:$0xff]  }
 0x3c0   : > { %4801 = vmatprep.subr.bf16.mxu0 %v10156_v25  ;;  %10162 = vst [vmem:[#allocation36_spill] sm:$0xff] %v9418_v29  ;;  %v10163_v25 = vld [vmem:[#allocation37_spill] sm:$0xff] }
 0x3c1   : > { %4371 = vmatpush1.bf16.msra.mxu1 %v9399_v63  ;;  %v10164_v63 = vld [vmem:[#allocation38_spill] sm:$0xff] }
 0x3c2   : > { %4372 = vmatprep.subr.bf16.mxu1 %v9402_v2  ;;  %v9423_v2 = vld [vmem:[#allocation6 + $0x7a0] ss:$8 sps:$4 sm:$0xff]  }
 0x3c3   : > { %4802 = vmatpush1.bf16.msra.mxu0 %v10159_v24  ;;  %10165 = vst [vmem:[#allocation37_spill] sm:$0xff] %v9423_v2  ;;  %v9426_v24 = vld [vmem:[#allocation6 + $0x7b4] ss:$8 sps:$4 sm:$0xff]  }
 0x3c4   : > { %4803 = vmatprep.subr.bf16.mxu0 %v10160_v53  ;;  %10166 = vst [vmem:[#allocation38_spill] sm:$0xff] %v9426_v24  ;;  %v10167_v53 = vld [vmem:[#allocation41_spill] sm:$0xff] }
 0x3c5   : > { %4373 = vmatpush1.bf16.msra.mxu1 %v9407_v33  ;;  %v10168_v33 = vld [vmem:[#allocation42_spill] sm:$0xff]  ;;  %10171 = vst [vmem:[#allocation41_spill] sm:$0xff] %v9448_v56 }
 0x3c6   : > { %4374 = vmatprep.subr.bf16.mxu1 %v9410_v21  ;;  %v9431_v21 = vld [vmem:[#allocation6 + $0x7b0] ss:$8 sps:$4 sm:$0xff]  }
 0x3c7   : > { %4804 = vmatpush1.bf16.msra.mxu0 %v10163_v25  ;;  %v9434_v25 = vld [vmem:[#allocation6 + $0x7c4] ss:$8 sps:$4 sm:$0xff]  }
 0x3c8   : > { %4805 = vmatprep.subr.bf16.mxu0 %v10164_v63 }
 0x3c9   : > { %4375 = vmatpush1.bf16.msra.mxu1 %v9415_v34  ;;  %v10169_v34 = vld [vmem:[#allocation45_spill] sm:$0xff] }
 0x3ca   : > { %4376 = vmatprep.subr.bf16.mxu1 %v9418_v29 }
 0x3cb   : > { %4806 = vmatpush1.bf16.msra.mxu0 %v10167_v53 }
 0x3cc   : > { %4807 = vmatprep.subr.bf16.mxu0 %v10168_v33 }
 0x3cd   : > { %4377 = vmatpush1.bf16.msra.mxu1 %v9423_v2  ;;  %v9445_v2 = vld [vmem:[#allocation6 + $0x7c0] ss:$8 sps:$4 sm:$0xff]  }
 0x3ce   : > { %4378 = vmatprep.subr.bf16.mxu1 %v9426_v24 }
 0x3cf   : > { %v3098_v63 = vpop.f32.mrb[20].mxu1  ;;  %4808 = vmatpush1.bf16.msra.mxu0 %v10169_v34  ;;  %v10172_v34 = vld [vmem:[#allocation49_spill] sm:$0xff] }
 0x3d0   : > { %v9438_v47 = vadd.f32 %v9328_v4, %v3098_v63  ;;  %v3100_v29 = vpop.f32.mrb[21].mxu1  ;;  %4809 = vmatprep.subr.bf16.mxu0 %v10170_v59  ;;  %v10173_v4 = vld [vmem:[#allocation50_spill] sm:$0xff]  ;;  %v9453_v59 = vld [vmem:[#allocation6 + $0x7d0] ss:$8 sps:$4 sm:$0xff]   ;;  %v10177_v63 = vld [vmem:[#allocation53_spill] sm:$0xff] }
 0x3d1   : > { %v9442_v53 = vadd.f32 %v9333_v8, %v3100_v29  ;;  %v3102_v33 = vpop.f32.mrb[22].mxu1  ;;  %4379 = vmatpush1.bf16.msra.mxu1 %v9431_v21  ;;  %10174 = vst [vmem:[#allocation42_spill] sm:$0xff] %v9453_v59  ;;  %v9456_v8 = vld [vmem:[#allocation6 + $0x7e4] ss:$8 sps:$4 sm:$0xff]   ;;  %v10176_v29 = vld [vmem:[#allocation52_spill] sm:$0xff] }
 0x3d2   : > { %v3103_v24 = vpop.f32.mrb[23].mxu1  ;;  %4380 = vmatprep.subr.bf16.mxu1 %v9434_v25  ;;  %10175 = vst [vmem:[#allocation45_spill] sm:$0xff] %v9456_v8  ;;  %v9464_v33 = vld [vmem:[#allocation6 + $0x7f4] ss:$8 sps:$4 sm:$0xff]  }
 0x3d3   : > { %4810 = vmatpush1.bf16.msra.mxu0 %v10172_v34  ;;  %v9461_v24 = vld [vmem:[#allocation6 + $0x7e0] ss:$8 sps:$4 sm:$0xff]   ;;  %10179 = vst [vmem:[#allocation49_spill] sm:$0xff] %v9464_v33 }
 0x3d4   : > { %4811 = vmatprep.subr.bf16.mxu0 %v10173_v4  ;;  %10178 = vst [vmem:[#allocation46_spill] sm:$0xff] %v9461_v24  ;;  %v10180_v34 = vld [vmem:[#allocation54_spill] sm:$0xff]  ;;  %v10181_v4 = vld [vmem:[#allocation55_spill] sm:$0xff] }
 0x3d5   : > { %4381 = vmatpush1.bf16.msra.mxu1 %v9445_v2 }
 0x3d6   : > { %4382 = vmatprep.subr.bf16.mxu1 %v9448_v56 }
 0x3d7   : > { %4812 = vmatpush1.bf16.msra.mxu0 %v10176_v29  ;;  %v9472_v29 = vld [vmem:[#allocation6 + $0x7f0] ss:$8 sps:$4 sm:$0xff]  }
 0x3d8   : > { %4813 = vmatprep.subr.bf16.mxu0 %v10177_v63  ;;  %10182 = vst [vmem:[#allocation50_spill] sm:$0xff] %v9472_v29  ;;  %v9475_v63 = vld [vmem:[#allocation6 + $0x804] ss:$8 sps:$4 sm:$0xff]  }
 0x3d9   : > { %4383 = vmatpush1.bf16.msra.mxu1 %v9453_v59  ;;  %v10184_v59 = vld [vmem:[#allocation19_spill] sm:$0xff] }
 0x3da   : > { %4568 = vmatprep.subr.bf16.mxu1 %v9456_v8  ;;  %v10183_v8 = vld [vmem:[#allocation58_spill] sm:$0xff]  ;;  %v9998_v56 = vrot.slane %v10184_v59, 1  ;;  %v9498_v59 = vld [vmem:[#allocation6 + $0x834] ss:$8 sps:$4 sm:$0xff]  }
 0x3db   : > { %4814 = vmatpush1.bf16.msra.mxu0 %v10180_v34  ;;  %v10185_v34 = vmov 0   ;;  %10191 = vst [vmem:[#allocation95_spill] sm:$0xff] %v9498_v59 }
 0x3dc   : > { %4389 = vmatmul.mubr.bf16.vlgmr.msra.gmra.mrb[24].mxu1 %v10103_v27  ;;  %4815 = vmatprep.subr.bf16.mxu0 %v10181_v4  ;;  %v9481_v4 = vld [vmem:[#allocation6 + $0x800] ss:$8 sps:$4 sm:$0xff]  }
 0x3dd   : > { %4569 = vmatpush1.bf16.msra.mxu1 %v9461_v24  ;;  %6704 = vmatprep.mubr.msk.bf16.mxu1 %vm2652_vm5, %v10105_v10  ;;  %10186 = vst [vmem:[#allocation52_spill] sm:$0xff] %v9481_v4  ;;  %v9486_v24 = vld [vmem:[#allocation6 + $0x814] ss:$8 sps:$4 sm:$0xff]  }
 0x3de   : > { %4570 = vmatprep.subr.bf16.mxu1 %v9464_v33  ;;  %10187 = vst [vmem:[#allocation53_spill] sm:$0xff] %v9486_v24  ;;  %v9489_v33 = vld [vmem:[#allocation6 + $0x810] ss:$8 sps:$4 sm:$0xff]  }
 0x3df   : > { %4816 = vmatpush1.bf16.msra.mxu0 %v10183_v8  ;;  %10188 = vst [vmem:[#allocation54_spill] sm:$0xff] %v9489_v33  ;;  %v9492_v8 = vld [vmem:[#allocation6 + $0x824] ss:$8 sps:$4 sm:$0xff]  }
 0x3e0   : > { %5181 = vmatprep.subr.bf16.mxu0 %v10185_v34  ;;  %10189 = vst [vmem:[#allocation55_spill] sm:$0xff] %v9492_v8 }
 0x3e1   : > { %4571 = vmatpush1.bf16.msra.mxu1 %v9472_v29  ;;  %v9495_v29 = vld [vmem:[#allocation6 + $0x820] ss:$8 sps:$4 sm:$0xff]  }
 0x3e2   : > { %4822 = vmatmul.mubr.bf16.vlgmr.msra.gmra.mrb[20].mxu0 %v9998_v56  ;;  %4572 = vmatprep.subr.bf16.mxu1 %v9475_v63  ;;  %10190 = vst [vmem:[#allocation58_spill] sm:$0xff] %v9495_v29  ;;  %v9501_v56 = vld [vmem:[#allocation6 + $0x830] ss:$8 sps:$4 sm:$0xff]  }
 0x3e3   : > { %10192 = vst [vmem:[#allocation96_spill] sm:$0xff] %v9501_v56 }
 0x3e5   : > { %4573 = vmatpush1.bf16.msra.mxu1 %v9481_v4  ;;  %v9504_v4 = vld [vmem:[#allocation6 + $0x844] ss:$8 sps:$4 sm:$0xff]  }
 0x3e6   : > { %4574 = vmatprep.subr.bf16.mxu1 %v9486_v24  ;;  %10193 = vst [vmem:[#allocation97_spill] sm:$0xff] %v9504_v4  ;;  %v9507_v24 = vld [vmem:[#allocation6 + $0x840] ss:$8 sps:$4 sm:$0xff]  }
 0x3e7   : > { %10194 = vst [vmem:[#allocation98_spill] sm:$0xff] %v9507_v24 }
 0x3e9   : > { %4575 = vmatpush1.bf16.msra.mxu1 %v9489_v33  ;;  %v9510_v33 = vld [vmem:[#allocation6 + $0x854] ss:$8 sps:$4 sm:$0xff]  }
 0x3ea   : > { %4576 = vmatprep.subr.bf16.mxu1 %v9492_v8  ;;  %10195 = vst [vmem:[#allocation99_spill] sm:$0xff] %v9510_v33  ;;  %v9513_v8 = vld [vmem:[#allocation6 + $0x850] ss:$8 sps:$4 sm:$0xff]  }
 0x3eb   : > { %10196 = vst [vmem:[#allocation100_spill] sm:$0xff] %v9513_v8 }
 0x3ed   : > { %4577 = vmatpush1.bf16.msra.mxu1 %v9495_v29  ;;  %v9516_v29 = vld [vmem:[#allocation6 + $0x864] ss:$8 sps:$4 sm:$0xff]  }
 0x3ee   : > { %4578 = vmatprep.subr.bf16.mxu1 %v9498_v59  ;;  %10197 = vst [vmem:[#allocation101_spill] sm:$0xff] %v9516_v29  ;;  %v9519_v59 = vld [vmem:[#allocation6 + $0x860] ss:$8 sps:$4 sm:$0xff]  }
 0x3ef   : > { %10198 = vst [vmem:[#allocation102_spill] sm:$0xff] %v9519_v59 }
 0x3f1   : > { %4579 = vmatpush1.bf16.msra.mxu1 %v9501_v56  ;;  %v9522_v56 = vld [vmem:[#allocation6 + $0x874] ss:$8 sps:$4 sm:$0xff]  }
 0x3f2   : > { %4580 = vmatprep.subr.bf16.mxu1 %v9504_v4  ;;  %10199 = vst [vmem:[#allocation103_spill] sm:$0xff] %v9522_v56  ;;  %v9525_v4 = vld [vmem:[#allocation6 + $0x870] ss:$8 sps:$4 sm:$0xff]  }
 0x3f3   : > { %10200 = vst [vmem:[#allocation104_spill] sm:$0xff] %v9525_v4 }
 0x3f5   : > { %4581 = vmatpush1.bf16.msra.mxu1 %v9507_v24  ;;  %v9528_v24 = vld [vmem:[#allocation6 + $0x884] ss:$8 sps:$4 sm:$0xff]  }
 0x3f6   : > { %4582 = vmatprep.subr.bf16.mxu1 %v9510_v33  ;;  %10201 = vst [vmem:[#allocation105_spill] sm:$0xff] %v9528_v24  ;;  %v9531_v33 = vld [vmem:[#allocation6 + $0x880] ss:$8 sps:$4 sm:$0xff]  }
 0x3f9   : > { %4583 = vmatpush1.bf16.msra.mxu1 %v9513_v8  ;;  %v9534_v8 = vld [vmem:[#allocation6 + $0x894] ss:$8 sps:$4 sm:$0xff]  }
 0x3fa   : > { %4584 = vmatprep.subr.bf16.mxu1 %v9516_v29  ;;  %v9537_v29 = vld [vmem:[#allocation6 + $0x890] ss:$8 sps:$4 sm:$0xff]  }
 0x3fd   : > { %4585 = vmatpush1.bf16.msra.mxu1 %v9519_v59  ;;  %v9540_v59 = vld [vmem:[#allocation6 + $0x8a4] ss:$8 sps:$4 sm:$0xff]  }
 0x3fe   : > { %4586 = vmatprep.subr.bf16.mxu1 %v9522_v56  ;;  %v9543_v56 = vld [vmem:[#allocation6 + $0x8a0] ss:$8 sps:$4 sm:$0xff]  }
 0x401   : > { %4587 = vmatpush1.bf16.msra.mxu1 %v9525_v4  ;;  %v9546_v4 = vld [vmem:[#allocation6 + $0x8b4] ss:$8 sps:$4 sm:$0xff]  }
 0x402   : > { %4588 = vmatprep.subr.bf16.mxu1 %v9528_v24  ;;  %v9549_v24 = vld [vmem:[#allocation6 + $0x8b0] ss:$8 sps:$4 sm:$0xff]  }
 0x405   : > { %4589 = vmatpush1.bf16.msra.mxu1 %v9531_v33 }
 0x406   : > { %4590 = vmatprep.subr.bf16.mxu1 %v9534_v8 }
 0x409   : > { %4591 = vmatpush1.bf16.msra.mxu1 %v9537_v29 }
 0x40a   : > { %4592 = vmatprep.subr.bf16.mxu1 %v9540_v59 }
 0x40d   : > { %4593 = vmatpush1.bf16.msra.mxu1 %v9543_v56 }
 0x40e   : > { %4594 = vmatprep.subr.bf16.mxu1 %v9546_v4 }
 0x411   : > { %4595 = vmatpush1.bf16.msra.mxu1 %v9549_v24 }
 0x412   : > { %4834 = vmatprep.subr.bf16.mxu1 %v8995_v40  ;;  %v10203_v40 = vld [vmem:[#allocation61_spill] sm:$0xff] }
 0x414   : > { %4601 = vmatmul.mubr.bf16.vlgmr.msra.gmra.mrb[24].mxu1 %v10133_v19 }
 0x415   : > { %4835 = vmatpush1.bf16.msra.mxu1 %v9001_v41  ;;  %6711 = vmatprep.mubr.msk.bf16.mxu1 %vm2652_vm5, %v10099_v30  ;;  %v10204_v41 = vld [vmem:[#allocation62_spill] sm:$0xff]  ;;  %v10242_v30 = vld [vmem:[#allocation87_spill] sm:$0xff] }
 0x416   : > { %4836 = vmatprep.subr.bf16.mxu1 %v9006_v58  ;;  %v10202_v58 = vld [vmem:[#allocation60_spill] sm:$0xff] }
 0x419   : > { %4837 = vmatpush1.bf16.msra.mxu1 %v9014_v45  ;;  %v10205_v45 = vld [vmem:[#allocation39_spill] sm:$0xff] }
 0x41a   : > { %4838 = vmatprep.subr.bf16.mxu1 %v9017_v48  ;;  %v10207_v48 = vld [vmem:[#allocation43_spill] sm:$0xff] }
 0x41d   : > { %4839 = vmatpush1.bf16.msra.mxu1 %v9022_v49  ;;  %v10208_v49 = vld [vmem:[#allocation44_spill] sm:$0xff] }
 0x41e   : > { %4840 = vmatprep.subr.bf16.mxu1 %v9026_v60  ;;  %v10209_v60 = vld [vmem:[#allocation47_spill] sm:$0xff] }
 0x421   : > { %4841 = vmatpush1.bf16.msra.mxu1 %v9033_v62  ;;  %v10210_v62 = vld [vmem:[#allocation48_spill] sm:$0xff] }
 0x422   : > { %4842 = vmatprep.subr.bf16.mxu1 %v9036_v5  ;;  %v10211_v5 = vld [vmem:[#allocation51_spill] sm:$0xff] }
 0x425   : > { %4843 = vmatpush1.bf16.msra.mxu1 %v9041_v52  ;;  %v10212_v52 = vld [vmem:[#allocation63_spill] sm:$0xff] }
 0x426   : > { %4844 = vmatprep.subr.bf16.mxu1 %v9044_v1  ;;  %v10213_v1 = vld [vmem:[#allocation64_spill] sm:$0xff] }
 0x429   : > { %4845 = vmatpush1.bf16.msra.mxu1 %v9049_v12  ;;  %v10214_v12 = vld [vmem:[#allocation65_spill] sm:$0xff] }
 0x42a   : > { %4846 = vmatprep.subr.bf16.mxu1 %v9052_v18  ;;  %v10215_v18 = vld [vmem:[#allocation18_spill] sm:$0xff] }
 0x42d   : > { %4847 = vmatpush1.bf16.msra.mxu1 %v9057_v26  ;;  %v10216_v26 = vld [vmem:[#allocation66_spill] sm:$0xff] }
 0x42e   : > { %4848 = vmatprep.subr.bf16.mxu1 %v9060_v20  ;;  %v10217_v20 = vld [vmem:[#allocation20_spill] sm:$0xff] }
 0x431   : > { %4849 = vmatpush1.bf16.msra.mxu1 %v9065_v39  ;;  %v10218_v39 = vld [vmem:[#allocation67_spill] sm:$0xff] }
 0x432   : > { %4850 = vmatprep.subr.bf16.mxu1 %v9068_v51  ;;  %v10219_v51 = vld [vmem:[#allocation56_spill] sm:$0xff] }
 0x435   : > { %4851 = vmatpush1.bf16.msra.mxu1 %v9073_v50  ;;  %v10220_v50 = vld [vmem:[#allocation57_spill] sm:$0xff] }
 0x436   : > { %4852 = vmatprep.subr.bf16.mxu1 %v9076_v14  ;;  %v10221_v14 = vld [vmem:[#allocation68_spill] sm:$0xff] }
 0x439   : > { %4853 = vmatpush1.bf16.msra.mxu1 %v9081_v16  ;;  %v10222_v16 = vld [vmem:[#allocation22_spill] sm:$0xff] }
 0x43a   : > { %4854 = vmatprep.subr.bf16.mxu1 %v9084_v23  ;;  %v10223_v23 = vld [vmem:[#allocation24_spill] sm:$0xff] }
 0x43d   : > { %4855 = vmatpush1.bf16.msra.mxu1 %v9089_v46  ;;  %v10224_v46 = vld [vmem:[#allocation69_spill] sm:$0xff] }
 0x43e   : > { %4856 = vmatprep.subr.bf16.mxu1 %v10202_v58  ;;  %v7598_v58 = vld [vmem:[#allocation9 + $0x18] sm:$0xff]  }
 0x441   : > { %4857 = vmatpush1.bf16.msra.mxu1 %v10203_v40 }
 0x442   : > { %4858 = vmatprep.subr.bf16.mxu1 %v10204_v41 }
 0x445   : > { %4859 = vmatpush1.bf16.msra.mxu1 %v10205_v45  ;;  %v10243_v45 = vld [vmem:[#allocation88_spill] sm:$0xff] }
 0x446   : > { %4860 = vmatprep.subr.bf16.mxu1 %v9108_v6  ;;  %v10228_v6 = vld [vmem:[#allocation73_spill] sm:$0xff] }
 0x449   : > { %4861 = vmatpush1.bf16.msra.mxu1 %v9113_v43  ;;  %v10225_v43 = vld [vmem:[#allocation70_spill] sm:$0xff] }
 0x44a   : > { %4875 = vmatprep.subr.bf16.mxu1 %v9116_v13  ;;  %v10229_v13 = vld [vmem:[#allocation74_spill] sm:$0xff] }
 0x44c   : > { %4867 = vmatmul.mubr.bf16.vlgmr.msra.gmra.mrb[28].mxu1 %v9003_v44  ;;  %v10206_v44 = vld [vmem:[#allocation40_spill] sm:$0xff] }
 0x44d   : > { %4876 = vmatpush1.bf16.msra.mxu1 %v9121_v22  ;;  %6712 = vmatprep.mubr.msk.bf16.mxu1 %vm2652_vm5, %v8675_v11  ;;  %v10226_v22 = vld [vmem:[#allocation71_spill] sm:$0xff] }
 0x44e   : > { %4877 = vmatprep.subr.bf16.mxu1 %v9124_v35  ;;  %v10230_v35 = vld [vmem:[#allocation75_spill] sm:$0xff] }
 0x451   : > { %4878 = vmatpush1.bf16.msra.mxu1 %v9133_v61  ;;  %v10231_v61 = vld [vmem:[#allocation76_spill] sm:$0xff] }
 0x452   : > { %4879 = vmatprep.subr.bf16.mxu1 %v9136_v57  ;;  %v10232_v57 = vld [vmem:[#allocation77_spill] sm:$0xff] }
 0x455   : > { %4880 = vmatpush1.bf16.msra.mxu1 %v9141_v37  ;;  %v10233_v37 = vld [vmem:[#allocation78_spill] sm:$0xff] }
 0x456   : > { %4881 = vmatprep.subr.bf16.mxu1 %v9146_v15  ;;  %v10234_v15 = vld [vmem:[#allocation79_spill] sm:$0xff] }
 0x459   : > { %4882 = vmatpush1.bf16.msra.mxu1 %v9153_v9  ;;  %v10235_v9 = vld [vmem:[#allocation80_spill] sm:$0xff] }
 0x45a   : > { %4883 = vmatprep.subr.bf16.mxu1 %v9156_v38  ;;  %v10236_v38 = vld [vmem:[#allocation81_spill] sm:$0xff] }
 0x45d   : > { %4884 = vmatpush1.bf16.msra.mxu1 %v9161_v3  ;;  %v7595_v3 = vld [vmem:[#allocation9] sm:$0xff]  }
 0x45e   : > { %4885 = vmatprep.subr.bf16.mxu1 %v9164_v36  ;;  %v10227_v36 = vld [vmem:[#allocation72_spill] sm:$0xff]  ;;  %5182 = vmatpush1.bf16.msra.mxu0 %v7595_v3 }
 0x45f   : > { %5183 = vmatprep.subr.bf16.mxu0 %v10185_v34 }
 0x461   : > { %4886 = vmatpush1.bf16.msra.mxu1 %v9169_v17  ;;  %v10237_v17 = vld [vmem:[#allocation82_spill] sm:$0xff] }
 0x462   : > { %4887 = vmatprep.subr.bf16.mxu1 %v9172_v32  ;;  %v10238_v32 = vld [vmem:[#allocation83_spill] sm:$0xff] }
 0x465   : > { %4888 = vmatpush1.bf16.msra.mxu1 %v9177_v31  ;;  %v7596_v31 = vld [vmem:[#allocation9 + $0x8] sm:$0xff]  }
 0x466   : > { %4889 = vmatprep.subr.bf16.mxu1 %v9180_v0  ;;  %v10239_v0 = vld [vmem:[#allocation84_spill] sm:$0xff]  ;;  %5184 = vmatpush1.bf16.msra.mxu0 %v7596_v31 }
 0x467   : > { %5185 = vmatprep.subr.bf16.mxu0 %v10185_v34 }
 0x469   : > { %4890 = vmatpush1.bf16.msra.mxu1 %v9185_v28  ;;  %v10240_v28 = vld [vmem:[#allocation85_spill] sm:$0xff] }
 0x46a   : > { %4891 = vmatprep.subr.bf16.mxu1 %v9188_v55  ;;  %v7597_v55 = vld [vmem:[#allocation9 + $0x10] sm:$0xff]  }
 0x46b   : > { %5186 = vmatpush1.bf16.msra.mxu0 %v7597_v55  ;;  %v10267_v55 = vld [vmem:[#allocation41_spill] sm:$0xff] }
 0x46c   : > { %5187 = vmatprep.subr.bf16.mxu0 %v10185_v34 }
 0x46d   : > { %4892 = vmatpush1.bf16.msra.mxu1 %v9193_v7 }
 0x46e   : > { %4893 = vmatprep.subr.bf16.mxu1 %v9196_v54  ;;  %v10241_v54 = vld [vmem:[#allocation86_spill] sm:$0xff] }
 0x46f   : > { %5188 = vmatpush1.bf16.msra.mxu0 %v7598_v58  ;;  %v10277_v58 = vld [vmem:[#allocation55_spill] sm:$0xff] }
 0x470   : > { %5189 = vmatprep.subr.bf16.mxu0 %v10185_v34 }
 0x471   : > { %4894 = vmatpush1.bf16.msra.mxu1 %v9201_v42 }
 0x472   : > { %4895 = vmatprep.subr.bf16.mxu1 %v10206_v44  ;;  %v10244_v44 = vld [vmem:[#allocation89_spill] sm:$0xff] }
 0x475   : > { %4896 = vmatpush1.bf16.msra.mxu1 %v10207_v48  ;;  %v7599_v48 = vld [vmem:[#allocation9 + $0x20] sm:$0xff]  }
 0x476   : > { %4897 = vmatprep.subr.bf16.mxu1 %v10208_v49  ;;  %v10245_v49 = vld [vmem:[#allocation90_spill] sm:$0xff]  ;;  %5190 = vmatpush1.bf16.msra.mxu0 %v7599_v48  ;;  %v10285_v48 = vld [vmem:[#allocation101_spill] sm:$0xff] }
 0x477   : > { %5191 = vmatprep.subr.bf16.mxu0 %v10185_v34 }
 0x479   : > { %4898 = vmatpush1.bf16.msra.mxu1 %v10209_v60  ;;  %v10246_v60 = vld [vmem:[#allocation91_spill] sm:$0xff] }
 0x47a   : > { %4899 = vmatprep.subr.bf16.mxu1 %v10210_v62  ;;  %v7600_v62 = vld [vmem:[#allocation9 + $0x28] sm:$0xff]  }
 0x47b   : > { %5192 = vmatpush1.bf16.msra.mxu0 %v7600_v62  ;;  %v10288_v62 = vld [vmem:[#allocation104_spill] sm:$0xff] }
 0x47c   : > { %5193 = vmatprep.subr.bf16.mxu0 %v10185_v34 }
 0x47d   : > { %4900 = vmatpush1.bf16.msra.mxu1 %v10211_v5  ;;  %v10247_v5 = vld [vmem:[#allocation92_spill] sm:$0xff] }
 0x47e   : > { %4901 = vmatprep.subr.bf16.mxu1 %v10212_v52  ;;  %v10248_v52 = vld [vmem:[#allocation93_spill] sm:$0xff] }
 0x481   : > { %4902 = vmatpush1.bf16.msra.mxu1 %v10213_v1  ;;  %v7601_v1 = vld [vmem:[#allocation9 + $0x30] sm:$0xff]  }
 0x482   : > { %4916 = vmatprep.subr.bf16.mxu1 %v10214_v12  ;;  %v10250_v12 = vld [vmem:[#allocation59_spill] sm:$0xff]  ;;  %5194 = vmatpush1.bf16.msra.mxu0 %v7601_v1 }
 0x483   : > { %5195 = vmatprep.subr.bf16.mxu0 %v10185_v34 }
 0x484   : > { %6713 = vmatmul.mubr.msk.bf16.vlgmr.msra.gmra.mrb[28].mxu1 %vm2425_vm4, %v10215_v18  ;;  %v10251_v18 = vld [vmem:[#allocation21_spill] sm:$0xff] }
 0x485   : > { %4917 = vmatpush1.bf16.msra.mxu1 %v10216_v26  ;;  %6714 = vmatprep.mubr.msk.bf16.mxu1 %vm2652_vm5, %v10217_v20  ;;  %v10252_v26 = vld [vmem:[#allocation23_spill] sm:$0xff]  ;;  %v7603_v20 = vld [vmem:[#allocation9 + $0x40] sm:$0xff]  }
 0x486   : > { %4918 = vmatprep.subr.bf16.mxu1 %v10218_v39  ;;  %v10253_v39 = vld [vmem:[#allocation25_spill] sm:$0xff] }
 0x489   : > { %4919 = vmatpush1.bf16.msra.mxu1 %v10219_v51  ;;  %v10254_v51 = vld [vmem:[#allocation26_spill] sm:$0xff] }
 0x48a   : > { %4920 = vmatprep.subr.bf16.mxu1 %v10220_v50  ;;  %v7604_v50 = vld [vmem:[#allocation9 + $0x48] sm:$0xff]  }
 0x48d   : > { %4921 = vmatpush1.bf16.msra.mxu1 %v10221_v14  ;;  %v10255_v14 = vld [vmem:[#allocation27_spill] sm:$0xff] }
 0x48e   : > { %4922 = vmatprep.subr.bf16.mxu1 %v10222_v16  ;;  %v10256_v16 = vld [vmem:[#allocation28_spill] sm:$0xff] }
 0x491   : > { %4923 = vmatpush1.bf16.msra.mxu1 %v10223_v23  ;;  %v7605_v23 = vld [vmem:[#allocation9 + $0x50] sm:$0xff]  }
 0x492   : > { %4924 = vmatprep.subr.bf16.mxu1 %v10224_v46  ;;  %v10257_v46 = vld [vmem:[#allocation29_spill] sm:$0xff] }
 0x495   : > { %4925 = vmatpush1.bf16.msra.mxu1 %v10225_v43  ;;  %v10258_v43 = vld [vmem:[#allocation30_spill] sm:$0xff] }
 0x496   : > { %4926 = vmatprep.subr.bf16.mxu1 %v10226_v22  ;;  %v7606_v22 = vld [vmem:[#allocation9 + $0x58] sm:$0xff]  }
 0x499   : > { %4927 = vmatpush1.bf16.msra.mxu1 %v10227_v36  ;;  %v10259_v36 = vld [vmem:[#allocation31_spill] sm:$0xff] }
 0x49a   : > { %4928 = vmatprep.subr.bf16.mxu1 %v10228_v6  ;;  %v10260_v6 = vld [vmem:[#allocation32_spill] sm:$0xff] }
 0x49d   : > { %4929 = vmatpush1.bf16.msra.mxu1 %v10229_v13  ;;  %v10261_v13 = vld [vmem:[#allocation33_spill] sm:$0xff] }
 0x49e   : > { %4930 = vmatprep.subr.bf16.mxu1 %v10230_v35  ;;  %v10262_v35 = vld [vmem:[#allocation34_spill] sm:$0xff] }
 0x4a1   : > { %4931 = vmatpush1.bf16.msra.mxu1 %v10231_v61  ;;  %v10263_v61 = vld [vmem:[#allocation35_spill] sm:$0xff] }
 0x4a2   : > { %4932 = vmatprep.subr.bf16.mxu1 %v10232_v57  ;;  %v10264_v57 = vld [vmem:[#allocation36_spill] sm:$0xff] }
 0x4a5   : > { %4933 = vmatpush1.bf16.msra.mxu1 %v10233_v37  ;;  %v10265_v37 = vld [vmem:[#allocation37_spill] sm:$0xff] }
 0x4a6   : > { %4934 = vmatprep.subr.bf16.mxu1 %v10234_v15  ;;  %v10266_v15 = vld [vmem:[#allocation38_spill] sm:$0xff] }
 0x4a9   : > { %4935 = vmatpush1.bf16.msra.mxu1 %v10235_v9 }
 0x4aa   : > { %4936 = vmatprep.subr.bf16.mxu1 %v10236_v38 }
 0x4ad   : > { %4937 = vmatpush1.bf16.msra.mxu1 %v10237_v17 }
 0x4ae   : > { %4938 = vmatprep.subr.bf16.mxu1 %v10238_v32 }
 0x4b1   : > { %4939 = vmatpush1.bf16.msra.mxu1 %v10239_v0 }
 0x4b2   : > { %4940 = vmatprep.subr.bf16.mxu1 %v10240_v28 }
 0x4b5   : > { %v9646_v7 = vpop.f32.mrb[20].mxu0  ;;  %4941 = vmatpush1.bf16.msra.mxu1 %v10241_v54  ;;  %v10268_v54 = vld [vmem:[#allocation42_spill] sm:$0xff] }
 0x4b6   : > { %v9649_v42 = vpop.f32.mrb[21].mxu0  ;;  %4942 = vmatprep.subr.bf16.mxu1 %v10242_v30  ;;  %v10276_v30 = vld [vmem:[#allocation54_spill] sm:$0xff] }
 0x4b7   : > { %v4827_v40 = vpop.f32.mrb[22].mxu0 }
 0x4b8   : > { %v4828_v41 = vpop.f32.mrb[23].mxu0  ;;  %v10279_v40 = vld [vmem:[#allocation95_spill] sm:$0xff] }
 0x4b9   : > { %4943 = vmatpush1.bf16.msra.mxu1 %v10243_v45  ;;  %v10281_v41 = vld [vmem:[#allocation97_spill] sm:$0xff]  ;;  %v10282_v45 = vld [vmem:[#allocation98_spill] sm:$0xff] }
 0x4ba   : > { %4959 = vmatprep.subr.bf16.mxu1 %v10244_v44  ;;  %v10283_v44 = vld [vmem:[#allocation99_spill] sm:$0xff] }
 0x4bc   : > { %4949 = vmatmul.mubr.bf16.vlgmr.msra.gmra.mrb[28].mxu1 %v10103_v27  ;;  %v10249_v27 = vld [vmem:[#allocation94_spill] sm:$0xff] }
 0x4bd   : > { %4960 = vmatpush1.bf16.msra.mxu1 %v10245_v49  ;;  %6715 = vmatprep.mubr.msk.bf16.mxu1 %vm2652_vm5, %v10105_v10  ;;  %v7602_v10 = vld [vmem:[#allocation9 + $0x38] sm:$0xff]   ;;  %v10286_v49 = vld [vmem:[#allocation102_spill] sm:$0xff] }
 0x4be   : > { %4961 = vmatprep.subr.bf16.mxu1 %v10246_v60  ;;  %5196 = vmatpush1.bf16.msra.mxu0 %v7602_v10  ;;  %v10287_v60 = vld [vmem:[#allocation103_spill] sm:$0xff] }
 0x4bf   : > { %5197 = vmatprep.subr.bf16.mxu0 %v10185_v34 }
 0x4c1   : > { %4962 = vmatpush1.bf16.msra.mxu1 %v10247_v5  ;;  %v10289_v5 = vld [vmem:[#allocation105_spill] sm:$0xff] }
 0x4c2   : > { %4963 = vmatprep.subr.bf16.mxu1 %v10248_v52  ;;  %5198 = vmatpush1.bf16.msra.mxu0 %v7603_v20  ;;  %v10290_v52 = vld [vmem:[#allocation19_spill] sm:$0xff] }
 0x4c3   : > { %5199 = vmatprep.subr.bf16.mxu0 %v10185_v34  ;;  %v10291_v1 = vrot.slane %v10290_v52, 1  ;;  %v7645_v52 = vld [vmem:[#allocation9 + $0x190] sm:$0xff]  }
 0x4c5   : > { %4964 = vmatpush1.bf16.msra.mxu1 %v10249_v27  ;;  %v7607_v27 = vld [vmem:[#allocation9 + $0x60] sm:$0xff]  }
 0x4c6   : > { %4965 = vmatprep.subr.bf16.mxu1 %v10250_v12  ;;  %5200 = vmatpush1.bf16.msra.mxu0 %v7604_v50 }
 0x4c7   : > { %5201 = vmatprep.subr.bf16.mxu0 %v10185_v34 }
 0x4c9   : > { %4966 = vmatpush1.bf16.msra.mxu1 %v10251_v18 }
 0x4ca   : > { %4967 = vmatprep.subr.bf16.mxu1 %v10252_v26  ;;  %5202 = vmatpush1.bf16.msra.mxu0 %v7605_v23 }
 0x4cb   : > { %5203 = vmatprep.subr.bf16.mxu0 %v10185_v34 }
 0x4cd   : > { %4968 = vmatpush1.bf16.msra.mxu1 %v10253_v39 }
 0x4ce   : > { %4969 = vmatprep.subr.bf16.mxu1 %v10254_v51  ;;  %5204 = vmatpush1.bf16.msra.mxu0 %v7606_v22 }
 0x4cf   : > { %5205 = vmatprep.subr.bf16.mxu0 %v10185_v34 }
 0x4d1   : > { %4970 = vmatpush1.bf16.msra.mxu1 %v10255_v14 }
 0x4d2   : > { %4971 = vmatprep.subr.bf16.mxu1 %v10256_v16  ;;  %5206 = vmatpush1.bf16.msra.mxu0 %v7607_v27  ;;  %v7647_v27 = vld [vmem:[#allocation9 + $0x1a0] sm:$0xff]  }
 0x4d3   : > { %5207 = vmatprep.subr.bf16.mxu0 %v10185_v34 }
 0x4d5   : > { %4972 = vmatpush1.bf16.msra.mxu1 %v10257_v46  ;;  %v7609_v46 = vld [vmem:[#allocation9 + $0x70] sm:$0xff]  }
 0x4d6   : > { %4973 = vmatprep.subr.bf16.mxu1 %v10258_v43 }
 0x4d9   : > { %4974 = vmatpush1.bf16.msra.mxu1 %v10259_v36  ;;  %v7610_v36 = vld [vmem:[#allocation9 + $0x78] sm:$0xff]  }
 0x4da   : > { %4975 = vmatprep.subr.bf16.mxu1 %v10260_v6  ;;  %v7611_v6 = vld [vmem:[#allocation9 + $0x80] sm:$0xff]  }
 0x4dd   : > { %4976 = vmatpush1.bf16.msra.mxu1 %v10261_v13  ;;  %v7612_v13 = vld [vmem:[#allocation9 + $0x88] sm:$0xff]  }
 0x4de   : > { %4977 = vmatprep.subr.bf16.mxu1 %v10262_v35  ;;  %v7613_v35 = vld [vmem:[#allocation9 + $0x90] sm:$0xff]  }
 0x4e1   : > { %4978 = vmatpush1.bf16.msra.mxu1 %v10263_v61  ;;  %v7614_v61 = vld [vmem:[#allocation9 + $0x98] sm:$0xff]  }
 0x4e2   : > { %4979 = vmatprep.subr.bf16.mxu1 %v10264_v57  ;;  %v7615_v57 = vld [vmem:[#allocation9 + $0xa0] sm:$0xff]  }
 0x4e5   : > { %4980 = vmatpush1.bf16.msra.mxu1 %v10265_v37  ;;  %v7616_v37 = vld [vmem:[#allocation9 + $0xa8] sm:$0xff]  }
 0x4e6   : > { %4981 = vmatprep.subr.bf16.mxu1 %v10266_v15  ;;  %v7617_v15 = vld [vmem:[#allocation9 + $0xb0] sm:$0xff]  }
 0x4e7   : > { %v4602_v9 = vpop.f32.mrb[24].mxu1 }
 0x4e8   : > { %v4611_v38 = vmax.f32 %v9438_v47, %v4602_v9  ;;  %v4604_v3 = vpop.f32.mrb[25].mxu1  ;;  %v10269_v47 = vld [vmem:[#allocation45_spill] sm:$0xff] }
 0x4e9   : > { %v4612_v17 = vmax.f32 %v9442_v53, %v4604_v3  ;;  %v4606_v32 = vpop.f32.mrb[26].mxu1  ;;  %4982 = vmatpush1.bf16.msra.mxu1 %v9431_v21  ;;  %v10270_v53 = vld [vmem:[#allocation46_spill] sm:$0xff]  ;;  %v10271_v21 = vrot.slane %v8675_v11, 1  ;;  %v10280_v11 = vld [vmem:[#allocation96_spill] sm:$0xff] }
 0x4ea   : > { %v4607_v31 = vpop.f32.mrb[27].mxu1  ;;  %4983 = vmatprep.subr.bf16.mxu1 %v9434_v25  ;;  %v4832_v0 = vmax.f32 %v4611_v38, %v9646_v7  ;;  %v10272_v25 = vld [vmem:[#allocation49_spill] sm:$0xff]  ;;  %v10273_v7 = vld [vmem:[#allocation50_spill] sm:$0xff] }
 0x4eb   : > { %v4833_v28 = vmax.f32 %v4612_v17, %v9649_v42  ;;  %v10275_v42 = vld [vmem:[#allocation53_spill] sm:$0xff]  ;;  %v7620_v3 = vld [vmem:[#allocation9 + $0xc8] sm:$0xff]   ;;  %v7621_v17 = vld [vmem:[#allocation9 + $0xd0] sm:$0xff]  }
 0x4ec   : > { %v7618_v9 = vld [vmem:[#allocation9 + $0xb8] sm:$0xff]   ;;  %v7619_v38 = vld [vmem:[#allocation9 + $0xc0] sm:$0xff]  }
 0x4ed   : > { %4984 = vmatpush1.bf16.msra.mxu1 %v9445_v2  ;;  %v10274_v2 = vld [vmem:[#allocation52_spill] sm:$0xff]  ;;  %v7623_v31 = vld [vmem:[#allocation9 + $0xe0] sm:$0xff]  }
 0x4ee   : > { %4985 = vmatprep.subr.bf16.mxu1 %v10267_v55  ;;  %v7622_v32 = vld [vmem:[#allocation9 + $0xd8] sm:$0xff]   ;;  %v7624_v55 = vld [vmem:[#allocation9 + $0xe8] sm:$0xff]  }
 0x4f1   : > { %4986 = vmatpush1.bf16.msra.mxu1 %v10268_v54  ;;  %v7625_v54 = vld [vmem:[#allocation9 + $0xf0] sm:$0xff]  }
 0x4f2   : > { %5002 = vmatprep.subr.bf16.mxu1 %v10269_v47  ;;  %v7626_v47 = vld [vmem:[#allocation9 + $0xf8] sm:$0xff]  }
 0x4f4   : > { %4992 = vmatmul.mubr.bf16.vlgmr.msra.gmra.mrb[28].mxu1 %v10133_v19  ;;  %v10278_v19 = vld [vmem:[#allocation58_spill] sm:$0xff] }
 0x4f5   : > { %5003 = vmatpush1.bf16.msra.mxu1 %v10270_v53  ;;  %6716 = vmatprep.mubr.msk.bf16.mxu1 %vm2652_vm5, %v10271_v21  ;;  %v7627_v53 = vld [vmem:[#allocation9 + $0x100] sm:$0xff]   ;;  %v7628_v21 = vld [vmem:[#allocation9 + $0x108] sm:$0xff]  }
 0x4f6   : > { %5004 = vmatprep.subr.bf16.mxu1 %v10272_v25  ;;  %v7629_v25 = vld [vmem:[#allocation9 + $0x110] sm:$0xff]  }
 0x4f9   : > { %5005 = vmatpush1.bf16.msra.mxu1 %v10273_v7  ;;  %v7630_v7 = vld [vmem:[#allocation9 + $0x118] sm:$0xff]  }
 0x4fa   : > { %5006 = vmatprep.subr.bf16.mxu1 %v9475_v63  ;;  %v10284_v63 = vld [vmem:[#allocation100_spill] sm:$0xff] }
 0x4fd   : > { %5007 = vmatpush1.bf16.msra.mxu1 %v10274_v2  ;;  %v7631_v2 = vld [vmem:[#allocation9 + $0x120] sm:$0xff]  }
 0x4fe   : > { %5008 = vmatprep.subr.bf16.mxu1 %v10275_v42  ;;  %v7632_v42 = vld [vmem:[#allocation9 + $0x128] sm:$0xff]  }
 0x501   : > { %5009 = vmatpush1.bf16.msra.mxu1 %v10276_v30  ;;  %v7633_v30 = vld [vmem:[#allocation9 + $0x130] sm:$0xff]  }
 0x502   : > { %5010 = vmatprep.subr.bf16.mxu1 %v10277_v58  ;;  %v7634_v58 = vld [vmem:[#allocation9 + $0x138] sm:$0xff]  }
 0x505   : > { %5011 = vmatpush1.bf16.msra.mxu1 %v10278_v19  ;;  %v7635_v19 = vld [vmem:[#allocation9 + $0x140] sm:$0xff]  }
 0x506   : > { %5012 = vmatprep.subr.bf16.mxu1 %v10279_v40  ;;  %v7636_v40 = vld [vmem:[#allocation9 + $0x148] sm:$0xff]  }
 0x509   : > { %5013 = vmatpush1.bf16.msra.mxu1 %v10280_v11  ;;  %v7637_v11 = vld [vmem:[#allocation9 + $0x150] sm:$0xff]  }
 0x50a   : > { %5014 = vmatprep.subr.bf16.mxu1 %v10281_v41 }
 0x50d   : > { %5015 = vmatpush1.bf16.msra.mxu1 %v10282_v45 }
 0x50e   : > { %5016 = vmatprep.subr.bf16.mxu1 %v10283_v44  ;;  %v7638_v44 = vld [vmem:[#allocation9 + $0x158] sm:$0xff]  }
 0x511   : > { %5017 = vmatpush1.bf16.msra.mxu1 %v10284_v63  ;;  %v7639_v63 = vld [vmem:[#allocation9 + $0x160] sm:$0xff]  }
 0x512   : > { %5018 = vmatprep.subr.bf16.mxu1 %v10285_v48  ;;  %v7640_v48 = vld [vmem:[#allocation9 + $0x168] sm:$0xff]  }
 0x515   : > { %5019 = vmatpush1.bf16.msra.mxu1 %v10286_v49  ;;  %v7641_v49 = vld [vmem:[#allocation9 + $0x170] sm:$0xff]  }
 0x516   : > { %5020 = vmatprep.subr.bf16.mxu1 %v10287_v60  ;;  %v7642_v60 = vld [vmem:[#allocation9 + $0x178] sm:$0xff]  }
 0x519   : > { %5021 = vmatpush1.bf16.msra.mxu1 %v10288_v62  ;;  %v7643_v62 = vld [vmem:[#allocation9 + $0x180] sm:$0xff]  }
 0x51a   : > { %5022 = vmatprep.subr.bf16.mxu1 %v10289_v5  ;;  %v7644_v5 = vld [vmem:[#allocation9 + $0x188] sm:$0xff]  }
 0x51d   : > { %5023 = vmatpush1.bf16.msra.mxu1 %v9531_v33  ;;  %v7608_v33 = vld [vmem:[#allocation9 + $0x68] sm:$0xff]  }
 0x51e   : > { %5024 = vmatprep.subr.bf16.mxu1 %v9534_v8  ;;  %5208 = vmatpush1.bf16.msra.mxu0 %v7608_v33  ;;  %v10292_v8 = vld [vmem:[#allocation17_spill] sm:$0xff]  ;;  %v7648_v33 = vld [vmem:[#allocation9 + $0x1a8] sm:$0xff]  }
 0x51f   : > { %5344 = vmatprep.subr.bf16.mxu0 %v10185_v34 }
 0x521   : > { %5025 = vmatpush1.bf16.msra.mxu1 %v9537_v29  ;;  %v5047_v29 = vld [vmem:[#allocation7] sm:$0x3] }
 0x522   : > { %5026 = vmatprep.subr.bf16.mxu1 %v9540_v59  ;;  %v5052_v59 = vrot.slane %v5047_v29, %v10292_v8 }
 0x525   : > { %5027 = vmatpush1.bf16.msra.mxu1 %v9543_v56  ;;  %v10293_v56 = vld [vmem:[#allocation16_spill] sm:$0xff] }
 0x526   : > { %5028 = vmatprep.subr.bf16.mxu1 %v9546_v4  ;;  %v10294_v10 = vsub.s32 1, %v10293_v56 }
 0x528   : > { %v5056_v4 = vrot.slane %v5047_v29, %v10294_v10  ;;  %v7649_v29 = vld [vmem:[#allocation9 + $0x1b0] sm:$0xff]  }
 0x529   : > { %5029 = vmatpush1.bf16.msra.mxu1 %v9549_v24 }
 0x52c   : > { %5035 = vmatmul.mubr.bf16.vlgmr.msra.gmra.mrb[28].mxu1 %v10291_v1  ;;  %v7646_v1 = vld [vmem:[#allocation9 + $0x198] sm:$0xff]  }
 0x5ff   : > { %v5036_v12 = vpop.f32.mrb[28].mxu1 }
 0x600   : > { %v5045_v18 = vmax.f32 %v4832_v0, %v5036_v12  ;;  %v5038_v24 = vpop.f32.mrb[29].mxu1  ;;  %v7651_v12 = vld [vmem:[#allocation9 + $0x1c0] sm:$0xff]  }
 0x601   : > { %v5046_v26 = vmax.f32 %v4833_v28, %v5038_v24  ;;  %v5040_v20 = vpop.f32.mrb[30].mxu1  ;;  %v7654_v24 = vld [vmem:[#allocation9 + $0x1d8] sm:$0xff]  }
 0x602   : > { %v5059_v39 = vadd.f32 %v5052_v59, %v5045_v18  ;;  %v5041_v51 = vpop.f32.mrb[31].mxu1  ;;  %v7650_v59 = vld [vmem:[#allocation9 + $0x1b8] sm:$0xff]   ;;  %v7653_v18 = vld [vmem:[#allocation9 + $0x1d0] sm:$0xff]   ;;  %v7656_v20 = vld [vmem:[#allocation9 + $0x1e8] sm:$0xff]  }
 0x603   : > { %v5060_v50 = vadd.f32 %v5056_v4, %v5046_v26  ;;  %v7652_v4 = vld [vmem:[#allocation9 + $0x1c8] sm:$0xff]   ;;  %v7655_v26 = vld [vmem:[#allocation9 + $0x1e0] sm:$0xff]   ;;  %v7658_v51 = vld [vmem:[#allocation9 + $0x1f8] sm:$0xff]  }
 0x604   : > { %v5061_v14 = vmax.f32 %v5059_v39, 0.0  ;;  %v7657_v39 = vld [vmem:[#allocation9 + $0x1f0] sm:$0xff]  }
 0x605   : > { %v5062_v16 = vmax.f32 %v5060_v50, 0.0  ;;  %v7659_v50 = vld [vmem:[#allocation9 + $0x200] sm:$0xff]  }
 0x606   : > { %v9739_v43 = vpack.c.bf16 %v5061_v14, %v5061_v14  ;;  %v7660_v14 = vld [vmem:[#allocation9 + $0x208] sm:$0xff]  }
 0x607   : > { %v9737_v23 = vpack.c.bf16 %v5062_v16, %v5062_v16  ;;  %v7661_v16 = vld [vmem:[#allocation9 + $0x210] sm:$0xff]  }
 0x608   : > { %v9763_v0 = vshrl.u32 %v9739_v43, 16  ;;  %v5416_v41 = vrot.slane %v9739_v43, 1 }
 0x609   : > { %6731 = vmatprep.mubr.msk.bf16.mxu0 %vm2652_vm5, %v9737_v23  ;;  %v9744_v22 = vshrl.u32 %v9737_v23, 16  ;;  %v5417_v28 = vrot.slane %v9737_v23, 1  ;;  %v5737_v10 = vrot.slane %v9737_v23, 2 }
 0x60a   : > { %5214 = vmatmul.mubr.bf16.vlgmr.msra.gmra.mrb[24].mxu0 %v9739_v43  ;;  %v5576_v56 = vrot.slane %v9763_v0, 1 }
 0x60b   : > { %5345 = vmatpush1.bf16.msra.mxu0 %v7609_v46  ;;  %6746 = vmatprep.mubr.msk.bf16.mxu0 %vm2652_vm5, %v9744_v22  ;;  %v5577_v45 = vrot.slane %v9744_v22, 1  ;;  %v7662_v46 = vld [vmem:[#allocation9 + $0x218] sm:$0xff]  }
 0x60c   : > { %5346 = vmatprep.subr.bf16.mxu0 %v10185_v34 }
 0x60f   : > { %5347 = vmatpush1.bf16.msra.mxu0 %v7610_v36  ;;  %v7663_v36 = vld [vmem:[#allocation9 + $0x220] sm:$0xff]  }
 0x610   : > { %5348 = vmatprep.subr.bf16.mxu0 %v10185_v34 }
 0x613   : > { %5349 = vmatpush1.bf16.msra.mxu0 %v7611_v6  ;;  %v7664_v6 = vld [vmem:[#allocation9 + $0x228] sm:$0xff]  }
 0x614   : > { %5350 = vmatprep.subr.bf16.mxu0 %v10185_v34 }
 0x617   : > { %5351 = vmatpush1.bf16.msra.mxu0 %v7612_v13  ;;  %v7665_v13 = vld [vmem:[#allocation9 + $0x230] sm:$0xff]  }
 0x618   : > { %5352 = vmatprep.subr.bf16.mxu0 %v10185_v34 }
 0x61b   : > { %5353 = vmatpush1.bf16.msra.mxu0 %v7613_v35  ;;  %v5736_v35 = vrot.slane %v9739_v43, 2 }
 0x61c   : > { %5354 = vmatprep.subr.bf16.mxu0 %v10185_v34 }
 0x61f   : > { %5355 = vmatpush1.bf16.msra.mxu0 %v7614_v61  ;;  %v5897_v61 = vrot.slane %v9744_v22, 2  ;;  %v7670_v22 = vld [vmem:[#allocation9 + $0x258] sm:$0xff]  }
 0x620   : > { %5356 = vmatprep.subr.bf16.mxu0 %v10185_v34 }
 0x623   : > { %5357 = vmatpush1.bf16.msra.mxu0 %v7615_v57  ;;  %v7666_v57 = vld [vmem:[#allocation9 + $0x238] sm:$0xff]  }
 0x624   : > { %5358 = vmatprep.subr.bf16.mxu0 %v10185_v34 }
 0x627   : > { %5359 = vmatpush1.bf16.msra.mxu0 %v7616_v37  ;;  %v7667_v37 = vld [vmem:[#allocation9 + $0x240] sm:$0xff]  }
 0x628   : > { %5360 = vmatprep.subr.bf16.mxu0 %v10185_v34 }
 0x62b   : > { %5361 = vmatpush1.bf16.msra.mxu0 %v7617_v15  ;;  %v7668_v15 = vld [vmem:[#allocation9 + $0x248] sm:$0xff]  }
 0x62c   : > { %5362 = vmatprep.subr.bf16.mxu0 %v10185_v34 }
 0x62f   : > { %5363 = vmatpush1.bf16.msra.mxu0 %v7618_v9  ;;  %v7669_v9 = vld [vmem:[#allocation9 + $0x250] sm:$0xff]  }
 0x630   : > { %5364 = vmatprep.subr.bf16.mxu0 %v10185_v34 }
 0x633   : > { %5365 = vmatpush1.bf16.msra.mxu0 %v7619_v38  ;;  %v7671_v38 = vld [vmem:[#allocation9 + $0x260] sm:$0xff]  }
 0x634   : > { %5366 = vmatprep.subr.bf16.mxu0 %v10185_v34 }
 0x637   : > { %5367 = vmatpush1.bf16.msra.mxu0 %v7620_v3  ;;  %v7672_v3 = vld [vmem:[#allocation9 + $0x268] sm:$0xff]  }
 0x638   : > { %5368 = vmatprep.subr.bf16.mxu0 %v10185_v34 }
 0x63b   : > { %5369 = vmatpush1.bf16.msra.mxu0 %v7621_v17  ;;  %v7673_v17 = vld [vmem:[#allocation9 + $0x270] sm:$0xff]  }
 0x63c   : > { %5370 = vmatprep.subr.bf16.mxu0 %v10185_v34 }
 0x63f   : > { %5371 = vmatpush1.bf16.msra.mxu0 %v7622_v32  ;;  %v7674_v32 = vld [vmem:[#allocation9 + $0x278] sm:$0xff]  }
 0x640   : > { %5506 = vmatprep.subr.bf16.mxu0 %v10185_v34 }
 0x642   : > { %5377 = vmatmul.mubr.bf16.vlgmr.msra.gmra.mrb[24].mxu0 %v9763_v0 }
 0x643   : > { %5507 = vmatpush1.bf16.msra.mxu0 %v7623_v31  ;;  %6761 = vmatprep.mubr.msk.bf16.mxu0 %vm2652_vm5, %v5417_v28  ;;  %v7675_v31 = vld [vmem:[#allocation9 + $0x280] sm:$0xff]   ;;  %v7676_v28 = vld [vmem:[#allocation9 + $0x288] sm:$0xff]  }
 0x644   : > { %5508 = vmatprep.subr.bf16.mxu0 %v10185_v34 }
 0x647   : > { %5509 = vmatpush1.bf16.msra.mxu0 %v7624_v55  ;;  %v7677_v55 = vld [vmem:[#allocation9 + $0x290] sm:$0xff]  }
 0x648   : > { %5510 = vmatprep.subr.bf16.mxu0 %v10185_v34 }
 0x64b   : > { %5511 = vmatpush1.bf16.msra.mxu0 %v7625_v54  ;;  %v7678_v54 = vld [vmem:[#allocation9 + $0x298] sm:$0xff]  }
 0x64c   : > { %5512 = vmatprep.subr.bf16.mxu0 %v10185_v34 }
 0x64f   : > { %5513 = vmatpush1.bf16.msra.mxu0 %v7626_v47  ;;  %v7679_v47 = vld [vmem:[#allocation9 + $0x2a0] sm:$0xff]  }
 0x650   : > { %5514 = vmatprep.subr.bf16.mxu0 %v10185_v34 }
 0x653   : > { %5515 = vmatpush1.bf16.msra.mxu0 %v7627_v53  ;;  %v5896_v53 = vrot.slane %v9763_v0, 2  ;;  %v7683_v0 = vld [vmem:[#allocation9 + $0x2c0] sm:$0xff]  }
 0x654   : > { %5516 = vmatprep.subr.bf16.mxu0 %v10185_v34 }
 0x657   : > { %5517 = vmatpush1.bf16.msra.mxu0 %v7628_v21  ;;  %v6057_v21 = vrot.slane %v9737_v23, 3  ;;  %v7684_v23 = vld [vmem:[#allocation9 + $0x2c8] sm:$0xff]  }
 0x658   : > { %5518 = vmatprep.subr.bf16.mxu0 %v10185_v34 }
 0x65b   : > { %5519 = vmatpush1.bf16.msra.mxu0 %v7629_v25  ;;  %v7680_v25 = vld [vmem:[#allocation9 + $0x2a8] sm:$0xff]  }
 0x65c   : > { %5520 = vmatprep.subr.bf16.mxu0 %v10185_v34 }
 0x65f   : > { %5521 = vmatpush1.bf16.msra.mxu0 %v7630_v7  ;;  %v7681_v7 = vld [vmem:[#allocation9 + $0x2b0] sm:$0xff]  }
 0x660   : > { %5522 = vmatprep.subr.bf16.mxu0 %v10185_v34 }
 0x663   : > { %5523 = vmatpush1.bf16.msra.mxu0 %v7631_v2  ;;  %v7682_v2 = vld [vmem:[#allocation9 + $0x2b8] sm:$0xff]  }
 0x664   : > { %5524 = vmatprep.subr.bf16.mxu0 %v10185_v34 }
 0x667   : > { %5525 = vmatpush1.bf16.msra.mxu0 %v7632_v42  ;;  %v7685_v42 = vld [vmem:[#allocation9 + $0x2d0] sm:$0xff]  }
 0x668   : > { %5526 = vmatprep.subr.bf16.mxu0 %v10185_v34 }
 0x66b   : > { %5527 = vmatpush1.bf16.msra.mxu0 %v7633_v30  ;;  %v7686_v30 = vld [vmem:[#allocation9 + $0x2d8] sm:$0xff]  }
 0x66c   : > { %5528 = vmatprep.subr.bf16.mxu0 %v10185_v34 }
 0x66f   : > { %5529 = vmatpush1.bf16.msra.mxu0 %v7634_v58  ;;  %v7687_v58 = vld [vmem:[#allocation9 + $0x2e0] sm:$0xff]  }
 0x670   : > { %5530 = vmatprep.subr.bf16.mxu0 %v10185_v34 }
 0x673   : > { %5531 = vmatpush1.bf16.msra.mxu0 %v7635_v19  ;;  %v7688_v19 = vld [vmem:[#allocation9 + $0x2e8] sm:$0xff]  }
 0x674   : > { %5532 = vmatprep.subr.bf16.mxu0 %v10185_v34 }
 0x677   : > { %5533 = vmatpush1.bf16.msra.mxu0 %v7636_v40  ;;  %v7689_v40 = vld [vmem:[#allocation9 + $0x2f0] sm:$0xff]  }
 0x678   : > { %5666 = vmatprep.subr.bf16.mxu0 %v10185_v34 }
 0x67a   : > { %5539 = vmatmul.mubr.bf16.vlgmr.msra.gmra.mrb[24].mxu0 %v5416_v41  ;;  %v7691_v41 = vld [vmem:[#allocation9 + $0x300] sm:$0xff]  }
 0x67b   : > { %5667 = vmatpush1.bf16.msra.mxu0 %v7637_v11  ;;  %6776 = vmatprep.mubr.msk.bf16.mxu0 %vm2652_vm5, %v5577_v45  ;;  %v7690_v11 = vld [vmem:[#allocation9 + $0x2f8] sm:$0xff]   ;;  %v7692_v45 = vld [vmem:[#allocation9 + $0x308] sm:$0xff]  }
 0x67c   : > { %5668 = vmatprep.subr.bf16.mxu0 %v10185_v34 }
 0x67f   : > { %5669 = vmatpush1.bf16.msra.mxu0 %v7638_v44  ;;  %v6056_v44 = vrot.slane %v9739_v43, 3 }
 0x680   : > { %5670 = vmatprep.subr.bf16.mxu0 %v10185_v34 }
 0x683   : > { %5671 = vmatpush1.bf16.msra.mxu0 %v7639_v63  ;;  %v5065_v63 = vld [vmem:[#allocation10] sm:$0x1] }
 0x684   : > { %5672 = vmatprep.subr.bf16.mxu0 %v10185_v34 }
 0x687   : > { %5673 = vmatpush1.bf16.msra.mxu0 %v7640_v48 }
 0x688   : > { %5674 = vmatprep.subr.bf16.mxu0 %v10185_v34 }
 0x68b   : > { %5675 = vmatpush1.bf16.msra.mxu0 %v7641_v49 }
 0x68c   : > { %5676 = vmatprep.subr.bf16.mxu0 %v10185_v34 }
 0x68f   : > { %5677 = vmatpush1.bf16.msra.mxu0 %v7642_v60 }
 0x690   : > { %5678 = vmatprep.subr.bf16.mxu0 %v10185_v34 }
 0x693   : > { %5679 = vmatpush1.bf16.msra.mxu0 %v7643_v62 }
 0x694   : > { %5680 = vmatprep.subr.bf16.mxu0 %v10185_v34 }
 0x697   : > { %5681 = vmatpush1.bf16.msra.mxu0 %v7644_v5 }
 0x698   : > { %5682 = vmatprep.subr.bf16.mxu0 %v10185_v34 }
 0x69b   : > { %5683 = vmatpush1.bf16.msra.mxu0 %v7645_v52 }
 0x69c   : > { %5684 = vmatprep.subr.bf16.mxu0 %v10185_v34 }
 0x69f   : > { %5685 = vmatpush1.bf16.msra.mxu0 %v7646_v1 }
 0x6a0   : > { %5686 = vmatprep.subr.bf16.mxu0 %v10185_v34 }
 0x6a3   : > { %5687 = vmatpush1.bf16.msra.mxu0 %v7647_v27 }
 0x6a4   : > { %5688 = vmatprep.subr.bf16.mxu0 %v10185_v34 }
 0x6a7   : > { %5689 = vmatpush1.bf16.msra.mxu0 %v7648_v33 }
 0x6a8   : > { %5690 = vmatprep.subr.bf16.mxu0 %v10185_v34 }
 0x6ab   : > { %5691 = vmatpush1.bf16.msra.mxu0 %v7649_v29 }
 0x6ac   : > { %5692 = vmatprep.subr.bf16.mxu0 %v10185_v34 }
 0x6af   : > { %5693 = vmatpush1.bf16.msra.mxu0 %v7650_v59 }
 0x6b0   : > { %5826 = vmatprep.subr.bf16.mxu0 %v10185_v34 }
 0x6b2   : > { %5699 = vmatmul.mubr.bf16.vlgmr.msra.gmra.mrb[24].mxu0 %v5576_v56 }
 0x6b3   : > { %5827 = vmatpush1.bf16.msra.mxu0 %v7651_v12  ;;  %6791 = vmatprep.mubr.msk.bf16.mxu0 %vm2652_vm5, %v5737_v10 }
 0x6b4   : > { %5828 = vmatprep.subr.bf16.mxu0 %v10185_v34 }
 0x6b7   : > { %5829 = vmatpush1.bf16.msra.mxu0 %v7652_v4 }
 0x6b8   : > { %5830 = vmatprep.subr.bf16.mxu0 %v10185_v34 }
 0x6bb   : > { %5831 = vmatpush1.bf16.msra.mxu0 %v7653_v18 }
 0x6bc   : > { %5832 = vmatprep.subr.bf16.mxu0 %v10185_v34 }
 0x6bf   : > { %5833 = vmatpush1.bf16.msra.mxu0 %v7654_v24 }
 0x6c0   : > { %5834 = vmatprep.subr.bf16.mxu0 %v10185_v34 }
 0x6c3   : > { %5835 = vmatpush1.bf16.msra.mxu0 %v7655_v26 }
 0x6c4   : > { %5836 = vmatprep.subr.bf16.mxu0 %v10185_v34 }
 0x6c7   : > { %5837 = vmatpush1.bf16.msra.mxu0 %v7656_v20 }
 0x6c8   : > { %5838 = vmatprep.subr.bf16.mxu0 %v10185_v34 }
 0x6cb   : > { %5839 = vmatpush1.bf16.msra.mxu0 %v7657_v39 }
 0x6cc   : > { %5840 = vmatprep.subr.bf16.mxu0 %v10185_v34 }
 0x6cf   : > { %5841 = vmatpush1.bf16.msra.mxu0 %v7658_v51 }
 0x6d0   : > { %5842 = vmatprep.subr.bf16.mxu0 %v10185_v34 }
 0x6d3   : > { %5843 = vmatpush1.bf16.msra.mxu0 %v7659_v50 }
 0x6d4   : > { %5844 = vmatprep.subr.bf16.mxu0 %v10185_v34 }
 0x6d7   : > { %5845 = vmatpush1.bf16.msra.mxu0 %v7660_v14 }
 0x6d8   : > { %5846 = vmatprep.subr.bf16.mxu0 %v10185_v34 }
 0x6db   : > { %5847 = vmatpush1.bf16.msra.mxu0 %v7661_v16 }
 0x6dc   : > { %5848 = vmatprep.subr.bf16.mxu0 %v10185_v34 }
 0x6df   : > { %5849 = vmatpush1.bf16.msra.mxu0 %v7662_v46 }
 0x6e0   : > { %5850 = vmatprep.subr.bf16.mxu0 %v10185_v34 }
 0x6e3   : > { %5851 = vmatpush1.bf16.msra.mxu0 %v7663_v36 }
 0x6e4   : > { %5852 = vmatprep.subr.bf16.mxu0 %v10185_v34 }
 0x6e7   : > { %5853 = vmatpush1.bf16.msra.mxu0 %v7664_v6 }
 0x6e8   : > { %5986 = vmatprep.subr.bf16.mxu0 %v10185_v34 }
 0x6ea   : > { %5859 = vmatmul.mubr.bf16.vlgmr.msra.gmra.mrb[24].mxu0 %v5736_v35 }
 0x6eb   : > { %5987 = vmatpush1.bf16.msra.mxu0 %v7665_v13  ;;  %6806 = vmatprep.mubr.msk.bf16.mxu0 %vm2652_vm5, %v5897_v61 }
 0x6ec   : > { %5988 = vmatprep.subr.bf16.mxu0 %v10185_v34 }
 0x6ef   : > { %5989 = vmatpush1.bf16.msra.mxu0 %v7666_v57 }
 0x6f0   : > { %5990 = vmatprep.subr.bf16.mxu0 %v10185_v34 }
 0x6f3   : > { %5991 = vmatpush1.bf16.msra.mxu0 %v7667_v37 }
 0x6f4   : > { %5992 = vmatprep.subr.bf16.mxu0 %v10185_v34 }
 0x6f7   : > { %5993 = vmatpush1.bf16.msra.mxu0 %v7668_v15 }
 0x6f8   : > { %5994 = vmatprep.subr.bf16.mxu0 %v10185_v34 }
 0x6fb   : > { %5995 = vmatpush1.bf16.msra.mxu0 %v7669_v9 }
 0x6fc   : > { %5996 = vmatprep.subr.bf16.mxu0 %v10185_v34 }
 0x6ff   : > { %5997 = vmatpush1.bf16.msra.mxu0 %v7670_v22 }
 0x700   : > { %5998 = vmatprep.subr.bf16.mxu0 %v10185_v34 }
 0x703   : > { %5999 = vmatpush1.bf16.msra.mxu0 %v7671_v38 }
 0x704   : > { %6000 = vmatprep.subr.bf16.mxu0 %v10185_v34 }
 0x707   : > { %6001 = vmatpush1.bf16.msra.mxu0 %v7672_v3 }
 0x708   : > { %6002 = vmatprep.subr.bf16.mxu0 %v10185_v34 }
 0x70b   : > { %6003 = vmatpush1.bf16.msra.mxu0 %v7673_v17 }
 0x70c   : > { %6004 = vmatprep.subr.bf16.mxu0 %v10185_v34 }
 0x70f   : > { %6005 = vmatpush1.bf16.msra.mxu0 %v7674_v32 }
 0x710   : > { %6006 = vmatprep.subr.bf16.mxu0 %v10185_v34 }
 0x713   : > { %6007 = vmatpush1.bf16.msra.mxu0 %v7675_v31 }
 0x714   : > { %6008 = vmatprep.subr.bf16.mxu0 %v10185_v34 }
 0x717   : > { %6009 = vmatpush1.bf16.msra.mxu0 %v7676_v28 }
 0x718   : > { %6010 = vmatprep.subr.bf16.mxu0 %v10185_v34 }
 0x71b   : > { %6011 = vmatpush1.bf16.msra.mxu0 %v7677_v55 }
 0x71c   : > { %6012 = vmatprep.subr.bf16.mxu0 %v10185_v34 }
 0x71f   : > { %6013 = vmatpush1.bf16.msra.mxu0 %v7678_v54 }
 0x720   : > { %6146 = vmatprep.subr.bf16.mxu0 %v10185_v34 }
 0x722   : > { %6019 = vmatmul.mubr.bf16.vlgmr.msra.gmra.mrb[24].mxu0 %v5896_v53 }
 0x723   : > { %6147 = vmatpush1.bf16.msra.mxu0 %v7679_v47  ;;  %6821 = vmatprep.mubr.msk.bf16.mxu0 %vm2652_vm5, %v6057_v21 }
 0x724   : > { %6148 = vmatprep.subr.bf16.mxu0 %v10185_v34 }
 0x727   : > { %6149 = vmatpush1.bf16.msra.mxu0 %v7680_v25 }
 0x728   : > { %6150 = vmatprep.subr.bf16.mxu0 %v10185_v34 }
 0x72b   : > { %6151 = vmatpush1.bf16.msra.mxu0 %v7681_v7 }
 0x72c   : > { %6152 = vmatprep.subr.bf16.mxu0 %v10185_v34 }
 0x72f   : > { %6153 = vmatpush1.bf16.msra.mxu0 %v7682_v2 }
 0x730   : > { %6154 = vmatprep.subr.bf16.mxu0 %v10185_v34 }
 0x733   : > { %6155 = vmatpush1.bf16.msra.mxu0 %v7683_v0 }
 0x734   : > { %6156 = vmatprep.subr.bf16.mxu0 %v10185_v34 }
 0x737   : > { %6157 = vmatpush1.bf16.msra.mxu0 %v7684_v23 }
 0x738   : > { %6158 = vmatprep.subr.bf16.mxu0 %v10185_v34 }
 0x73b   : > { %6159 = vmatpush1.bf16.msra.mxu0 %v7685_v42 }
 0x73c   : > { %6160 = vmatprep.subr.bf16.mxu0 %v10185_v34 }
 0x73f   : > { %6161 = vmatpush1.bf16.msra.mxu0 %v7686_v30 }
 0x740   : > { %6162 = vmatprep.subr.bf16.mxu0 %v10185_v34 }
 0x743   : > { %6163 = vmatpush1.bf16.msra.mxu0 %v7687_v58 }
 0x744   : > { %6164 = vmatprep.subr.bf16.mxu0 %v10185_v34 }
 0x747   : > { %6165 = vmatpush1.bf16.msra.mxu0 %v7688_v19 }
 0x748   : > { %6166 = vmatprep.subr.bf16.mxu0 %v10185_v34 }
 0x74b   : > { %6167 = vmatpush1.bf16.msra.mxu0 %v7689_v40 }
 0x74c   : > { %6168 = vmatprep.subr.bf16.mxu0 %v10185_v34 }
 0x74f   : > { %6169 = vmatpush1.bf16.msra.mxu0 %v7690_v11 }
 0x750   : > { %6170 = vmatprep.subr.bf16.mxu0 %v10185_v34 }
 0x753   : > { %6171 = vmatpush1.bf16.msra.mxu0 %v7691_v41 }
 0x754   : > { %6172 = vmatprep.subr.bf16.mxu0 %v10185_v34 }
 0x757   : > { %6173 = vmatpush1.bf16.msra.mxu0 %v7692_v45 }
 0x75a   : > { %6179 = vmatmul.mubr.bf16.vlgmr.msra.gmra.mrb[24].mxu0 %v6056_v44 }
 0x82d   : > { %v6180_v48 = vpop.f32.mrb[24].mxu0 }
 0x82e   : > { %v6828_v49 = vadd.f32 %v6180_v48, %v5065_v63  ;;  %v6182_v60 = vpop.f32.mrb[25].mxu0 }
 0x82f   : > { %v6183_v62 = vpop.f32.mrb[26].mxu0 }
 0x830   : > { %v6191_v5 = vrot.slane %v6828_v49, %v10292_v8  ;;  %v6184_v52 = vpop.f32.mrb[27].mxu0 }
 0x832   : > { %6193 = vst [vmem:[%s360_s21] sm:$0xff] %v6191_v5 }
 0x833 PF: > { %s21_s24 = sadd.s32 1, %s7953_s24  }
 0x834   : > { %p18_p10 = scmp.ge.s32.totalorder %s21_s24, 4  }
 0x836   :  { %20 = sbr.rel (!%p18_p10) target bundleno = 4 (0x4), region = 127 }
 0x83d   :  { %6213 = vsyncpa [#allocation3], 1 }
 0x83e   :  { %6215 = vsyncpa [#allocation3 + $0x1], 1 }
 0x83f   :  { %6216 = vsyncpa [#allocation5], 1 }
 0x840   :  { %6217 = vsyncpa [#allocation8], 1 }
 0x841   :  { %6218 = vsyncpa [#allocation11], 1 }

</bundles_post_ra>
